<compile_context>
chip_gen: v6e
topology: v6e:2x2x1
jax: 0.10.0
libtpu: 0.0.40
codegen_flags: <defaults>
</compile_context>

<pallas_src>
import functools
import math

import jax
import jax.numpy as jnp
from jax.experimental import pallas as pl
from jax.experimental.pallas import tpu as pltpu


_LANE = 128
_SUBLANE = 8
_NEG_INF = -1e30


def _round_up(x, m):
    return ((x + m - 1) // m) * m


def _sigmoid_tanh(x):
    # sigmoid via tanh: one EUP op, no divide on the VPU path.
    return 0.5 * (jnp.tanh(0.5 * x) + 1.0)


# --------------------------------------------------------------------------
# Fused kernel: all LSTM layers + relu -> FC -> masked softmax.
# --------------------------------------------------------------------------
def _fused_lstm_net_kernel(*args, t_len, bp, hp, num_layers):
    n_in = 1 + 3 * num_layers + 2
    x_ref = args[0]                                   # (T*Bp, Dp), time-major
    layer_refs = [tuple(args[1 + 3 * l: 1 + 3 * (l + 1)])
                  for l in range(num_layers)]         # (w_ih, w_hh, bias) each
    w_fc_ref = args[n_in - 2]                         # (Hp, Op)
    b_fc_ref = args[n_in - 1]                         # (1, Op), pad classes = -1e30
    o_ref = args[n_in]                                # (Bp, Op)
    seq_scr = args[n_in + 1]                          # (T*Bp, Hp)  inter-layer seq
    gih_scr = args[n_in + 2]                          # (T*Bp, 4Hp) hoisted x@W_ih

    cur_in = x_ref                                    # layer 0 input; then seq_scr
    h = jnp.zeros((bp, hp), jnp.float32)

    for layer, (w_ih_ref, w_hh_ref, b_ref) in enumerate(layer_refs):
        is_last = layer == num_layers - 1

        # Hoisted input-to-hidden projection for the entire sequence at once.
        gih_scr[...] = (
            jnp.dot(cur_in[...], w_ih_ref[...],
                    preferred_element_type=jnp.float32)
            + b_ref[...]
        )

        w_hh = w_hh_ref[...]                          # keep VMEM-resident weight load hoisted
        h = jnp.zeros((bp, hp), jnp.float32)
        c = jnp.zeros((bp, hp), jnp.float32)
        for t in range(t_len):                        # fully unrolled, static slices
            gates = gih_scr[t * bp:(t + 1) * bp, :] + jnp.dot(
                h, w_hh, preferred_element_type=jnp.float32)
            i_g = _sigmoid_tanh(gates[:, 0 * hp:1 * hp])
            f_g = _sigmoid_tanh(gates[:, 1 * hp:2 * hp])
            g_g = jnp.tanh(gates[:, 2 * hp:3 * hp])
            o_g = _sigmoid_tanh(gates[:, 3 * hp:4 * hp])
            c = f_g * c + i_g * g_g
            h = o_g * jnp.tanh(c)
            if not is_last:                           # last layer: only h@T-1 is needed
                seq_scr[t * bp:(t + 1) * bp, :] = h
        cur_in = seq_scr

    # Head: relu -> FC -> softmax (class mask baked into padded FC bias).
    hr = jnp.maximum(h, 0.0)
    logits = jnp.dot(hr, w_fc_ref[...],
                     preferred_element_type=jnp.float32) + b_fc_ref[...]
    m = jnp.max(logits, axis=-1, keepdims=True)
    e = jnp.exp(logits - m)
    s = jnp.sum(e, axis=-1, keepdims=True)
    o_ref[...] = e / s


# --------------------------------------------------------------------------
# Parameter init (PyTorch-style layout) + one-time TPU layout preparation.
# --------------------------------------------------------------------------
def init_lstm_net_params(key, dim_input, dim_recurrent, num_layers, dim_output):
    """Deterministic init mimicking nn.LSTM / nn.Linear defaults: U(-k, k), k=1/sqrt(H)."""
    k = 1.0 / math.sqrt(dim_recurrent)
    params = {"lstm": [], "fc": None}
    for layer in range(num_layers):
        d_in = dim_input if layer == 0 else dim_recurrent
        key, k1, k2, k3, k4 = jax.random.split(key, 5)
        w_ih = jax.random.uniform(k1, (4 * dim_recurrent, d_in), jnp.float32, -k, k)
        w_hh = jax.random.uniform(k2, (4 * dim_recurrent, dim_recurrent), jnp.float32, -k, k)
        b_ih = jax.random.uniform(k3, (4 * dim_recurrent,), jnp.float32, -k, k)
        b_hh = jax.random.uniform(k4, (4 * dim_recurrent,), jnp.float32, -k, k)
        params["lstm"].append((w_ih, w_hh, b_ih, b_hh))
    key, k5, k6 = jax.random.split(key, 3)
    w_fc = jax.random.uniform(k5, (dim_output, dim_recurrent), jnp.float32, -k, k)
    b_fc = jax.random.uniform(k6, (dim_output,), jnp.float32, -k, k)
    params["fc"] = (w_fc, b_fc)
    return params


def _pad_gate_blocks(w_t, h, hp):
    """w_t: (rows, 4*h) -> (rows, 4*hp), zero-padding each of the i|f|g|o blocks."""
    blocks = jnp.split(w_t, 4, axis=-1)
    return jnp.concatenate(
        [jnp.pad(blk, ((0, 0), (0, hp - h))) for blk in blocks], axis=-1)


def prepare_params(params, dim_input, dim_recurrent, dim_output):
    """One-time weight prep (transpose + pad) done OUTSIDE the per-call path."""
    h = dim_recurrent
    hp = _round_up(dim_recurrent, _LANE)
    dp = _round_up(dim_input, _LANE)
    op = _round_up(dim_output, _LANE)

    lstm_prepped = []
    for layer, (w_ih, w_hh, b_ih, b_hh) in enumerate(params["lstm"]):
        d_in = dim_input if layer == 0 else h
        d_in_p = dp if layer == 0 else hp
        w_ih_t = _pad_gate_blocks(w_ih.T, h, hp)                      # (d_in, 4*hp)
        w_ih_t = jnp.pad(w_ih_t, ((0, d_in_p - d_in), (0, 0)))        # (d_in_p, 4*hp)
        w_hh_t = _pad_gate_blocks(w_hh.T, h, hp)                      # (h, 4*hp)
        w_hh_t = jnp.pad(w_hh_t, ((0, hp - h), (0, 0)))               # (hp, 4*hp)
        bias = _pad_gate_blocks((b_ih + b_hh)[None, :], h, hp)        # (1, 4*hp)
        lstm_prepped.append((w_ih_t, w_hh_t, bias))

    w_fc, b_fc = params["fc"]
    w_fc_t = jnp.pad(w_fc.T, ((0, hp - h), (0, op - dim_output)))     # (hp, op)
    # Bake the class mask into the padded bias: pad classes get -1e30.
    b_fc_p = jnp.pad(b_fc[None, :], ((0, 0), (0, op - dim_output)),
                     constant_values=_NEG_INF)                        # (1, op)

    return {"lstm": lstm_prepped, "fc": (w_fc_t, b_fc_p),
            "hp": hp, "dp": dp, "op": op}


# --------------------------------------------------------------------------
# Full forward pass: ONE pallas_call.
# --------------------------------------------------------------------------
def lstm_net_forward(x, prepped, dim_output):
    """x: (B, dim_input, T) — the module's raw input (it transposes dims 1,2 itself)."""
    b, d_in, t_len = x.shape
    hp, dp, op = prepped["hp"], prepped["dp"], prepped["op"]
    bp = _round_up(b, _SUBLANE)
    num_layers = len(prepped["lstm"])

    # input.transpose_(1, 2) + time-major layout + sublane/lane padding,
    # flattened to a lane-dense (T*Bp, Dp) slab for the hoisted matmul.
    x_seq = jnp.transpose(x, (2, 0, 1)).astype(jnp.float32)           # (T, B, D_in)
    x_seq = jnp.pad(x_seq, ((0, 0), (0, bp - b), (0, dp - d_in)))     # (T, Bp, Dp)
    x_flat = x_seq.reshape(t_len * bp, dp)                            # (T*Bp, Dp)

    operands = [x_flat]
    in_specs = [pl.BlockSpec((t_len * bp, dp), lambda i: (0, 0))]
    for (w_ih, w_hh, bias) in prepped["lstm"]:
        operands += [w_ih, w_hh, bias]
        in_specs += [
            pl.BlockSpec(w_ih.shape, lambda i: (0, 0)),
            pl.BlockSpec(w_hh.shape, lambda i: (0, 0)),
            pl.BlockSpec(bias.shape, lambda i: (0, 0)),
        ]
    w_fc, b_fc = prepped["fc"]
    operands += [w_fc, b_fc]
    in_specs += [pl.BlockSpec(w_fc.shape, lambda i: (0, 0)),
                 pl.BlockSpec(b_fc.shape, lambda i: (0, 0))]

    kernel = functools.partial(_fused_lstm_net_kernel, t_len=t_len, bp=bp,
                               hp=hp, num_layers=num_layers)

    probs = pl.pallas_call(
        kernel,
        out_shape=jax.ShapeDtypeStruct((bp, op), jnp.float32),
        grid=(1,),
        in_specs=in_specs,
        out_specs=pl.BlockSpec((bp, op), lambda i: (0, 0)),
        scratch_shapes=[
            pltpu.VMEM((t_len * bp, hp), jnp.float32),      # inter-layer sequence
            pltpu.VMEM((t_len * bp, 4 * hp), jnp.float32),  # hoisted x@W_ih gates
        ],
        compiler_params=pltpu.CompilerParams(
            dimension_semantics=("arbitrary",),
            vmem_limit_bytes=32 * 1024 * 1024),
    )(*operands)
    return probs[:b, :dim_output]


# --------------------------------------------------------------------------
# Pure-JAX reference (unpadded) for correctness check.
# --------------------------------------------------------------------------
def reference_forward(x, params, dim_recurrent):
    xb = jnp.transpose(x, (0, 2, 1))                                  # (B, T, D_in)
    b, t_len, _ = xb.shape
    seq = xb
    for (w_ih, w_hh, b_ih, b_hh) in params["lstm"]:
        h = jnp.zeros((b, dim_recurrent), jnp.float32)
        c = jnp.zeros((b, dim_recurrent), jnp.float32)
        outs = []
        for t in range(t_len):
            gates = seq[:, t, :] @ w_ih.T + h @ w_hh.T + b_ih + b_hh
            i_g, f_g, g_g, o_g = jnp.split(gates, 4, axis=-1)
            i_g, f_g, o_g = jax.nn.sigmoid(i_g), jax.nn.sigmoid(f_g), jax.nn.sigmoid(o_g)
            g_g = jnp.tanh(g_g)
            c = f_g * c + i_g * g_g
            h = o_g * jnp.tanh(c)
            outs.append(h)
        seq = jnp.stack(outs, axis=1)                                 # (B, T, H)
    w_fc, b_fc = params["fc"]
    logits = jnp.maximum(seq[:, -1, :], 0.0) @ w_fc.T + b_fc
    return jax.nn.softmax(logits, axis=-1)


if __name__ == "__main__":
    key = jax.random.PRNGKey(0)
    k_x, k_p = jax.random.split(key)

    # Small shapes consistent with the module: batch=2, dim_input=4 (channels),
    # seq=8 time steps, hidden=32, 2 layers, 8 output classes.
    B, DIM_INPUT, T = 2, 4, 8
    DIM_RECURRENT, NUM_LAYERS, DIM_OUTPUT = 32, 2, 8

    x = jax.random.normal(k_x, (B, DIM_INPUT, T), jnp.float32)
    raw_params = init_lstm_net_params(k_p, DIM_INPUT, DIM_RECURRENT,
                                      NUM_LAYERS, DIM_OUTPUT)
    prepped = prepare_params(raw_params, DIM_INPUT, DIM_RECURRENT, DIM_OUTPUT)

    out = lstm_net_forward(x, prepped, DIM_OUTPUT)
    out = jax.block_until_ready(out)

    ref = reference_forward(x, raw_params, DIM_RECURRENT)
    assert out.shape == (B, DIM_OUTPUT), out.shape
    assert jnp.allclose(out, ref, atol=1e-4, rtol=1e-3), float(jnp.max(jnp.abs(out - ref)))
    assert jnp.allclose(jnp.sum(out, axis=-1), 1.0, atol=1e-5)

    print("KERNEL_OK")
</pallas_src>

<mosaic_0001>
module attributes {stable_mosaic.version = 11 : i64} {
  func.func @_fused_lstm_net_kernel(%arg0: i32, %arg1: memref<64x128xf32, #tpu.memory_space<vmem>>, %arg2: memref<128x512xf32, #tpu.memory_space<vmem>>, %arg3: memref<128x512xf32, #tpu.memory_space<vmem>>, %arg4: memref<1x512xf32, #tpu.memory_space<vmem>>, %arg5: memref<128x512xf32, #tpu.memory_space<vmem>>, %arg6: memref<128x512xf32, #tpu.memory_space<vmem>>, %arg7: memref<1x512xf32, #tpu.memory_space<vmem>>, %arg8: memref<128x128xf32, #tpu.memory_space<vmem>>, %arg9: memref<1x128xf32, #tpu.memory_space<vmem>>, %arg10: memref<8x128xf32, #tpu.memory_space<vmem>>, %arg11: memref<64x128xf32, #tpu.memory_space<vmem>>, %arg12: memref<64x512xf32, #tpu.memory_space<vmem>>) attributes {dimension_semantics = [#tpu.dimension_semantics<arbitrary>], iteration_bounds = array<i64: 1>, scalar_prefetch = 0 : i64, scratch_operands = 2 : i64, tpu.core_type = #tpu.core_type<tc>, window_params = [{pipeline_mode = #tpu.pipeline_mode<synchronous>, transform_indices = @transform_0, window_bounds = array<i64: 64, 128>}, {pipeline_mode = #tpu.pipeline_mode<synchronous>, transform_indices = @transform_1, window_bounds = array<i64: 128, 512>}, {pipeline_mode = #tpu.pipeline_mode<synchronous>, transform_indices = @transform_2, window_bounds = array<i64: 128, 512>}, {pipeline_mode = #tpu.pipeline_mode<synchronous>, transform_indices = @transform_3, window_bounds = array<i64: 1, 512>}, {pipeline_mode = #tpu.pipeline_mode<synchronous>, transform_indices = @transform_4, window_bounds = array<i64: 128, 512>}, {pipeline_mode = #tpu.pipeline_mode<synchronous>, transform_indices = @transform_5, window_bounds = array<i64: 128, 512>}, {pipeline_mode = #tpu.pipeline_mode<synchronous>, transform_indices = @transform_6, window_bounds = array<i64: 1, 512>}, {pipeline_mode = #tpu.pipeline_mode<synchronous>, transform_indices = @transform_7, window_bounds = array<i64: 128, 128>}, {pipeline_mode = #tpu.pipeline_mode<synchronous>, transform_indices = @transform_8, window_bounds = array<i64: 1, 128>}, {pipeline_mode = #tpu.pipeline_mode<synchronous>, transform_indices = @transform_9, window_bounds = array<i64: 8, 128>}]} {
    %c0 = arith.constant 0 : index
    %c0_0 = arith.constant 0 : index
    %0 = vector.load %arg1[%c0, %c0_0] : memref<64x128xf32, #tpu.memory_space<vmem>>, vector<64x128xf32>
    %c0_1 = arith.constant 0 : index
    %c0_2 = arith.constant 0 : index
    %1 = vector.load %arg2[%c0_1, %c0_2] : memref<128x512xf32, #tpu.memory_space<vmem>>, vector<128x512xf32>
    %cst = arith.constant dense<0.000000e+00> : vector<64x512xf32>
    %2 = tpu.matmul %0, %1, %cst {dimension_numbers = #tpu.dot_dimension_numbers<[1], [0], [0], [1], [0, 0, 1, 1], [], []>} : vector<64x128xf32>, vector<128x512xf32>, vector<64x512xf32> -> vector<64x512xf32>
    %c0_3 = arith.constant 0 : index
    %c0_4 = arith.constant 0 : index
    %3 = vector.load %arg4[%c0_3, %c0_4] : memref<1x512xf32, #tpu.memory_space<vmem>>, vector<1x512xf32>
    %4 = vector.broadcast %3 : vector<1x512xf32> to vector<64x512xf32>
    %5 = arith.addf %2, %4 : vector<64x512xf32>
    %c0_5 = arith.constant 0 : index
    %c0_6 = arith.constant 0 : index
    %6 = vector.load %arg12[%c0_5, %c0_6] : memref<64x512xf32, #tpu.memory_space<vmem>>, vector<64x512xf32>
    tpu.vector_store %arg12[%c0_5, %c0_6], %5 {strides = array<i32>} : memref<64x512xf32, #tpu.memory_space<vmem>>, vector<64x512xf32>,
    %c0_7 = arith.constant 0 : index
    %c0_8 = arith.constant 0 : index
    %7 = vector.load %arg3[%c0_7, %c0_8] : memref<128x512xf32, #tpu.memory_space<vmem>>, vector<128x512xf32>
    %cst_9 = arith.constant 0.000000e+00 : f32
    %8 = vector.broadcast %cst_9 : f32 to vector<8x128xf32>
    %cst_10 = arith.constant 0.000000e+00 : f32
    %9 = vector.broadcast %cst_10 : f32 to vector<8x128xf32>
    %c0_11 = arith.constant 0 : index
    %c0_12 = arith.constant 0 : index
    %10 = vector.load %arg12[%c0_11, %c0_12] : memref<64x512xf32, #tpu.memory_space<vmem>>, vector<8x512xf32>
    %cst_13 = arith.constant dense<0.000000e+00> : vector<8x512xf32>
    %11 = tpu.matmul %8, %7, %cst_13 {dimension_numbers = #tpu.dot_dimension_numbers<[1], [0], [0], [1], [0, 0, 1, 1], [], []>} : vector<8x128xf32>, vector<128x512xf32>, vector<8x512xf32> -> vector<8x512xf32>
    %12 = arith.addf %10, %11 : vector<8x512xf32>
    %13 = vector.extract_strided_slice %12 {offsets = [0, 0], sizes = [8, 128], strides = [1, 1]} : vector<8x512xf32> to vector<8x128xf32>
    %cst_14 = arith.constant 5.000000e-01 : f32
    %14 = vector.broadcast %cst_14 : f32 to vector<8x128xf32>
    %15 = arith.mulf %14, %13 : vector<8x128xf32>
    %16 = math.tanh %15 : vector<8x128xf32>
    %cst_15 = arith.constant 1.000000e+00 : f32
    %17 = vector.broadcast %cst_15 : f32 to vector<8x128xf32>
    %18 = arith.addf %16, %17 : vector<8x128xf32>
    %cst_16 = arith.constant 5.000000e-01 : f32
    %19 = vector.broadcast %cst_16 : f32 to vector<8x128xf32>
    %20 = arith.mulf %19, %18 : vector<8x128xf32>
    %21 = vector.extract_strided_slice %12 {offsets = [0, 128], sizes = [8, 128], strides = [1, 1]} : vector<8x512xf32> to vector<8x128xf32>
    %cst_17 = arith.constant 5.000000e-01 : f32
    %22 = vector.broadcast %cst_17 : f32 to vector<8x128xf32>
    %23 = arith.mulf %22, %21 : vector<8x128xf32>
    %24 = math.tanh %23 : vector<8x128xf32>
    %cst_18 = arith.constant 1.000000e+00 : f32
    %25 = vector.broadcast %cst_18 : f32 to vector<8x128xf32>
    %26 = arith.addf %24, %25 : vector<8x128xf32>
    %cst_19 = arith.constant 5.000000e-01 : f32
    %27 = vector.broadcast %cst_19 : f32 to vector<8x128xf32>
    %28 = arith.mulf %27, %26 : vector<8x128xf32>
    %29 = vector.extract_strided_slice %12 {offsets = [0, 256], sizes = [8, 128], strides = [1, 1]} : vector<8x512xf32> to vector<8x128xf32>
    %30 = math.tanh %29 : vector<8x128xf32>
    %31 = vector.extract_strided_slice %12 {offsets = [0, 384], sizes = [8, 128], strides = [1, 1]} : vector<8x512xf32> to vector<8x128xf32>
    %cst_20 = arith.constant 5.000000e-01 : f32
    %32 = vector.broadcast %cst_20 : f32 to vector<8x128xf32>
    %33 = arith.mulf %32, %31 : vector<8x128xf32>
    %34 = math.tanh %33 : vector<8x128xf32>
    %cst_21 = arith.constant 1.000000e+00 : f32
    %35 = vector.broadcast %cst_21 : f32 to vector<8x128xf32>
    %36 = arith.addf %34, %35 : vector<8x128xf32>
    %cst_22 = arith.constant 5.000000e-01 : f32
    %37 = vector.broadcast %cst_22 : f32 to vector<8x128xf32>
    %38 = arith.mulf %37, %36 : vector<8x128xf32>
    %39 = arith.mulf %28, %9 : vector<8x128xf32>
    %40 = arith.mulf %20, %30 : vector<8x128xf32>
    %41 = arith.addf %39, %40 : vector<8x128xf32>
    %42 = math.tanh %41 : vector<8x128xf32>
    %43 = arith.mulf %38, %42 : vector<8x128xf32>
    %c0_23 = arith.constant 0 : index
    %c0_24 = arith.constant 0 : index
    %44 = vector.load %arg11[%c0_23, %c0_24] : memref<64x128xf32, #tpu.memory_space<vmem>>, vector<8x128xf32>
    tpu.vector_store %arg11[%c0_23, %c0_24], %43 {strides = array<i32>} : memref<64x128xf32, #tpu.memory_space<vmem>>, vector<8x128xf32>,
    %c8 = arith.constant 8 : index
    %c0_25 = arith.constant 0 : index
    %45 = vector.load %arg12[%c8, %c0_25] : memref<64x512xf32, #tpu.memory_space<vmem>>, vector<8x512xf32>
    %cst_26 = arith.constant dense<0.000000e+00> : vector<8x512xf32>
    %46 = tpu.matmul %43, %7, %cst_26 {dimension_numbers = #tpu.dot_dimension_numbers<[1], [0], [0], [1], [0, 0, 1, 1], [], []>} : vector<8x128xf32>, vector<128x512xf32>, vector<8x512xf32> -> vector<8x512xf32>
    %47 = arith.addf %45, %46 : vector<8x512xf32>
    %48 = vector.extract_strided_slice %47 {offsets = [0, 0], sizes = [8, 128], strides = [1, 1]} : vector<8x512xf32> to vector<8x128xf32>
    %cst_27 = arith.constant 5.000000e-01 : f32
    %49 = vector.broadcast %cst_27 : f32 to vector<8x128xf32>
    %50 = arith.mulf %49, %48 : vector<8x128xf32>
    %51 = math.tanh %50 : vector<8x128xf32>
    %cst_28 = arith.constant 1.000000e+00 : f32
    %52 = vector.broadcast %cst_28 : f32 to vector<8x128xf32>
    %53 = arith.addf %51, %52 : vector<8x128xf32>
    %cst_29 = arith.constant 5.000000e-01 : f32
    %54 = vector.broadcast %cst_29 : f32 to vector<8x128xf32>
    %55 = arith.mulf %54, %53 : vector<8x128xf32>
    %56 = vector.extract_strided_slice %47 {offsets = [0, 128], sizes = [8, 128], strides = [1, 1]} : vector<8x512xf32> to vector<8x128xf32>
    %cst_30 = arith.constant 5.000000e-01 : f32
    %57 = vector.broadcast %cst_30 : f32 to vector<8x128xf32>
    %58 = arith.mulf %57, %56 : vector<8x128xf32>
    %59 = math.tanh %58 : vector<8x128xf32>
    %cst_31 = arith.constant 1.000000e+00 : f32
    %60 = vector.broadcast %cst_31 : f32 to vector<8x128xf32>
    %61 = arith.addf %59, %60 : vector<8x128xf32>
    %cst_32 = arith.constant 5.000000e-01 : f32
    %62 = vector.broadcast %cst_32 : f32 to vector<8x128xf32>
    %63 = arith.mulf %62, %61 : vector<8x128xf32>
    %64 = vector.extract_strided_slice %47 {offsets = [0, 256], sizes = [8, 128], strides = [1, 1]} : vector<8x512xf32> to vector<8x128xf32>
    %65 = math.tanh %64 : vector<8x128xf32>
    %66 = vector.extract_strided_slice %47 {offsets = [0, 384], sizes = [8, 128], strides = [1, 1]} : vector<8x512xf32> to vector<8x128xf32>
    %cst_33 = arith.constant 5.000000e-01 : f32
    %67 = vector.broadcast %cst_33 : f32 to vector<8x128xf32>
    %68 = arith.mulf %67, %66 : vector<8x128xf32>
    %69 = math.tanh %68 : vector<8x128xf32>
    %cst_34 = arith.constant 1.000000e+00 : f32
    %70 = vector.broadcast %cst_34 : f32 to vector<8x128xf32>
    %71 = arith.addf %69, %70 : vector<8x128xf32>
    %cst_35 = arith.constant 5.000000e-01 : f32
    %72 = vector.broadcast %cst_35 : f32 to vector<8x128xf32>
    %73 = arith.mulf %72, %71 : vector<8x128xf32>
    %74 = arith.mulf %63, %41 : vector<8x128xf32>
    %75 = arith.mulf %55, %65 : vector<8x128xf32>
    %76 = arith.addf %74, %75 : vector<8x128xf32>
    %77 = math.tanh %76 : vector<8x128xf32>
    %78 = arith.mulf %73, %77 : vector<8x128xf32>
    %c8_36 = arith.constant 8 : index
    %c0_37 = arith.constant 0 : index
    %79 = vector.load %arg11[%c8_36, %c0_37] : memref<64x128xf32, #tpu.memory_space<vmem>>, vector<8x128xf32>
    tpu.vector_store %arg11[%c8_36, %c0_37], %78 {strides = array<i32>} : memref<64x128xf32, #tpu.memory_space<vmem>>, vector<8x128xf32>,
    %c16 = arith.constant 16 : index
    %c0_38 = arith.constant 0 : index
    %80 = vector.load %arg12[%c16, %c0_38] : memref<64x512xf32, #tpu.memory_space<vmem>>, vector<8x512xf32>
    %cst_39 = arith.constant dense<0.000000e+00> : vector<8x512xf32>
    %81 = tpu.matmul %78, %7, %cst_39 {dimension_numbers = #tpu.dot_dimension_numbers<[1], [0], [0], [1], [0, 0, 1, 1], [], []>} : vector<8x128xf32>, vector<128x512xf32>, vector<8x512xf32> -> vector<8x512xf32>
    %82 = arith.addf %80, %81 : vector<8x512xf32>
    %83 = vector.extract_strided_slice %82 {offsets = [0, 0], sizes = [8, 128], strides = [1, 1]} : vector<8x512xf32> to vector<8x128xf32>
    %cst_40 = arith.constant 5.000000e-01 : f32
    %84 = vector.broadcast %cst_40 : f32 to vector<8x128xf32>
    %85 = arith.mulf %84, %83 : vector<8x128xf32>
    %86 = math.tanh %85 : vector<8x128xf32>
    %cst_41 = arith.constant 1.000000e+00 : f32
    %87 = vector.broadcast %cst_41 : f32 to vector<8x128xf32>
    %88 = arith.addf %86, %87 : vector<8x128xf32>
    %cst_42 = arith.constant 5.000000e-01 : f32
    %89 = vector.broadcast %cst_42 : f32 to vector<8x128xf32>
    %90 = arith.mulf %89, %88 : vector<8x128xf32>
    %91 = vector.extract_strided_slice %82 {offsets = [0, 128], sizes = [8, 128], strides = [1, 1]} : vector<8x512xf32> to vector<8x128xf32>
    %cst_43 = arith.constant 5.000000e-01 : f32
    %92 = vector.broadcast %cst_43 : f32 to vector<8x128xf32>
    %93 = arith.mulf %92, %91 : vector<8x128xf32>
    %94 = math.tanh %93 : vector<8x128xf32>
    %cst_44 = arith.constant 1.000000e+00 : f32
    %95 = vector.broadcast %cst_44 : f32 to vector<8x128xf32>
    %96 = arith.addf %94, %95 : vector<8x128xf32>
    %cst_45 = arith.constant 5.000000e-01 : f32
    %97 = vector.broadcast %cst_45 : f32 to vector<8x128xf32>
    %98 = arith.mulf %97, %96 : vector<8x128xf32>
    %99 = vector.extract_strided_slice %82 {offsets = [0, 256], sizes = [8, 128], strides = [1, 1]} : vector<8x512xf32> to vector<8x128xf32>
    %100 = math.tanh %99 : vector<8x128xf32>
    %101 = vector.extract_strided_slice %82 {offsets = [0, 384], sizes = [8, 128], strides = [1, 1]} : vector<8x512xf32> to vector<8x128xf32>
    %cst_46 = arith.constant 5.000000e-01 : f32
    %102 = vector.broadcast %cst_46 : f32 to vector<8x128xf32>
    %103 = arith.mulf %102, %101 : vector<8x128xf32>
    %104 = math.tanh %103 : vector<8x128xf32>
    %cst_47 = arith.constant 1.000000e+00 : f32
    %105 = vector.broadcast %cst_47 : f32 to vector<8x128xf32>
    %106 = arith.addf %104, %105 : vector<8x128xf32>
    %cst_48 = arith.constant 5.000000e-01 : f32
    %107 = vector.broadcast %cst_48 : f32 to vector<8x128xf32>
    %108 = arith.mulf %107, %106 : vector<8x128xf32>
    %109 = arith.mulf %98, %76 : vector<8x128xf32>
    %110 = arith.mulf %90, %100 : vector<8x128xf32>
    %111 = arith.addf %109, %110 : vector<8x128xf32>
    %112 = math.tanh %111 : vector<8x128xf32>
    %113 = arith.mulf %108, %112 : vector<8x128xf32>
    %c16_49 = arith.constant 16 : index
    %c0_50 = arith.constant 0 : index
    %114 = vector.load %arg11[%c16_49, %c0_50] : memref<64x128xf32, #tpu.memory_space<vmem>>, vector<8x128xf32>
    tpu.vector_store %arg11[%c16_49, %c0_50], %113 {strides = array<i32>} : memref<64x128xf32, #tpu.memory_space<vmem>>, vector<8x128xf32>,
    %c24 = arith.constant 24 : index
    %c0_51 = arith.constant 0 : index
    %115 = vector.load %arg12[%c24, %c0_51] : memref<64x512xf32, #tpu.memory_space<vmem>>, vector<8x512xf32>
    %cst_52 = arith.constant dense<0.000000e+00> : vector<8x512xf32>
    %116 = tpu.matmul %113, %7, %cst_52 {dimension_numbers = #tpu.dot_dimension_numbers<[1], [0], [0], [1], [0, 0, 1, 1], [], []>} : vector<8x128xf32>, vector<128x512xf32>, vector<8x512xf32> -> vector<8x512xf32>
    %117 = arith.addf %115, %116 : vector<8x512xf32>
    %118 = vector.extract_strided_slice %117 {offsets = [0, 0], sizes = [8, 128], strides = [1, 1]} : vector<8x512xf32> to vector<8x128xf32>
    %cst_53 = arith.constant 5.000000e-01 : f32
    %119 = vector.broadcast %cst_53 : f32 to vector<8x128xf32>
    %120 = arith.mulf %119, %118 : vector<8x128xf32>
    %121 = math.tanh %120 : vector<8x128xf32>
    %cst_54 = arith.constant 1.000000e+00 : f32
    %122 = vector.broadcast %cst_54 : f32 to vector<8x128xf32>
    %123 = arith.addf %121, %122 : vector<8x128xf32>
    %cst_55 = arith.constant 5.000000e-01 : f32
    %124 = vector.broadcast %cst_55 : f32 to vector<8x128xf32>
    %125 = arith.mulf %124, %123 : vector<8x128xf32>
    %126 = vector.extract_strided_slice %117 {offsets = [0, 128], sizes = [8, 128], strides = [1, 1]} : vector<8x512xf32> to vector<8x128xf32>
    %cst_56 = arith.constant 5.000000e-01 : f32
    %127 = vector.broadcast %cst_56 : f32 to vector<8x128xf32>
    %128 = arith.mulf %127, %126 : vector<8x128xf32>
    %129 = math.tanh %128 : vector<8x128xf32>
    %cst_57 = arith.constant 1.000000e+00 : f32
    %130 = vector.broadcast %cst_57 : f32 to vector<8x128xf32>
    %131 = arith.addf %129, %130 : vector<8x128xf32>
    %cst_58 = arith.constant 5.000000e-01 : f32
    %132 = vector.broadcast %cst_58 : f32 to vector<8x128xf32>
    %133 = arith.mulf %132, %131 : vector<8x128xf32>
    %134 = vector.extract_strided_slice %117 {offsets = [0, 256], sizes = [8, 128], strides = [1, 1]} : vector<8x512xf32> to vector<8x128xf32>
    %135 = math.tanh %134 : vector<8x128xf32>
    %136 = vector.extract_strided_slice %117 {offsets = [0, 384], sizes = [8, 128], strides = [1, 1]} : vector<8x512xf32> to vector<8x128xf32>
    %cst_59 = arith.constant 5.000000e-01 : f32
    %137 = vector.broadcast %cst_59 : f32 to vector<8x128xf32>
    %138 = arith.mulf %137, %136 : vector<8x128xf32>
    %139 = math.tanh %138 : vector<8x128xf32>
    %cst_60 = arith.constant 1.000000e+00 : f32
    %140 = vector.broadcast %cst_60 : f32 to vector<8x128xf32>
    %141 = arith.addf %139, %140 : vector<8x128xf32>
    %cst_61 = arith.constant 5.000000e-01 : f32
    %142 = vector.broadcast %cst_61 : f32 to vector<8x128xf32>
    %143 = arith.mulf %142, %141 : vector<8x128xf32>
    %144 = arith.mulf %133, %111 : vector<8x128xf32>
    %145 = arith.mulf %125, %135 : vector<8x128xf32>
    %146 = arith.addf %144, %145 : vector<8x128xf32>
    %147 = math.tanh %146 : vector<8x128xf32>
    %148 = arith.mulf %143, %147 : vector<8x128xf32>
    %c24_62 = arith.constant 24 : index
    %c0_63 = arith.constant 0 : index
    %149 = vector.load %arg11[%c24_62, %c0_63] : memref<64x128xf32, #tpu.memory_space<vmem>>, vector<8x128xf32>
    tpu.vector_store %arg11[%c24_62, %c0_63], %148 {strides = array<i32>} : memref<64x128xf32, #tpu.memory_space<vmem>>, vector<8x128xf32>,
    %c32 = arith.constant 32 : index
    %c0_64 = arith.constant 0 : index
    %150 = vector.load %arg12[%c32, %c0_64] : memref<64x512xf32, #tpu.memory_space<vmem>>, vector<8x512xf32>
    %cst_65 = arith.constant dense<0.000000e+00> : vector<8x512xf32>
    %151 = tpu.matmul %148, %7, %cst_65 {dimension_numbers = #tpu.dot_dimension_numbers<[1], [0], [0], [1], [0, 0, 1, 1], [], []>} : vector<8x128xf32>, vector<128x512xf32>, vector<8x512xf32> -> vector<8x512xf32>
    %152 = arith.addf %150, %151 : vector<8x512xf32>
    %153 = vector.extract_strided_slice %152 {offsets = [0, 0], sizes = [8, 128], strides = [1, 1]} : vector<8x512xf32> to vector<8x128xf32>
    %cst_66 = arith.constant 5.000000e-01 : f32
    %154 = vector.broadcast %cst_66 : f32 to vector<8x128xf32>
    %155 = arith.mulf %154, %153 : vector<8x128xf32>
    %156 = math.tanh %155 : vector<8x128xf32>
    %cst_67 = arith.constant 1.000000e+00 : f32
    %157 = vector.broadcast %cst_67 : f32 to vector<8x128xf32>
    %158 = arith.addf %156, %157 : vector<8x128xf32>
    %cst_68 = arith.constant 5.000000e-01 : f32
    %159 = vector.broadcast %cst_68 : f32 to vector<8x128xf32>
    %160 = arith.mulf %159, %158 : vector<8x128xf32>
    %161 = vector.extract_strided_slice %152 {offsets = [0, 128], sizes = [8, 128], strides = [1, 1]} : vector<8x512xf32> to vector<8x128xf32>
    %cst_69 = arith.constant 5.000000e-01 : f32
    %162 = vector.broadcast %cst_69 : f32 to vector<8x128xf32>
    %163 = arith.mulf %162, %161 : vector<8x128xf32>
    %164 = math.tanh %163 : vector<8x128xf32>
    %cst_70 = arith.constant 1.000000e+00 : f32
    %165 = vector.broadcast %cst_70 : f32 to vector<8x128xf32>
    %166 = arith.addf %164, %165 : vector<8x128xf32>
    %cst_71 = arith.constant 5.000000e-01 : f32
    %167 = vector.broadcast %cst_71 : f32 to vector<8x128xf32>
    %168 = arith.mulf %167, %166 : vector<8x128xf32>
    %169 = vector.extract_strided_slice %152 {offsets = [0, 256], sizes = [8, 128], strides = [1, 1]} : vector<8x512xf32> to vector<8x128xf32>
    %170 = math.tanh %169 : vector<8x128xf32>
    %171 = vector.extract_strided_slice %152 {offsets = [0, 384], sizes = [8, 128], strides = [1, 1]} : vector<8x512xf32> to vector<8x128xf32>
    %cst_72 = arith.constant 5.000000e-01 : f32
    %172 = vector.broadcast %cst_72 : f32 to vector<8x128xf32>
    %173 = arith.mulf %172, %171 : vector<8x128xf32>
    %174 = math.tanh %173 : vector<8x128xf32>
    %cst_73 = arith.constant 1.000000e+00 : f32
    %175 = vector.broadcast %cst_73 : f32 to vector<8x128xf32>
    %176 = arith.addf %174, %175 : vector<8x128xf32>
    %cst_74 = arith.constant 5.000000e-01 : f32
    %177 = vector.broadcast %cst_74 : f32 to vector<8x128xf32>
    %178 = arith.mulf %177, %176 : vector<8x128xf32>
    %179 = arith.mulf %168, %146 : vector<8x128xf32>
    %180 = arith.mulf %160, %170 : vector<8x128xf32>
    %181 = arith.addf %179, %180 : vector<8x128xf32>
    %182 = math.tanh %181 : vector<8x128xf32>
    %183 = arith.mulf %178, %182 : vector<8x128xf32>
    %c32_75 = arith.constant 32 : index
    %c0_76 = arith.constant 0 : index
    %184 = vector.load %arg11[%c32_75, %c0_76] : memref<64x128xf32, #tpu.memory_space<vmem>>, vector<8x128xf32>
    tpu.vector_store %arg11[%c32_75, %c0_76], %183 {strides = array<i32>} : memref<64x128xf32, #tpu.memory_space<vmem>>, vector<8x128xf32>,
    %c40 = arith.constant 40 : index
    %c0_77 = arith.constant 0 : index
    %185 = vector.load %arg12[%c40, %c0_77] : memref<64x512xf32, #tpu.memory_space<vmem>>, vector<8x512xf32>
    %cst_78 = arith.constant dense<0.000000e+00> : vector<8x512xf32>
    %186 = tpu.matmul %183, %7, %cst_78 {dimension_numbers = #tpu.dot_dimension_numbers<[1], [0], [0], [1], [0, 0, 1, 1], [], []>} : vector<8x128xf32>, vector<128x512xf32>, vector<8x512xf32> -> vector<8x512xf32>
    %187 = arith.addf %185, %186 : vector<8x512xf32>
    %188 = vector.extract_strided_slice %187 {offsets = [0, 0], sizes = [8, 128], strides = [1, 1]} : vector<8x512xf32> to vector<8x128xf32>
    %cst_79 = arith.constant 5.000000e-01 : f32
    %189 = vector.broadcast %cst_79 : f32 to vector<8x128xf32>
    %190 = arith.mulf %189, %188 : vector<8x128xf32>
    %191 = math.tanh %190 : vector<8x128xf32>
    %cst_80 = arith.constant 1.000000e+00 : f32
    %192 = vector.broadcast %cst_80 : f32 to vector<8x128xf32>
    %193 = arith.addf %191, %192 : vector<8x128xf32>
    %cst_81 = arith.constant 5.000000e-01 : f32
    %194 = vector.broadcast %cst_81 : f32 to vector<8x128xf32>
    %195 = arith.mulf %194, %193 : vector<8x128xf32>
    %196 = vector.extract_strided_slice %187 {offsets = [0, 128], sizes = [8, 128], strides = [1, 1]} : vector<8x512xf32> to vector<8x128xf32>
    %cst_82 = arith.constant 5.000000e-01 : f32
    %197 = vector.broadcast %cst_82 : f32 to vector<8x128xf32>
    %198 = arith.mulf %197, %196 : vector<8x128xf32>
    %199 = math.tanh %198 : vector<8x128xf32>
    %cst_83 = arith.constant 1.000000e+00 : f32
    %200 = vector.broadcast %cst_83 : f32 to vector<8x128xf32>
    %201 = arith.addf %199, %200 : vector<8x128xf32>
    %cst_84 = arith.constant 5.000000e-01 : f32
    %202 = vector.broadcast %cst_84 : f32 to vector<8x128xf32>
    %203 = arith.mulf %202, %201 : vector<8x128xf32>
    %204 = vector.extract_strided_slice %187 {offsets = [0, 256], sizes = [8, 128], strides = [1, 1]} : vector<8x512xf32> to vector<8x128xf32>
    %205 = math.tanh %204 : vector<8x128xf32>
    %206 = vector.extract_strided_slice %187 {offsets = [0, 384], sizes = [8, 128], strides = [1, 1]} : vector<8x512xf32> to vector<8x128xf32>
    %cst_85 = arith.constant 5.000000e-01 : f32
    %207 = vector.broadcast %cst_85 : f32 to vector<8x128xf32>
    %208 = arith.mulf %207, %206 : vector<8x128xf32>
    %209 = math.tanh %208 : vector<8x128xf32>
    %cst_86 = arith.constant 1.000000e+00 : f32
    %210 = vector.broadcast %cst_86 : f32 to vector<8x128xf32>
    %211 = arith.addf %209, %210 : vector<8x128xf32>
    %cst_87 = arith.constant 5.000000e-01 : f32
    %212 = vector.broadcast %cst_87 : f32 to vector<8x128xf32>
    %213 = arith.mulf %212, %211 : vector<8x128xf32>
    %214 = arith.mulf %203, %181 : vector<8x128xf32>
    %215 = arith.mulf %195, %205 : vector<8x128xf32>
    %216 = arith.addf %214, %215 : vector<8x128xf32>
    %217 = math.tanh %216 : vector<8x128xf32>
    %218 = arith.mulf %213, %217 : vector<8x128xf32>
    %c40_88 = arith.constant 40 : index
    %c0_89 = arith.constant 0 : index
    %219 = vector.load %arg11[%c40_88, %c0_89] : memref<64x128xf32, #tpu.memory_space<vmem>>, vector<8x128xf32>
    tpu.vector_store %arg11[%c40_88, %c0_89], %218 {strides = array<i32>} : memref<64x128xf32, #tpu.memory_space<vmem>>, vector<8x128xf32>,
    %c48 = arith.constant 48 : index
    %c0_90 = arith.constant 0 : index
    %220 = vector.load %arg12[%c48, %c0_90] : memref<64x512xf32, #tpu.memory_space<vmem>>, vector<8x512xf32>
    %cst_91 = arith.constant dense<0.000000e+00> : vector<8x512xf32>
    %221 = tpu.matmul %218, %7, %cst_91 {dimension_numbers = #tpu.dot_dimension_numbers<[1], [0], [0], [1], [0, 0, 1, 1], [], []>} : vector<8x128xf32>, vector<128x512xf32>, vector<8x512xf32> -> vector<8x512xf32>
    %222 = arith.addf %220, %221 : vector<8x512xf32>
    %223 = vector.extract_strided_slice %222 {offsets = [0, 0], sizes = [8, 128], strides = [1, 1]} : vector<8x512xf32> to vector<8x128xf32>
    %cst_92 = arith.constant 5.000000e-01 : f32
    %224 = vector.broadcast %cst_92 : f32 to vector<8x128xf32>
    %225 = arith.mulf %224, %223 : vector<8x128xf32>
    %226 = math.tanh %225 : vector<8x128xf32>
    %cst_93 = arith.constant 1.000000e+00 : f32
    %227 = vector.broadcast %cst_93 : f32 to vector<8x128xf32>
    %228 = arith.addf %226, %227 : vector<8x128xf32>
    %cst_94 = arith.constant 5.000000e-01 : f32
    %229 = vector.broadcast %cst_94 : f32 to vector<8x128xf32>
    %230 = arith.mulf %229, %228 : vector<8x128xf32>
    %231 = vector.extract_strided_slice %222 {offsets = [0, 128], sizes = [8, 128], strides = [1, 1]} : vector<8x512xf32> to vector<8x128xf32>
    %cst_95 = arith.constant 5.000000e-01 : f32
    %232 = vector.broadcast %cst_95 : f32 to vector<8x128xf32>
    %233 = arith.mulf %232, %231 : vector<8x128xf32>
    %234 = math.tanh %233 : vector<8x128xf32>
    %cst_96 = arith.constant 1.000000e+00 : f32
    %235 = vector.broadcast %cst_96 : f32 to vector<8x128xf32>
    %236 = arith.addf %234, %235 : vector<8x128xf32>
    %cst_97 = arith.constant 5.000000e-01 : f32
    %237 = vector.broadcast %cst_97 : f32 to vector<8x128xf32>
    %238 = arith.mulf %237, %236 : vector<8x128xf32>
    %239 = vector.extract_strided_slice %222 {offsets = [0, 256], sizes = [8, 128], strides = [1, 1]} : vector<8x512xf32> to vector<8x128xf32>
    %240 = math.tanh %239 : vector<8x128xf32>
    %241 = vector.extract_strided_slice %222 {offsets = [0, 384], sizes = [8, 128], strides = [1, 1]} : vector<8x512xf32> to vector<8x128xf32>
    %cst_98 = arith.constant 5.000000e-01 : f32
    %242 = vector.broadcast %cst_98 : f32 to vector<8x128xf32>
    %243 = arith.mulf %242, %241 : vector<8x128xf32>
    %244 = math.tanh %243 : vector<8x128xf32>
    %cst_99 = arith.constant 1.000000e+00 : f32
    %245 = vector.broadcast %cst_99 : f32 to vector<8x128xf32>
    %246 = arith.addf %244, %245 : vector<8x128xf32>
    %cst_100 = arith.constant 5.000000e-01 : f32
    %247 = vector.broadcast %cst_100 : f32 to vector<8x128xf32>
    %248 = arith.mulf %247, %246 : vector<8x128xf32>
    %249 = arith.mulf %238, %216 : vector<8x128xf32>
    %250 = arith.mulf %230, %240 : vector<8x128xf32>
    %251 = arith.addf %249, %250 : vector<8x128xf32>
    %252 = math.tanh %251 : vector<8x128xf32>
    %253 = arith.mulf %248, %252 : vector<8x128xf32>
    %c48_101 = arith.constant 48 : index
    %c0_102 = arith.constant 0 : index
    %254 = vector.load %arg11[%c48_101, %c0_102] : memref<64x128xf32, #tpu.memory_space<vmem>>, vector<8x128xf32>
    tpu.vector_store %arg11[%c48_101, %c0_102], %253 {strides = array<i32>} : memref<64x128xf32, #tpu.memory_space<vmem>>, vector<8x128xf32>,
    %c56 = arith.constant 56 : index
    %c0_103 = arith.constant 0 : index
    %255 = vector.load %arg12[%c56, %c0_103] : memref<64x512xf32, #tpu.memory_space<vmem>>, vector<8x512xf32>
    %cst_104 = arith.constant dense<0.000000e+00> : vector<8x512xf32>
    %256 = tpu.matmul %253, %7, %cst_104 {dimension_numbers = #tpu.dot_dimension_numbers<[1], [0], [0], [1], [0, 0, 1, 1], [], []>} : vector<8x128xf32>, vector<128x512xf32>, vector<8x512xf32> -> vector<8x512xf32>
    %257 = arith.addf %255, %256 : vector<8x512xf32>
    %258 = vector.extract_strided_slice %257 {offsets = [0, 0], sizes = [8, 128], strides = [1, 1]} : vector<8x512xf32> to vector<8x128xf32>
    %cst_105 = arith.constant 5.000000e-01 : f32
    %259 = vector.broadcast %cst_105 : f32 to vector<8x128xf32>
    %260 = arith.mulf %259, %258 : vector<8x128xf32>
    %261 = math.tanh %260 : vector<8x128xf32>
    %cst_106 = arith.constant 1.000000e+00 : f32
    %262 = vector.broadcast %cst_106 : f32 to vector<8x128xf32>
    %263 = arith.addf %261, %262 : vector<8x128xf32>
    %cst_107 = arith.constant 5.000000e-01 : f32
    %264 = vector.broadcast %cst_107 : f32 to vector<8x128xf32>
    %265 = arith.mulf %264, %263 : vector<8x128xf32>
    %266 = vector.extract_strided_slice %257 {offsets = [0, 128], sizes = [8, 128], strides = [1, 1]} : vector<8x512xf32> to vector<8x128xf32>
    %cst_108 = arith.constant 5.000000e-01 : f32
    %267 = vector.broadcast %cst_108 : f32 to vector<8x128xf32>
    %268 = arith.mulf %267, %266 : vector<8x128xf32>
    %269 = math.tanh %268 : vector<8x128xf32>
    %cst_109 = arith.constant 1.000000e+00 : f32
    %270 = vector.broadcast %cst_109 : f32 to vector<8x128xf32>
    %271 = arith.addf %269, %270 : vector<8x128xf32>
    %cst_110 = arith.constant 5.000000e-01 : f32
    %272 = vector.broadcast %cst_110 : f32 to vector<8x128xf32>
    %273 = arith.mulf %272, %271 : vector<8x128xf32>
    %274 = vector.extract_strided_slice %257 {offsets = [0, 256], sizes = [8, 128], strides = [1, 1]} : vector<8x512xf32> to vector<8x128xf32>
    %275 = math.tanh %274 : vector<8x128xf32>
    %276 = vector.extract_strided_slice %257 {offsets = [0, 384], sizes = [8, 128], strides = [1, 1]} : vector<8x512xf32> to vector<8x128xf32>
    %cst_111 = arith.constant 5.000000e-01 : f32
    %277 = vector.broadcast %cst_111 : f32 to vector<8x128xf32>
    %278 = arith.mulf %277, %276 : vector<8x128xf32>
    %279 = math.tanh %278 : vector<8x128xf32>
    %cst_112 = arith.constant 1.000000e+00 : f32
    %280 = vector.broadcast %cst_112 : f32 to vector<8x128xf32>
    %281 = arith.addf %279, %280 : vector<8x128xf32>
    %cst_113 = arith.constant 5.000000e-01 : f32
    %282 = vector.broadcast %cst_113 : f32 to vector<8x128xf32>
    %283 = arith.mulf %282, %281 : vector<8x128xf32>
    %284 = arith.mulf %273, %251 : vector<8x128xf32>
    %285 = arith.mulf %265, %275 : vector<8x128xf32>
    %286 = arith.addf %284, %285 : vector<8x128xf32>
    %287 = math.tanh %286 : vector<8x128xf32>
    %288 = arith.mulf %283, %287 : vector<8x128xf32>
    %c56_114 = arith.constant 56 : index
    %c0_115 = arith.constant 0 : index
    %289 = vector.load %arg11[%c56_114, %c0_115] : memref<64x128xf32, #tpu.memory_space<vmem>>, vector<8x128xf32>
    tpu.vector_store %arg11[%c56_114, %c0_115], %288 {strides = array<i32>} : memref<64x128xf32, #tpu.memory_space<vmem>>, vector<8x128xf32>,
    %c0_116 = arith.constant 0 : index
    %c0_117 = arith.constant 0 : index
    %290 = vector.load %arg11[%c0_116, %c0_117] : memref<64x128xf32, #tpu.memory_space<vmem>>, vector<64x128xf32>
    %c0_118 = arith.constant 0 : index
    %c0_119 = arith.constant 0 : index
    %291 = vector.load %arg5[%c0_118, %c0_119] : memref<128x512xf32, #tpu.memory_space<vmem>>, vector<128x512xf32>
    %cst_120 = arith.constant dense<0.000000e+00> : vector<64x512xf32>
    %292 = tpu.matmul %290, %291, %cst_120 {dimension_numbers = #tpu.dot_dimension_numbers<[1], [0], [0], [1], [0, 0, 1, 1], [], []>} : vector<64x128xf32>, vector<128x512xf32>, vector<64x512xf32> -> vector<64x512xf32>
    %c0_121 = arith.constant 0 : index
    %c0_122 = arith.constant 0 : index
    %293 = vector.load %arg7[%c0_121, %c0_122] : memref<1x512xf32, #tpu.memory_space<vmem>>, vector<1x512xf32>
    %294 = vector.broadcast %293 : vector<1x512xf32> to vector<64x512xf32>
    %295 = arith.addf %292, %294 : vector<64x512xf32>
    %c0_123 = arith.constant 0 : index
    %c0_124 = arith.constant 0 : index
    %296 = vector.load %arg12[%c0_123, %c0_124] : memref<64x512xf32, #tpu.memory_space<vmem>>, vector<64x512xf32>
    tpu.vector_store %arg12[%c0_123, %c0_124], %295 {strides = array<i32>} : memref<64x512xf32, #tpu.memory_space<vmem>>, vector<64x512xf32>,
    %c0_125 = arith.constant 0 : index
    %c0_126 = arith.constant 0 : index
    %297 = vector.load %arg6[%c0_125, %c0_126] : memref<128x512xf32, #tpu.memory_space<vmem>>, vector<128x512xf32>
    %cst_127 = arith.constant 0.000000e+00 : f32
    %298 = vector.broadcast %cst_127 : f32 to vector<8x128xf32>
    %cst_128 = arith.constant 0.000000e+00 : f32
    %299 = vector.broadcast %cst_128 : f32 to vector<8x128xf32>
    %c0_129 = arith.constant 0 : index
    %c0_130 = arith.constant 0 : index
    %300 = vector.load %arg12[%c0_129, %c0_130] : memref<64x512xf32, #tpu.memory_space<vmem>>, vector<8x512xf32>
    %cst_131 = arith.constant dense<0.000000e+00> : vector<8x512xf32>
    %301 = tpu.matmul %298, %297, %cst_131 {dimension_numbers = #tpu.dot_dimension_numbers<[1], [0], [0], [1], [0, 0, 1, 1], [], []>} : vector<8x128xf32>, vector<128x512xf32>, vector<8x512xf32> -> vector<8x512xf32>
    %302 = arith.addf %300, %301 : vector<8x512xf32>
    %303 = vector.extract_strided_slice %302 {offsets = [0, 0], sizes = [8, 128], strides = [1, 1]} : vector<8x512xf32> to vector<8x128xf32>
    %cst_132 = arith.constant 5.000000e-01 : f32
    %304 = vector.broadcast %cst_132 : f32 to vector<8x128xf32>
    %305 = arith.mulf %304, %303 : vector<8x128xf32>
    %306 = math.tanh %305 : vector<8x128xf32>
    %cst_133 = arith.constant 1.000000e+00 : f32
    %307 = vector.broadcast %cst_133 : f32 to vector<8x128xf32>
    %308 = arith.addf %306, %307 : vector<8x128xf32>
    %cst_134 = arith.constant 5.000000e-01 : f32
    %309 = vector.broadcast %cst_134 : f32 to vector<8x128xf32>
    %310 = arith.mulf %309, %308 : vector<8x128xf32>
    %311 = vector.extract_strided_slice %302 {offsets = [0, 128], sizes = [8, 128], strides = [1, 1]} : vector<8x512xf32> to vector<8x128xf32>
    %cst_135 = arith.constant 5.000000e-01 : f32
    %312 = vector.broadcast %cst_135 : f32 to vector<8x128xf32>
    %313 = arith.mulf %312, %311 : vector<8x128xf32>
    %314 = math.tanh %313 : vector<8x128xf32>
    %cst_136 = arith.constant 1.000000e+00 : f32
    %315 = vector.broadcast %cst_136 : f32 to vector<8x128xf32>
    %316 = arith.addf %314, %315 : vector<8x128xf32>
    %cst_137 = arith.constant 5.000000e-01 : f32
    %317 = vector.broadcast %cst_137 : f32 to vector<8x128xf32>
    %318 = arith.mulf %317, %316 : vector<8x128xf32>
    %319 = vector.extract_strided_slice %302 {offsets = [0, 256], sizes = [8, 128], strides = [1, 1]} : vector<8x512xf32> to vector<8x128xf32>
    %320 = math.tanh %319 : vector<8x128xf32>
    %321 = vector.extract_strided_slice %302 {offsets = [0, 384], sizes = [8, 128], strides = [1, 1]} : vector<8x512xf32> to vector<8x128xf32>
    %cst_138 = arith.constant 5.000000e-01 : f32
    %322 = vector.broadcast %cst_138 : f32 to vector<8x128xf32>
    %323 = arith.mulf %322, %321 : vector<8x128xf32>
    %324 = math.tanh %323 : vector<8x128xf32>
    %cst_139 = arith.constant 1.000000e+00 : f32
    %325 = vector.broadcast %cst_139 : f32 to vector<8x128xf32>
    %326 = arith.addf %324, %325 : vector<8x128xf32>
    %cst_140 = arith.constant 5.000000e-01 : f32
    %327 = vector.broadcast %cst_140 : f32 to vector<8x128xf32>
    %328 = arith.mulf %327, %326 : vector<8x128xf32>
    %329 = arith.mulf %318, %299 : vector<8x128xf32>
    %330 = arith.mulf %310, %320 : vector<8x128xf32>
    %331 = arith.addf %329, %330 : vector<8x128xf32>
    %332 = math.tanh %331 : vector<8x128xf32>
    %333 = arith.mulf %328, %332 : vector<8x128xf32>
    %c8_141 = arith.constant 8 : index
    %c0_142 = arith.constant 0 : index
    %334 = vector.load %arg12[%c8_141, %c0_142] : memref<64x512xf32, #tpu.memory_space<vmem>>, vector<8x512xf32>
    %cst_143 = arith.constant dense<0.000000e+00> : vector<8x512xf32>
    %335 = tpu.matmul %333, %297, %cst_143 {dimension_numbers = #tpu.dot_dimension_numbers<[1], [0], [0], [1], [0, 0, 1, 1], [], []>} : vector<8x128xf32>, vector<128x512xf32>, vector<8x512xf32> -> vector<8x512xf32>
    %336 = arith.addf %334, %335 : vector<8x512xf32>
    %337 = vector.extract_strided_slice %336 {offsets = [0, 0], sizes = [8, 128], strides = [1, 1]} : vector<8x512xf32> to vector<8x128xf32>
    %cst_144 = arith.constant 5.000000e-01 : f32
    %338 = vector.broadcast %cst_144 : f32 to vector<8x128xf32>
    %339 = arith.mulf %338, %337 : vector<8x128xf32>
    %340 = math.tanh %339 : vector<8x128xf32>
    %cst_145 = arith.constant 1.000000e+00 : f32
    %341 = vector.broadcast %cst_145 : f32 to vector<8x128xf32>
    %342 = arith.addf %340, %341 : vector<8x128xf32>
    %cst_146 = arith.constant 5.000000e-01 : f32
    %343 = vector.broadcast %cst_146 : f32 to vector<8x128xf32>
    %344 = arith.mulf %343, %342 : vector<8x128xf32>
    %345 = vector.extract_strided_slice %336 {offsets = [0, 128], sizes = [8, 128], strides = [1, 1]} : vector<8x512xf32> to vector<8x128xf32>
    %cst_147 = arith.constant 5.000000e-01 : f32
    %346 = vector.broadcast %cst_147 : f32 to vector<8x128xf32>
    %347 = arith.mulf %346, %345 : vector<8x128xf32>
    %348 = math.tanh %347 : vector<8x128xf32>
    %cst_148 = arith.constant 1.000000e+00 : f32
    %349 = vector.broadcast %cst_148 : f32 to vector<8x128xf32>
    %350 = arith.addf %348, %349 : vector<8x128xf32>
    %cst_149 = arith.constant 5.000000e-01 : f32
    %351 = vector.broadcast %cst_149 : f32 to vector<8x128xf32>
    %352 = arith.mulf %351, %350 : vector<8x128xf32>
    %353 = vector.extract_strided_slice %336 {offsets = [0, 256], sizes = [8, 128], strides = [1, 1]} : vector<8x512xf32> to vector<8x128xf32>
    %354 = math.tanh %353 : vector<8x128xf32>
    %355 = vector.extract_strided_slice %336 {offsets = [0, 384], sizes = [8, 128], strides = [1, 1]} : vector<8x512xf32> to vector<8x128xf32>
    %cst_150 = arith.constant 5.000000e-01 : f32
    %356 = vector.broadcast %cst_150 : f32 to vector<8x128xf32>
    %357 = arith.mulf %356, %355 : vector<8x128xf32>
    %358 = math.tanh %357 : vector<8x128xf32>
    %cst_151 = arith.constant 1.000000e+00 : f32
    %359 = vector.broadcast %cst_151 : f32 to vector<8x128xf32>
    %360 = arith.addf %358, %359 : vector<8x128xf32>
    %cst_152 = arith.constant 5.000000e-01 : f32
    %361 = vector.broadcast %cst_152 : f32 to vector<8x128xf32>
    %362 = arith.mulf %361, %360 : vector<8x128xf32>
    %363 = arith.mulf %352, %331 : vector<8x128xf32>
    %364 = arith.mulf %344, %354 : vector<8x128xf32>
    %365 = arith.addf %363, %364 : vector<8x128xf32>
    %366 = math.tanh %365 : vector<8x128xf32>
    %367 = arith.mulf %362, %366 : vector<8x128xf32>
    %c16_153 = arith.constant 16 : index
    %c0_154 = arith.constant 0 : index
    %368 = vector.load %arg12[%c16_153, %c0_154] : memref<64x512xf32, #tpu.memory_space<vmem>>, vector<8x512xf32>
    %cst_155 = arith.constant dense<0.000000e+00> : vector<8x512xf32>
    %369 = tpu.matmul %367, %297, %cst_155 {dimension_numbers = #tpu.dot_dimension_numbers<[1], [0], [0], [1], [0, 0, 1, 1], [], []>} : vector<8x128xf32>, vector<128x512xf32>, vector<8x512xf32> -> vector<8x512xf32>
    %370 = arith.addf %368, %369 : vector<8x512xf32>
    %371 = vector.extract_strided_slice %370 {offsets = [0, 0], sizes = [8, 128], strides = [1, 1]} : vector<8x512xf32> to vector<8x128xf32>
    %cst_156 = arith.constant 5.000000e-01 : f32
    %372 = vector.broadcast %cst_156 : f32 to vector<8x128xf32>
    %373 = arith.mulf %372, %371 : vector<8x128xf32>
    %374 = math.tanh %373 : vector<8x128xf32>
    %cst_157 = arith.constant 1.000000e+00 : f32
    %375 = vector.broadcast %cst_157 : f32 to vector<8x128xf32>
    %376 = arith.addf %374, %375 : vector<8x128xf32>
    %cst_158 = arith.constant 5.000000e-01 : f32
    %377 = vector.broadcast %cst_158 : f32 to vector<8x128xf32>
    %378 = arith.mulf %377, %376 : vector<8x128xf32>
    %379 = vector.extract_strided_slice %370 {offsets = [0, 128], sizes = [8, 128], strides = [1, 1]} : vector<8x512xf32> to vector<8x128xf32>
    %cst_159 = arith.constant 5.000000e-01 : f32
    %380 = vector.broadcast %cst_159 : f32 to vector<8x128xf32>
    %381 = arith.mulf %380, %379 : vector<8x128xf32>
    %382 = math.tanh %381 : vector<8x128xf32>
    %cst_160 = arith.constant 1.000000e+00 : f32
    %383 = vector.broadcast %cst_160 : f32 to vector<8x128xf32>
    %384 = arith.addf %382, %383 : vector<8x128xf32>
    %cst_161 = arith.constant 5.000000e-01 : f32
    %385 = vector.broadcast %cst_161 : f32 to vector<8x128xf32>
    %386 = arith.mulf %385, %384 : vector<8x128xf32>
    %387 = vector.extract_strided_slice %370 {offsets = [0, 256], sizes = [8, 128], strides = [1, 1]} : vector<8x512xf32> to vector<8x128xf32>
    %388 = math.tanh %387 : vector<8x128xf32>
    %389 = vector.extract_strided_slice %370 {offsets = [0, 384], sizes = [8, 128], strides = [1, 1]} : vector<8x512xf32> to vector<8x128xf32>
    %cst_162 = arith.constant 5.000000e-01 : f32
    %390 = vector.broadcast %cst_162 : f32 to vector<8x128xf32>
    %391 = arith.mulf %390, %389 : vector<8x128xf32>
    %392 = math.tanh %391 : vector<8x128xf32>
    %cst_163 = arith.constant 1.000000e+00 : f32
    %393 = vector.broadcast %cst_163 : f32 to vector<8x128xf32>
    %394 = arith.addf %392, %393 : vector<8x128xf32>
    %cst_164 = arith.constant 5.000000e-01 : f32
    %395 = vector.broadcast %cst_164 : f32 to vector<8x128xf32>
    %396 = arith.mulf %395, %394 : vector<8x128xf32>
    %397 = arith.mulf %386, %365 : vector<8x128xf32>
    %398 = arith.mulf %378, %388 : vector<8x128xf32>
    %399 = arith.addf %397, %398 : vector<8x128xf32>
    %400 = math.tanh %399 : vector<8x128xf32>
    %401 = arith.mulf %396, %400 : vector<8x128xf32>
    %c24_165 = arith.constant 24 : index
    %c0_166 = arith.constant 0 : index
    %402 = vector.load %arg12[%c24_165, %c0_166] : memref<64x512xf32, #tpu.memory_space<vmem>>, vector<8x512xf32>
    %cst_167 = arith.constant dense<0.000000e+00> : vector<8x512xf32>
    %403 = tpu.matmul %401, %297, %cst_167 {dimension_numbers = #tpu.dot_dimension_numbers<[1], [0], [0], [1], [0, 0, 1, 1], [], []>} : vector<8x128xf32>, vector<128x512xf32>, vector<8x512xf32> -> vector<8x512xf32>
    %404 = arith.addf %402, %403 : vector<8x512xf32>
    %405 = vector.extract_strided_slice %404 {offsets = [0, 0], sizes = [8, 128], strides = [1, 1]} : vector<8x512xf32> to vector<8x128xf32>
    %cst_168 = arith.constant 5.000000e-01 : f32
    %406 = vector.broadcast %cst_168 : f32 to vector<8x128xf32>
    %407 = arith.mulf %406, %405 : vector<8x128xf32>
    %408 = math.tanh %407 : vector<8x128xf32>
    %cst_169 = arith.constant 1.000000e+00 : f32
    %409 = vector.broadcast %cst_169 : f32 to vector<8x128xf32>
    %410 = arith.addf %408, %409 : vector<8x128xf32>
    %cst_170 = arith.constant 5.000000e-01 : f32
    %411 = vector.broadcast %cst_170 : f32 to vector<8x128xf32>
    %412 = arith.mulf %411, %410 : vector<8x128xf32>
    %413 = vector.extract_strided_slice %404 {offsets = [0, 128], sizes = [8, 128], strides = [1, 1]} : vector<8x512xf32> to vector<8x128xf32>
    %cst_171 = arith.constant 5.000000e-01 : f32
    %414 = vector.broadcast %cst_171 : f32 to vector<8x128xf32>
    %415 = arith.mulf %414, %413 : vector<8x128xf32>
    %416 = math.tanh %415 : vector<8x128xf32>
    %cst_172 = arith.constant 1.000000e+00 : f32
    %417 = vector.broadcast %cst_172 : f32 to vector<8x128xf32>
    %418 = arith.addf %416, %417 : vector<8x128xf32>
    %cst_173 = arith.constant 5.000000e-01 : f32
    %419 = vector.broadcast %cst_173 : f32 to vector<8x128xf32>
    %420 = arith.mulf %419, %418 : vector<8x128xf32>
    %421 = vector.extract_strided_slice %404 {offsets = [0, 256], sizes = [8, 128], strides = [1, 1]} : vector<8x512xf32> to vector<8x128xf32>
    %422 = math.tanh %421 : vector<8x128xf32>
    %423 = vector.extract_strided_slice %404 {offsets = [0, 384], sizes = [8, 128], strides = [1, 1]} : vector<8x512xf32> to vector<8x128xf32>
    %cst_174 = arith.constant 5.000000e-01 : f32
    %424 = vector.broadcast %cst_174 : f32 to vector<8x128xf32>
    %425 = arith.mulf %424, %423 : vector<8x128xf32>
    %426 = math.tanh %425 : vector<8x128xf32>
    %cst_175 = arith.constant 1.000000e+00 : f32
    %427 = vector.broadcast %cst_175 : f32 to vector<8x128xf32>
    %428 = arith.addf %426, %427 : vector<8x128xf32>
    %cst_176 = arith.constant 5.000000e-01 : f32
    %429 = vector.broadcast %cst_176 : f32 to vector<8x128xf32>
    %430 = arith.mulf %429, %428 : vector<8x128xf32>
    %431 = arith.mulf %420, %399 : vector<8x128xf32>
    %432 = arith.mulf %412, %422 : vector<8x128xf32>
    %433 = arith.addf %431, %432 : vector<8x128xf32>
    %434 = math.tanh %433 : vector<8x128xf32>
    %435 = arith.mulf %430, %434 : vector<8x128xf32>
    %c32_177 = arith.constant 32 : index
    %c0_178 = arith.constant 0 : index
    %436 = vector.load %arg12[%c32_177, %c0_178] : memref<64x512xf32, #tpu.memory_space<vmem>>, vector<8x512xf32>
    %cst_179 = arith.constant dense<0.000000e+00> : vector<8x512xf32>
    %437 = tpu.matmul %435, %297, %cst_179 {dimension_numbers = #tpu.dot_dimension_numbers<[1], [0], [0], [1], [0, 0, 1, 1], [], []>} : vector<8x128xf32>, vector<128x512xf32>, vector<8x512xf32> -> vector<8x512xf32>
    %438 = arith.addf %436, %437 : vector<8x512xf32>
    %439 = vector.extract_strided_slice %438 {offsets = [0, 0], sizes = [8, 128], strides = [1, 1]} : vector<8x512xf32> to vector<8x128xf32>
    %cst_180 = arith.constant 5.000000e-01 : f32
    %440 = vector.broadcast %cst_180 : f32 to vector<8x128xf32>
    %441 = arith.mulf %440, %439 : vector<8x128xf32>
    %442 = math.tanh %441 : vector<8x128xf32>
    %cst_181 = arith.constant 1.000000e+00 : f32
    %443 = vector.broadcast %cst_181 : f32 to vector<8x128xf32>
    %444 = arith.addf %442, %443 : vector<8x128xf32>
    %cst_182 = arith.constant 5.000000e-01 : f32
    %445 = vector.broadcast %cst_182 : f32 to vector<8x128xf32>
    %446 = arith.mulf %445, %444 : vector<8x128xf32>
    %447 = vector.extract_strided_slice %438 {offsets = [0, 128], sizes = [8, 128], strides = [1, 1]} : vector<8x512xf32> to vector<8x128xf32>
    %cst_183 = arith.constant 5.000000e-01 : f32
    %448 = vector.broadcast %cst_183 : f32 to vector<8x128xf32>
    %449 = arith.mulf %448, %447 : vector<8x128xf32>
    %450 = math.tanh %449 : vector<8x128xf32>
    %cst_184 = arith.constant 1.000000e+00 : f32
    %451 = vector.broadcast %cst_184 : f32 to vector<8x128xf32>
    %452 = arith.addf %450, %451 : vector<8x128xf32>
    %cst_185 = arith.constant 5.000000e-01 : f32
    %453 = vector.broadcast %cst_185 : f32 to vector<8x128xf32>
    %454 = arith.mulf %453, %452 : vector<8x128xf32>
    %455 = vector.extract_strided_slice %438 {offsets = [0, 256], sizes = [8, 128], strides = [1, 1]} : vector<8x512xf32> to vector<8x128xf32>
    %456 = math.tanh %455 : vector<8x128xf32>
    %457 = vector.extract_strided_slice %438 {offsets = [0, 384], sizes = [8, 128], strides = [1, 1]} : vector<8x512xf32> to vector<8x128xf32>
    %cst_186 = arith.constant 5.000000e-01 : f32
    %458 = vector.broadcast %cst_186 : f32 to vector<8x128xf32>
    %459 = arith.mulf %458, %457 : vector<8x128xf32>
    %460 = math.tanh %459 : vector<8x128xf32>
    %cst_187 = arith.constant 1.000000e+00 : f32
    %461 = vector.broadcast %cst_187 : f32 to vector<8x128xf32>
    %462 = arith.addf %460, %461 : vector<8x128xf32>
    %cst_188 = arith.constant 5.000000e-01 : f32
    %463 = vector.broadcast %cst_188 : f32 to vector<8x128xf32>
    %464 = arith.mulf %463, %462 : vector<8x128xf32>
    %465 = arith.mulf %454, %433 : vector<8x128xf32>
    %466 = arith.mulf %446, %456 : vector<8x128xf32>
    %467 = arith.addf %465, %466 : vector<8x128xf32>
    %468 = math.tanh %467 : vector<8x128xf32>
    %469 = arith.mulf %464, %468 : vector<8x128xf32>
    %c40_189 = arith.constant 40 : index
    %c0_190 = arith.constant 0 : index
    %470 = vector.load %arg12[%c40_189, %c0_190] : memref<64x512xf32, #tpu.memory_space<vmem>>, vector<8x512xf32>
    %cst_191 = arith.constant dense<0.000000e+00> : vector<8x512xf32>
    %471 = tpu.matmul %469, %297, %cst_191 {dimension_numbers = #tpu.dot_dimension_numbers<[1], [0], [0], [1], [0, 0, 1, 1], [], []>} : vector<8x128xf32>, vector<128x512xf32>, vector<8x512xf32> -> vector<8x512xf32>
    %472 = arith.addf %470, %471 : vector<8x512xf32>
    %473 = vector.extract_strided_slice %472 {offsets = [0, 0], sizes = [8, 128], strides = [1, 1]} : vector<8x512xf32> to vector<8x128xf32>
    %cst_192 = arith.constant 5.000000e-01 : f32
    %474 = vector.broadcast %cst_192 : f32 to vector<8x128xf32>
    %475 = arith.mulf %474, %473 : vector<8x128xf32>
    %476 = math.tanh %475 : vector<8x128xf32>
    %cst_193 = arith.constant 1.000000e+00 : f32
    %477 = vector.broadcast %cst_193 : f32 to vector<8x128xf32>
    %478 = arith.addf %476, %477 : vector<8x128xf32>
    %cst_194 = arith.constant 5.000000e-01 : f32
    %479 = vector.broadcast %cst_194 : f32 to vector<8x128xf32>
    %480 = arith.mulf %479, %478 : vector<8x128xf32>
    %481 = vector.extract_strided_slice %472 {offsets = [0, 128], sizes = [8, 128], strides = [1, 1]} : vector<8x512xf32> to vector<8x128xf32>
    %cst_195 = arith.constant 5.000000e-01 : f32
    %482 = vector.broadcast %cst_195 : f32 to vector<8x128xf32>
    %483 = arith.mulf %482, %481 : vector<8x128xf32>
    %484 = math.tanh %483 : vector<8x128xf32>
    %cst_196 = arith.constant 1.000000e+00 : f32
    %485 = vector.broadcast %cst_196 : f32 to vector<8x128xf32>
    %486 = arith.addf %484, %485 : vector<8x128xf32>
    %cst_197 = arith.constant 5.000000e-01 : f32
    %487 = vector.broadcast %cst_197 : f32 to vector<8x128xf32>
    %488 = arith.mulf %487, %486 : vector<8x128xf32>
    %489 = vector.extract_strided_slice %472 {offsets = [0, 256], sizes = [8, 128], strides = [1, 1]} : vector<8x512xf32> to vector<8x128xf32>
    %490 = math.tanh %489 : vector<8x128xf32>
    %491 = vector.extract_strided_slice %472 {offsets = [0, 384], sizes = [8, 128], strides = [1, 1]} : vector<8x512xf32> to vector<8x128xf32>
    %cst_198 = arith.constant 5.000000e-01 : f32
    %492 = vector.broadcast %cst_198 : f32 to vector<8x128xf32>
    %493 = arith.mulf %492, %491 : vector<8x128xf32>
    %494 = math.tanh %493 : vector<8x128xf32>
    %cst_199 = arith.constant 1.000000e+00 : f32
    %495 = vector.broadcast %cst_199 : f32 to vector<8x128xf32>
    %496 = arith.addf %494, %495 : vector<8x128xf32>
    %cst_200 = arith.constant 5.000000e-01 : f32
    %497 = vector.broadcast %cst_200 : f32 to vector<8x128xf32>
    %498 = arith.mulf %497, %496 : vector<8x128xf32>
    %499 = arith.mulf %488, %467 : vector<8x128xf32>
    %500 = arith.mulf %480, %490 : vector<8x128xf32>
    %501 = arith.addf %499, %500 : vector<8x128xf32>
    %502 = math.tanh %501 : vector<8x128xf32>
    %503 = arith.mulf %498, %502 : vector<8x128xf32>
    %c48_201 = arith.constant 48 : index
    %c0_202 = arith.constant 0 : index
    %504 = vector.load %arg12[%c48_201, %c0_202] : memref<64x512xf32, #tpu.memory_space<vmem>>, vector<8x512xf32>
    %cst_203 = arith.constant dense<0.000000e+00> : vector<8x512xf32>
    %505 = tpu.matmul %503, %297, %cst_203 {dimension_numbers = #tpu.dot_dimension_numbers<[1], [0], [0], [1], [0, 0, 1, 1], [], []>} : vector<8x128xf32>, vector<128x512xf32>, vector<8x512xf32> -> vector<8x512xf32>
    %506 = arith.addf %504, %505 : vector<8x512xf32>
    %507 = vector.extract_strided_slice %506 {offsets = [0, 0], sizes = [8, 128], strides = [1, 1]} : vector<8x512xf32> to vector<8x128xf32>
    %cst_204 = arith.constant 5.000000e-01 : f32
    %508 = vector.broadcast %cst_204 : f32 to vector<8x128xf32>
    %509 = arith.mulf %508, %507 : vector<8x128xf32>
    %510 = math.tanh %509 : vector<8x128xf32>
    %cst_205 = arith.constant 1.000000e+00 : f32
    %511 = vector.broadcast %cst_205 : f32 to vector<8x128xf32>
    %512 = arith.addf %510, %511 : vector<8x128xf32>
    %cst_206 = arith.constant 5.000000e-01 : f32
    %513 = vector.broadcast %cst_206 : f32 to vector<8x128xf32>
    %514 = arith.mulf %513, %512 : vector<8x128xf32>
    %515 = vector.extract_strided_slice %506 {offsets = [0, 128], sizes = [8, 128], strides = [1, 1]} : vector<8x512xf32> to vector<8x128xf32>
    %cst_207 = arith.constant 5.000000e-01 : f32
    %516 = vector.broadcast %cst_207 : f32 to vector<8x128xf32>
    %517 = arith.mulf %516, %515 : vector<8x128xf32>
    %518 = math.tanh %517 : vector<8x128xf32>
    %cst_208 = arith.constant 1.000000e+00 : f32
    %519 = vector.broadcast %cst_208 : f32 to vector<8x128xf32>
    %520 = arith.addf %518, %519 : vector<8x128xf32>
    %cst_209 = arith.constant 5.000000e-01 : f32
    %521 = vector.broadcast %cst_209 : f32 to vector<8x128xf32>
    %522 = arith.mulf %521, %520 : vector<8x128xf32>
    %523 = vector.extract_strided_slice %506 {offsets = [0, 256], sizes = [8, 128], strides = [1, 1]} : vector<8x512xf32> to vector<8x128xf32>
    %524 = math.tanh %523 : vector<8x128xf32>
    %525 = vector.extract_strided_slice %506 {offsets = [0, 384], sizes = [8, 128], strides = [1, 1]} : vector<8x512xf32> to vector<8x128xf32>
    %cst_210 = arith.constant 5.000000e-01 : f32
    %526 = vector.broadcast %cst_210 : f32 to vector<8x128xf32>
    %527 = arith.mulf %526, %525 : vector<8x128xf32>
    %528 = math.tanh %527 : vector<8x128xf32>
    %cst_211 = arith.constant 1.000000e+00 : f32
    %529 = vector.broadcast %cst_211 : f32 to vector<8x128xf32>
    %530 = arith.addf %528, %529 : vector<8x128xf32>
    %cst_212 = arith.constant 5.000000e-01 : f32
    %531 = vector.broadcast %cst_212 : f32 to vector<8x128xf32>
    %532 = arith.mulf %531, %530 : vector<8x128xf32>
    %533 = arith.mulf %522, %501 : vector<8x128xf32>
    %534 = arith.mulf %514, %524 : vector<8x128xf32>
    %535 = arith.addf %533, %534 : vector<8x128xf32>
    %536 = math.tanh %535 : vector<8x128xf32>
    %537 = arith.mulf %532, %536 : vector<8x128xf32>
    %c56_213 = arith.constant 56 : index
    %c0_214 = arith.constant 0 : index
    %538 = vector.load %arg12[%c56_213, %c0_214] : memref<64x512xf32, #tpu.memory_space<vmem>>, vector<8x512xf32>
    %cst_215 = arith.constant dense<0.000000e+00> : vector<8x512xf32>
    %539 = tpu.matmul %537, %297, %cst_215 {dimension_numbers = #tpu.dot_dimension_numbers<[1], [0], [0], [1], [0, 0, 1, 1], [], []>} : vector<8x128xf32>, vector<128x512xf32>, vector<8x512xf32> -> vector<8x512xf32>
    %540 = arith.addf %538, %539 : vector<8x512xf32>
    %541 = vector.extract_strided_slice %540 {offsets = [0, 0], sizes = [8, 128], strides = [1, 1]} : vector<8x512xf32> to vector<8x128xf32>
    %cst_216 = arith.constant 5.000000e-01 : f32
    %542 = vector.broadcast %cst_216 : f32 to vector<8x128xf32>
    %543 = arith.mulf %542, %541 : vector<8x128xf32>
    %544 = math.tanh %543 : vector<8x128xf32>
    %cst_217 = arith.constant 1.000000e+00 : f32
    %545 = vector.broadcast %cst_217 : f32 to vector<8x128xf32>
    %546 = arith.addf %544, %545 : vector<8x128xf32>
    %cst_218 = arith.constant 5.000000e-01 : f32
    %547 = vector.broadcast %cst_218 : f32 to vector<8x128xf32>
    %548 = arith.mulf %547, %546 : vector<8x128xf32>
    %549 = vector.extract_strided_slice %540 {offsets = [0, 128], sizes = [8, 128], strides = [1, 1]} : vector<8x512xf32> to vector<8x128xf32>
    %cst_219 = arith.constant 5.000000e-01 : f32
    %550 = vector.broadcast %cst_219 : f32 to vector<8x128xf32>
    %551 = arith.mulf %550, %549 : vector<8x128xf32>
    %552 = math.tanh %551 : vector<8x128xf32>
    %cst_220 = arith.constant 1.000000e+00 : f32
    %553 = vector.broadcast %cst_220 : f32 to vector<8x128xf32>
    %554 = arith.addf %552, %553 : vector<8x128xf32>
    %cst_221 = arith.constant 5.000000e-01 : f32
    %555 = vector.broadcast %cst_221 : f32 to vector<8x128xf32>
    %556 = arith.mulf %555, %554 : vector<8x128xf32>
    %557 = vector.extract_strided_slice %540 {offsets = [0, 256], sizes = [8, 128], strides = [1, 1]} : vector<8x512xf32> to vector<8x128xf32>
    %558 = math.tanh %557 : vector<8x128xf32>
    %559 = vector.extract_strided_slice %540 {offsets = [0, 384], sizes = [8, 128], strides = [1, 1]} : vector<8x512xf32> to vector<8x128xf32>
    %cst_222 = arith.constant 5.000000e-01 : f32
    %560 = vector.broadcast %cst_222 : f32 to vector<8x128xf32>
    %561 = arith.mulf %560, %559 : vector<8x128xf32>
    %562 = math.tanh %561 : vector<8x128xf32>
    %cst_223 = arith.constant 1.000000e+00 : f32
    %563 = vector.broadcast %cst_223 : f32 to vector<8x128xf32>
    %564 = arith.addf %562, %563 : vector<8x128xf32>
    %cst_224 = arith.constant 5.000000e-01 : f32
    %565 = vector.broadcast %cst_224 : f32 to vector<8x128xf32>
    %566 = arith.mulf %565, %564 : vector<8x128xf32>
    %567 = arith.mulf %556, %535 : vector<8x128xf32>
    %568 = arith.mulf %548, %558 : vector<8x128xf32>
    %569 = arith.addf %567, %568 : vector<8x128xf32>
    %570 = math.tanh %569 : vector<8x128xf32>
    %571 = arith.mulf %566, %570 : vector<8x128xf32>
    %cst_225 = arith.constant 0.000000e+00 : f32
    %572 = vector.broadcast %cst_225 : f32 to vector<8x128xf32>
    %573 = arith.maximumf %571, %572 : vector<8x128xf32>
    %c0_226 = arith.constant 0 : index
    %c0_227 = arith.constant 0 : index
    %574 = vector.load %arg8[%c0_226, %c0_227] : memref<128x128xf32, #tpu.memory_space<vmem>>, vector<128x128xf32>
    %cst_228 = arith.constant dense<0.000000e+00> : vector<8x128xf32>
    %575 = tpu.matmul %573, %574, %cst_228 {dimension_numbers = #tpu.dot_dimension_numbers<[1], [0], [0], [1], [0, 0, 1, 1], [], []>} : vector<8x128xf32>, vector<128x128xf32>, vector<8x128xf32> -> vector<8x128xf32>
    %c0_229 = arith.constant 0 : index
    %c0_230 = arith.constant 0 : index
    %576 = vector.load %arg9[%c0_229, %c0_230] : memref<1x128xf32, #tpu.memory_space<vmem>>, vector<1x128xf32>
    %577 = vector.broadcast %576 : vector<1x128xf32> to vector<8x128xf32>
    %578 = arith.addf %575, %577 : vector<8x128xf32>
    %cst_231 = arith.constant dense<0xFF800000> : vector<8xf32>
    %579 = vector.multi_reduction <maximumf>, %578, %cst_231 [1] : vector<8x128xf32> to vector<8xf32>
    %580 = vector.shape_cast %579 : vector<8xf32> to vector<8x1xf32>
    %581 = vector.broadcast %580 : vector<8x1xf32> to vector<8x128xf32>
    %582 = arith.subf %578, %581 : vector<8x128xf32>
    %583 = math.exp %582 : vector<8x128xf32>
    %cst_232 = arith.constant dense<0.000000e+00> : vector<8xf32>
    %584 = vector.multi_reduction <add>, %583, %cst_232 [1] : vector<8x128xf32> to vector<8xf32>
    %585 = vector.shape_cast %584 : vector<8xf32> to vector<8x1xf32>
    %586 = vector.broadcast %585 : vector<8x1xf32> to vector<8x128xf32>
    %587 = arith.divf %583, %586 : vector<8x128xf32>
    %c0_233 = arith.constant 0 : index
    %c0_234 = arith.constant 0 : index
    %588 = vector.load %arg10[%c0_233, %c0_234] : memref<8x128xf32, #tpu.memory_space<vmem>>, vector<8x128xf32>
    tpu.vector_store %arg10[%c0_233, %c0_234], %587 {strides = array<i32>} : memref<8x128xf32, #tpu.memory_space<vmem>>, vector<8x128xf32>,
    return
  }
  func.func @transform_0(%arg0: i32) -> (i32, i32) {
    %c0_i32 = arith.constant 0 : i32
    %c0_i32_0 = arith.constant 0 : i32
    %c0_i32_1 = arith.constant 0 : i32
    return %c0_i32, %c0_i32_0 : i32, i32
  }
  func.func @transform_1(%arg0: i32) -> (i32, i32) {
    %c0_i32 = arith.constant 0 : i32
    %c0_i32_0 = arith.constant 0 : i32
    %c0_i32_1 = arith.constant 0 : i32
    return %c0_i32, %c0_i32_0 : i32, i32
  }
  func.func @transform_2(%arg0: i32) -> (i32, i32) {
    %c0_i32 = arith.constant 0 : i32
    %c0_i32_0 = arith.constant 0 : i32
    %c0_i32_1 = arith.constant 0 : i32
    return %c0_i32, %c0_i32_0 : i32, i32
  }
  func.func @transform_3(%arg0: i32) -> (i32, i32) {
    %c0_i32 = arith.constant 0 : i32
    %c0_i32_0 = arith.constant 0 : i32
    %c0_i32_1 = arith.constant 0 : i32
    return %c0_i32, %c0_i32_0 : i32, i32
  }
  func.func @transform_4(%arg0: i32) -> (i32, i32) {
    %c0_i32 = arith.constant 0 : i32
    %c0_i32_0 = arith.constant 0 : i32
    %c0_i32_1 = arith.constant 0 : i32
    return %c0_i32, %c0_i32_0 : i32, i32
  }
  func.func @transform_5(%arg0: i32) -> (i32, i32) {
    %c0_i32 = arith.constant 0 : i32
    %c0_i32_0 = arith.constant 0 : i32
    %c0_i32_1 = arith.constant 0 : i32
    return %c0_i32, %c0_i32_0 : i32, i32
  }
  func.func @transform_6(%arg0: i32) -> (i32, i32) {
    %c0_i32 = arith.constant 0 : i32
    %c0_i32_0 = arith.constant 0 : i32
    %c0_i32_1 = arith.constant 0 : i32
    return %c0_i32, %c0_i32_0 : i32, i32
  }
  func.func @transform_7(%arg0: i32) -> (i32, i32) {
    %c0_i32 = arith.constant 0 : i32
    %c0_i32_0 = arith.constant 0 : i32
    %c0_i32_1 = arith.constant 0 : i32
    return %c0_i32, %c0_i32_0 : i32, i32
  }
  func.func @transform_8(%arg0: i32) -> (i32, i32) {
    %c0_i32 = arith.constant 0 : i32
    %c0_i32_0 = arith.constant 0 : i32
    %c0_i32_1 = arith.constant 0 : i32
    return %c0_i32, %c0_i32_0 : i32, i32
  }
  func.func @transform_9(%arg0: i32) -> (i32, i32) {
    %c0_i32 = arith.constant 0 : i32
    %c0_i32_0 = arith.constant 0 : i32
    %c0_i32_1 = arith.constant 0 : i32
    return %c0_i32, %c0_i32_0 : i32, i32
  }
}

</mosaic_0001>

<bundles_post_ra>
// kernel: tpu_custom_call.1
= control target key start
LH: loop header
LB: loop body
LE: loop exit
PB: predicated region body
PF: predicated region fallthrough
CT: control target
= control target key end

     0   :  { %14 = vsyncpa [#allocation5], 0  ;;  %s6365_s0 = inlined_call_operand.hbm [shape: f32[64,128], index: 0, kind: input, shape index: {}]   ;;  %s6366_s1 = inlined_call_operand.hbm [shape: f32[128,512], index: 1, kind: input, shape index: {}]   ;;  %s6367_s2 = inlined_call_operand.hbm [shape: f32[128,512], index: 2, kind: input, shape index: {}]   ;;  %s6368_s3 = inlined_call_operand.vmem [shape: f32[1,512], index: 3, kind: input, shape index: {}]   ;;  %s6369_s4 = inlined_call_operand.hbm [shape: f32[128,512], index: 4, kind: input, shape index: {}]   ;;  %s6370_s5 = inlined_call_operand.hbm [shape: f32[128,512], index: 5, kind: input, shape index: {}]   ;;  %s6371_s6 = inlined_call_operand.vmem [shape: f32[1,512], index: 6, kind: input, shape index: {}]   ;;  %s6372_s7 = inlined_call_operand.hbm [shape: f32[128,128], index: 7, kind: input, shape index: {}]   ;;  %s6373_s8 = inlined_call_operand.vmem [shape: f32[1,128], index: 8, kind: input, shape index: {}]   ;;  %s6374_s9 = inlined_call_operand.hbm [shape: f32[8,128], index: 9, kind: output, shape index: {}]  }
   0x1   :  { %15 = vsyncpa [#allocation8], 0 }
   0x2   :  { %16 = vsyncpa [#allocation11], 0 }
   0x3   :  { %17 = vsyncpa [#allocation14], 0 }
   0x4   :  { %18 = vsyncpa [#allocation6], 0  ;;  %s4273_s30 = smov [#allocation7]  }
   0x5   :  { %s36_s10 = sshll.u32 %s4273_s30, 4  ;;  %s37_s10 = int_to_ptr.vmem [resolvable:$true] %s36_s10 }
   0x6   :  { %s4131_s11 = scalar_lea.vmem %s37_s10, 8192  ;;  %p4136_p1 = scmp.lt.s32.totalorder %s37_s10, %s37_s10 }
   0x7   :  { %p4132_p0 = scmp.ne.s32.totalorder %s37_s10, %s4131_s11  ;;  %p4137_p2 = scmp.lt.s32.totalorder %s4131_s11, %s4131_s11 }
   0x9   :  { %p4138_p3 = por %p4137_p2, %p4136_p1 }
   0xb   :  { %p4139_p4 = pnand %p4138_p3, %p4132_p0 }
   0xd   :  { %4142 = shalt.err (!%p4139_p4)
}
   0xe   :  { %s4274_s12 = smov 512   ;;  %s4275_s13 = smov 32  }
   0xf   :  { %42 = dma.hbm_to_vmem [thread:$0]  %s6366_s1, 8192, %s37_s10, [#allocation8], %s4274_s12, %s4274_s12, %s4275_s13  }
  0x10   :  { %s4276_s16 = smov [#allocation10]   ;;  %s4277_s18 = smov [#allocation4]  }
  0x11   :  { %s62_s17 = sshll.u32 %s4276_s16, 4  ;;  %s24_s19 = sshll.u32 %s4277_s18, 4  ;;  %s63_s17 = int_to_ptr.vmem [resolvable:$true] %s62_s17  ;;  %s25_s19 = int_to_ptr.vmem [resolvable:$true] %s24_s19 }
  0x12   :  { %s4151_s20 = scalar_lea.vmem %s63_s17, 8192  ;;  %p4156_p6 = scmp.lt.s32.totalorder %s63_s17, %s63_s17 }
  0x13   :  { %p4152_p5 = scmp.ne.s32.totalorder %s63_s17, %s4151_s20  ;;  %p4157_p7 = scmp.lt.s32.totalorder %s4151_s20, %s4151_s20 }
  0x15   :  { %p4158_p8 = por %p4157_p7, %p4156_p6 }
  0x17   :  { %p4159_p9 = pnand %p4158_p8, %p4152_p5 }
  0x19   :  { %4162 = shalt.err (!%p4159_p9)
}
  0x1a   :  { %68 = dma.hbm_to_vmem [thread:$0]  %s6369_s4, 8192, %s63_s17, [#allocation11], %s4274_s12, %s4274_s12, %s4275_s13  }
  0x1b   :  { %s4171_s1 = scalar_lea.vmem %s25_s19, 1024  ;;  %p4176_p11 = scmp.lt.s32.totalorder %s25_s19, %s25_s19 }
  0x1c   :  { %p4172_p10 = scmp.ne.s32.totalorder %s25_s19, %s4171_s1  ;;  %p4177_p12 = scmp.lt.s32.totalorder %s4171_s1, %s4171_s1 }
  0x1e   :  { %p4178_p13 = por %p4177_p12, %p4176_p11 }
  0x20   :  { %p4179_p0 = pnand %p4178_p13, %p4172_p10 }
  0x22   :  { %4182 = shalt.err (!%p4179_p0)
}
  0x23   :  { %s4278_s23 = smov 128   ;;  %s4279_s24 = smov 8  }
  0x24   :  { %30 = dma.hbm_to_vmem [thread:$0]  %s6365_s0, 1024, %s25_s19, [#allocation5], %s4278_s23, %s4278_s23, %s4279_s24  }
  0x25   :  { %s4280_s27 = smov [#allocation9]   ;;  %s4281_s4 = smov [#allocation12]  }
  0x26   :  { %s48_s28 = sshll.u32 %s4280_s27, 4  ;;  %s74_s29 = sshll.u32 %s4281_s4, 4  ;;  %s49_s28 = int_to_ptr.vmem [resolvable:$true] %s48_s28  ;;  %s75_s29 = int_to_ptr.vmem [resolvable:$true] %s74_s29 }
  0x27   :  { %s4191_s30 = scalar_lea.vmem %s49_s28, 8192  ;;  %p4196_p2 = scmp.lt.s32.totalorder %s49_s28, %s49_s28 }
  0x28   :  { %p4192_p1 = scmp.ne.s32.totalorder %s49_s28, %s4191_s30  ;;  %p4197_p3 = scmp.lt.s32.totalorder %s4191_s30, %s4191_s30 }
  0x2a   :  { %p4198_p4 = por %p4197_p3, %p4196_p2 }
  0x2c   :  { %p4199_p5 = pnand %p4198_p4, %p4192_p1 }
  0x2e   :  { %4202 = shalt.err (!%p4199_p5)
}
  0x2f   :  { %54 = dma.hbm_to_vmem [thread:$0]  %s6367_s2, 8192, %s49_s28, [#allocation8], %s4274_s12, %s4274_s12, %s4275_s13  }
  0x30   :  { %s4211_s0 = scalar_lea.vmem %s75_s29, 8192  ;;  %p4216_p7 = scmp.lt.s32.totalorder %s75_s29, %s75_s29 }
  0x31   :  { %p4212_p6 = scmp.ne.s32.totalorder %s75_s29, %s4211_s0  ;;  %p4217_p8 = scmp.lt.s32.totalorder %s4211_s0, %s4211_s0 }
  0x33   :  { %p4218_p9 = por %p4217_p8, %p4216_p7 }
  0x35   :  { %p4219_p10 = pnand %p4218_p9, %p4212_p6 }
  0x37   :  { %4222 = shalt.err (!%p4219_p10)
}
  0x38   :  { %80 = dma.hbm_to_vmem [thread:$0]  %s6370_s5, 8192, %s75_s29, [#allocation11], %s4274_s12, %s4274_s12, %s4275_s13  }
  0x39   :  { %s4282_s16 = smov [#allocation13]  }
  0x3a   :  { %s88_s17 = sshll.u32 %s4282_s16, 4  ;;  %s89_s17 = int_to_ptr.vmem [resolvable:$true] %s88_s17 }
  0x3b   :  { %s4231_s18 = scalar_lea.vmem %s89_s17, 2048  ;;  %p4236_p12 = scmp.lt.s32.totalorder %s89_s17, %s89_s17 }
  0x3c   :  { %p4232_p11 = scmp.ne.s32.totalorder %s89_s17, %s4231_s18  ;;  %p4237_p13 = scmp.lt.s32.totalorder %s4231_s18, %s4231_s18 }
  0x3e   :  { %p4238_p0 = por %p4237_p13, %p4236_p12 }
  0x40   :  { %p4239_p1 = pnand %p4238_p0, %p4232_p11 }
  0x42   :  { %4242 = shalt.err (!%p4239_p1)
}
  0x43   :  { %94 = dma.hbm_to_vmem [thread:$0]  %s6372_s7, 2048, %s89_s17, [#allocation14], %s4278_s23, %s4278_s23, %s4279_s24  }
  0x44   :  { %4263 = dma.done.wait [#allocation5], 1024  }
  0x45   :  { %4264 = vsyncadd [#allocation5], 4294966272 }
  0x46   :  { %4265 = dma.done.wait [#allocation8], 16384  }
  0x47   :  { %4266 = vsyncadd [#allocation8], 4294950912 }
  0x48   :  { %4267 = dma.done.wait [#allocation11], 16384  }
  0x49   :  { %4268 = vsyncadd [#allocation11], 4294950912 }
  0x4a   :  { %4269 = dma.done.wait [#allocation14], 2048  }
  0x4b   :  { %4270 = vsyncadd [#allocation14], 4294965248  ;;  %v6375_v0 = vmov 0.0   ;;  %v184_v1 = vld [vmem:[#allocation7 + $0x1e8] sm:$0xff]  ;;  %v186_v2 = vld [vmem:[#allocation7 + $0x1f8] sm:$0xff]  ;;  %vm4284_vm0 = vmmov 0  }
  0x4c   :  { %273 = vmatprep.mubr.f32.mxu0 %v6375_v0  ;;  %386 = vmatprep.mubr.f32.mxu1 %v6375_v0  ;;  %v183_v3 = vld [vmem:[#allocation7 + $0x1e0] sm:$0xff]  ;;  %v185_v4 = vld [vmem:[#allocation7 + $0x1f0] sm:$0xff]  ;;  %v180_v5 = vld [vmem:[#allocation7 + $0x1c8] sm:$0xff]  ;;  %s4285_s20 = smov [#allocation15]  }
  0x4d   :  { %209 = vmatprep.subr.mxu0 %v184_v1  ;;  %322 = vmatprep.subr.mxu1 %v186_v2  ;;  %v182_v6 = vld [vmem:[#allocation7 + $0x1d8] sm:$0xff]  ;;  %v179_v7 = vld [vmem:[#allocation7 + $0x1c0] sm:$0xff]  ;;  %v181_v8 = vld [vmem:[#allocation7 + $0x1d0] sm:$0xff]  ;;  %s3753_s21 = sshll.u32 %s4285_s20, 4  ;;  %s3754_s21 = int_to_ptr.vmem [resolvable:$true] %s3753_s21 }
  0x4e   :  { %210 = vmatpush1.msra.mxu0 %v183_v3  ;;  %323 = vmatpush1.msra.mxu1 %v185_v4  ;;  %v176_v9 = vld [vmem:[#allocation7 + $0x1a8] sm:$0xff]  ;;  %v178_v10 = vld [vmem:[#allocation7 + $0x1b8] sm:$0xff]  ;;  %v175_v11 = vld [vmem:[#allocation7 + $0x1a0] sm:$0xff]  ;;  %s4243_s22 = scalar_lea.vmem %s3754_s21, 128  ;;  %p4248_p3 = scmp.lt.s32.totalorder %s3754_s21, %s3754_s21 }
  0x4f   :  { %211 = vmatprep.subr.mxu0 %v180_v5  ;;  %324 = vmatprep.subr.mxu1 %v182_v6  ;;  %v177_v12 = vld [vmem:[#allocation7 + $0x1b0] sm:$0xff]  ;;  %v172_v13 = vld [vmem:[#allocation7 + $0x188] sm:$0xff]  ;;  %v174_v14 = vld [vmem:[#allocation7 + $0x198] sm:$0xff]  ;;  %p4244_p2 = scmp.ne.s32.totalorder %s3754_s21, %s4243_s22  ;;  %p4249_p4 = scmp.lt.s32.totalorder %s4243_s22, %s4243_s22 }
  0x50   :  { %212 = vmatpush1.msra.mxu0 %v179_v7  ;;  %325 = vmatpush1.msra.mxu1 %v181_v8  ;;  %v171_v15 = vld [vmem:[#allocation7 + $0x180] sm:$0xff]  ;;  %v173_v16 = vld [vmem:[#allocation7 + $0x190] sm:$0xff]  ;;  %v168_v17 = vld [vmem:[#allocation7 + $0x168] sm:$0xff] }
  0x51   :  { %213 = vmatprep.subr.mxu0 %v176_v9  ;;  %326 = vmatprep.subr.mxu1 %v178_v10  ;;  %v170_v18 = vld [vmem:[#allocation7 + $0x178] sm:$0xff]  ;;  %v167_v19 = vld [vmem:[#allocation7 + $0x160] sm:$0xff]  ;;  %v169_v20 = vld [vmem:[#allocation7 + $0x170] sm:$0xff]  ;;  %p4250_p5 = por %p4249_p4, %p4248_p3 }
  0x52   :  { %214 = vmatpush1.msra.mxu0 %v175_v11  ;;  %327 = vmatpush1.msra.mxu1 %v177_v12  ;;  %v164_v21 = vld [vmem:[#allocation7 + $0x148] sm:$0xff]  ;;  %v166_v22 = vld [vmem:[#allocation7 + $0x158] sm:$0xff]  ;;  %v163_v23 = vld [vmem:[#allocation7 + $0x140] sm:$0xff] }
  0x53   :  { %215 = vmatprep.subr.mxu0 %v172_v13  ;;  %328 = vmatprep.subr.mxu1 %v174_v14  ;;  %v165_v24 = vld [vmem:[#allocation7 + $0x150] sm:$0xff]  ;;  %v160_v25 = vld [vmem:[#allocation7 + $0x128] sm:$0xff]  ;;  %v162_v26 = vld [vmem:[#allocation7 + $0x138] sm:$0xff]  ;;  %p4251_p6 = pnand %p4250_p5, %p4244_p2 }
  0x54   :  { %216 = vmatpush1.msra.mxu0 %v171_v15  ;;  %329 = vmatpush1.msra.mxu1 %v173_v16  ;;  %v159_v27 = vld [vmem:[#allocation7 + $0x120] sm:$0xff]  ;;  %v161_v28 = vld [vmem:[#allocation7 + $0x130] sm:$0xff]  ;;  %v156_v29 = vld [vmem:[#allocation7 + $0x108] sm:$0xff] }
  0x55   :  { %217 = vmatprep.subr.mxu0 %v168_v17  ;;  %330 = vmatprep.subr.mxu1 %v170_v18  ;;  %v158_v30 = vld [vmem:[#allocation7 + $0x118] sm:$0xff]  ;;  %v155_v31 = vld [vmem:[#allocation7 + $0x100] sm:$0xff]  ;;  %v157_v32 = vld [vmem:[#allocation7 + $0x110] sm:$0xff] }
  0x56   :  { %218 = vmatpush1.msra.mxu0 %v167_v19  ;;  %331 = vmatpush1.msra.mxu1 %v169_v20  ;;  %v152_v33 = vld [vmem:[#allocation7 + $0xe8] sm:$0xff]  ;;  %v154_v34 = vld [vmem:[#allocation7 + $0xf8] sm:$0xff]  ;;  %v151_v35 = vld [vmem:[#allocation7 + $0xe0] sm:$0xff] }
  0x57   :  { %219 = vmatprep.subr.mxu0 %v164_v21  ;;  %332 = vmatprep.subr.mxu1 %v166_v22  ;;  %v153_v36 = vld [vmem:[#allocation7 + $0xf0] sm:$0xff]  ;;  %v148_v37 = vld [vmem:[#allocation7 + $0xc8] sm:$0xff]  ;;  %v150_v38 = vld [vmem:[#allocation7 + $0xd8] sm:$0xff] }
  0x58   :  { %220 = vmatpush1.msra.mxu0 %v163_v23  ;;  %333 = vmatpush1.msra.mxu1 %v165_v24  ;;  %v147_v39 = vld [vmem:[#allocation7 + $0xc0] sm:$0xff]  ;;  %v149_v40 = vld [vmem:[#allocation7 + $0xd0] sm:$0xff]  ;;  %v144_v41 = vld [vmem:[#allocation7 + $0xa8] sm:$0xff] }
  0x59   :  { %221 = vmatprep.subr.mxu0 %v160_v25  ;;  %334 = vmatprep.subr.mxu1 %v162_v26  ;;  %v146_v42 = vld [vmem:[#allocation7 + $0xb8] sm:$0xff]  ;;  %v143_v43 = vld [vmem:[#allocation7 + $0xa0] sm:$0xff]  ;;  %v145_v44 = vld [vmem:[#allocation7 + $0xb0] sm:$0xff] }
  0x5a   :  { %222 = vmatpush1.msra.mxu0 %v159_v27  ;;  %335 = vmatpush1.msra.mxu1 %v161_v28  ;;  %v140_v45 = vld [vmem:[#allocation7 + $0x88] sm:$0xff]  ;;  %v142_v46 = vld [vmem:[#allocation7 + $0x98] sm:$0xff]  ;;  %v139_v47 = vld [vmem:[#allocation7 + $0x80] sm:$0xff] }
  0x5b   :  { %223 = vmatprep.subr.mxu0 %v156_v29  ;;  %336 = vmatprep.subr.mxu1 %v158_v30  ;;  %v141_v48 = vld [vmem:[#allocation7 + $0x90] sm:$0xff]  ;;  %v136_v49 = vld [vmem:[#allocation7 + $0x68] sm:$0xff]  ;;  %v138_v50 = vld [vmem:[#allocation7 + $0x78] sm:$0xff] }
  0x5c   :  { %224 = vmatpush1.msra.mxu0 %v155_v31  ;;  %337 = vmatpush1.msra.mxu1 %v157_v32  ;;  %v135_v51 = vld [vmem:[#allocation7 + $0x60] sm:$0xff]  ;;  %v137_v52 = vld [vmem:[#allocation7 + $0x70] sm:$0xff]  ;;  %v132_v53 = vld [vmem:[#allocation7 + $0x48] sm:$0xff] }
  0x5d   :  { %225 = vmatprep.subr.mxu0 %v152_v33  ;;  %338 = vmatprep.subr.mxu1 %v154_v34  ;;  %v134_v54 = vld [vmem:[#allocation7 + $0x58] sm:$0xff]  ;;  %v131_v55 = vld [vmem:[#allocation7 + $0x40] sm:$0xff]  ;;  %v133_v56 = vld [vmem:[#allocation7 + $0x50] sm:$0xff] }
  0x5e   :  { %226 = vmatpush1.msra.mxu0 %v151_v35  ;;  %339 = vmatpush1.msra.mxu1 %v153_v36  ;;  %v128_v57 = vld [vmem:[#allocation7 + $0x28] sm:$0xff]  ;;  %v130_v58 = vld [vmem:[#allocation7 + $0x38] sm:$0xff]  ;;  %v127_v59 = vld [vmem:[#allocation7 + $0x20] sm:$0xff] }
  0x5f   :  { %227 = vmatprep.subr.mxu0 %v148_v37  ;;  %340 = vmatprep.subr.mxu1 %v150_v38  ;;  %v129_v60 = vld [vmem:[#allocation7 + $0x30] sm:$0xff]  ;;  %v124_v61 = vld [vmem:[#allocation7 + $0x8] sm:$0xff]  ;;  %v126_v62 = vld [vmem:[#allocation7 + $0x18] sm:$0xff] }
  0x60   :  { %228 = vmatpush1.msra.mxu0 %v147_v39  ;;  %341 = vmatpush1.msra.mxu1 %v149_v40  ;;  %v123_v63 = vld [vmem:[#allocation7] sm:$0xff]  ;;  %v125_v1 = vld [vmem:[#allocation7 + $0x10] sm:$0xff]  ;;  %v4374_v3 = vld [vmem:[#allocation9 + $0x1e8] sm:$0xff] }
  0x61   :  { %229 = vmatprep.subr.mxu0 %v144_v41  ;;  %342 = vmatprep.subr.mxu1 %v146_v42  ;;  %v115_v2 = vld [vmem:[#allocation4] sm:$0xff]  ;;  %6584 = vst [vmem:[#allocation21_spill] sm:$0xff] %v4374_v3  ;;  %v4376_v4 = vld [vmem:[#allocation9 + $0x1f8] sm:$0xff]  ;;  %v4380_v6 = vld [vmem:[#allocation9 + $0x1f0] sm:$0xff] }
  0x62   :  { %230 = vmatpush1.msra.mxu0 %v143_v43  ;;  %343 = vmatpush1.msra.mxu1 %v145_v44  ;;  %6585 = vst [vmem:[#allocation22_spill] sm:$0xff] %v4376_v4  ;;  %v4378_v5 = vld [vmem:[#allocation9 + $0x1e0] sm:$0xff]  ;;  %v4382_v7 = vld [vmem:[#allocation9 + $0x1c8] sm:$0xff]  ;;  %v4384_v8 = vld [vmem:[#allocation9 + $0x1d8] sm:$0xff] }
  0x63   :  { %231 = vmatprep.subr.mxu0 %v140_v45  ;;  %344 = vmatprep.subr.mxu1 %v142_v46  ;;  %v4390_v9 = vld [vmem:[#allocation9 + $0x1c0] sm:$0xff]  ;;  %v4392_v10 = vld [vmem:[#allocation9 + $0x1d0] sm:$0xff]  ;;  %v116_v11 = vld [vmem:[#allocation4 + $0x8] sm:$0xff] }
  0x64   :  { %232 = vmatpush1.msra.mxu0 %v139_v47  ;;  %345 = vmatpush1.msra.mxu1 %v141_v48  ;;  %v4398_v12 = vld [vmem:[#allocation9 + $0x1a8] sm:$0xff]  ;;  %v4400_v13 = vld [vmem:[#allocation9 + $0x1b8] sm:$0xff]  ;;  %v4404_v14 = vld [vmem:[#allocation9 + $0x1a0] sm:$0xff] }
  0x65   :  { %233 = vmatprep.subr.mxu0 %v136_v49  ;;  %346 = vmatprep.subr.mxu1 %v138_v50  ;;  %v4406_v15 = vld [vmem:[#allocation9 + $0x1b0] sm:$0xff]  ;;  %v4408_v16 = vld [vmem:[#allocation9 + $0x188] sm:$0xff]  ;;  %v4410_v17 = vld [vmem:[#allocation9 + $0x198] sm:$0xff] }
  0x66   :  { %234 = vmatpush1.msra.mxu0 %v135_v51  ;;  %347 = vmatpush1.msra.mxu1 %v137_v52  ;;  %v4416_v18 = vld [vmem:[#allocation9 + $0x180] sm:$0xff]  ;;  %v4418_v19 = vld [vmem:[#allocation9 + $0x190] sm:$0xff]  ;;  %v4424_v21 = vld [vmem:[#allocation9 + $0x168] sm:$0xff] }
  0x67   :  { %235 = vmatprep.subr.mxu0 %v132_v53  ;;  %348 = vmatprep.subr.mxu1 %v134_v54  ;;  %v117_v20 = vld [vmem:[#allocation4 + $0x10] sm:$0xff]  ;;  %v4426_v22 = vld [vmem:[#allocation9 + $0x178] sm:$0xff]  ;;  %v4430_v23 = vld [vmem:[#allocation9 + $0x160] sm:$0xff] }
  0x68   :  { %236 = vmatpush1.msra.mxu0 %v131_v55  ;;  %349 = vmatpush1.msra.mxu1 %v133_v56  ;;  %v4432_v24 = vld [vmem:[#allocation9 + $0x170] sm:$0xff]  ;;  %v4434_v25 = vld [vmem:[#allocation9 + $0x148] sm:$0xff]  ;;  %v4436_v26 = vld [vmem:[#allocation9 + $0x158] sm:$0xff] }
  0x69   :  { %237 = vmatprep.subr.mxu0 %v128_v57  ;;  %350 = vmatprep.subr.mxu1 %v130_v58  ;;  %v4442_v27 = vld [vmem:[#allocation9 + $0x140] sm:$0xff]  ;;  %v4444_v28 = vld [vmem:[#allocation9 + $0x150] sm:$0xff]  ;;  %v118_v29 = vld [vmem:[#allocation4 + $0x18] sm:$0xff] }
  0x6a   :  { %238 = vmatpush1.msra.mxu0 %v127_v59  ;;  %351 = vmatpush1.msra.mxu1 %v129_v60  ;;  %v4450_v30 = vld [vmem:[#allocation9 + $0x128] sm:$0xff]  ;;  %v4452_v31 = vld [vmem:[#allocation9 + $0x138] sm:$0xff]  ;;  %v4456_v32 = vld [vmem:[#allocation9 + $0x120] sm:$0xff] }
  0x6b   :  { %239 = vmatprep.subr.mxu0 %v124_v61  ;;  %352 = vmatprep.subr.mxu1 %v126_v62  ;;  %v4458_v33 = vld [vmem:[#allocation9 + $0x130] sm:$0xff]  ;;  %v4460_v34 = vld [vmem:[#allocation9 + $0x108] sm:$0xff]  ;;  %v4462_v35 = vld [vmem:[#allocation9 + $0x118] sm:$0xff] }
  0x6c   :  { %240 = vmatpush1.msra.mxu0 %v123_v63  ;;  %353 = vmatpush1.msra.mxu1 %v125_v1  ;;  %v4468_v36 = vld [vmem:[#allocation9 + $0x100] sm:$0xff]  ;;  %v4470_v37 = vld [vmem:[#allocation9 + $0x110] sm:$0xff]  ;;  %v4476_v39 = vld [vmem:[#allocation9 + $0xe8] sm:$0xff] }
  0x6d   :  { %274 = vmatmul.mubr.f32.vlgmr.msra.gmra.mxu0 %v115_v2  ;;  %387 = vmatmul.mubr.f32.vlgmr.msra.gmra.mxu1 %v115_v2  ;;  %v119_v38 = vld [vmem:[#allocation4 + $0x20] sm:$0xff]  ;;  %v4478_v40 = vld [vmem:[#allocation9 + $0xf8] sm:$0xff]  ;;  %v4484_v42 = vld [vmem:[#allocation9 + $0xf0] sm:$0xff] }
  0x6e   :  { %535 = vmatprep.subr.mxu0 %v4374_v3  ;;  %606 = vmatprep.subr.mxu1 %v4376_v4  ;;  %v4482_v41 = vld [vmem:[#allocation9 + $0xe0] sm:$0xff]  ;;  %v4486_v43 = vld [vmem:[#allocation9 + $0xc8] sm:$0xff]  ;;  %v4488_v44 = vld [vmem:[#allocation9 + $0xd8] sm:$0xff] }
  0x6f   :  { %536 = vmatpush1.msra.mxu0 %v4378_v5  ;;  %607 = vmatpush1.msra.mxu1 %v4380_v6  ;;  %v4494_v45 = vld [vmem:[#allocation9 + $0xc0] sm:$0xff]  ;;  %v4496_v46 = vld [vmem:[#allocation9 + $0xd0] sm:$0xff]  ;;  %v120_v47 = vld [vmem:[#allocation4 + $0x28] sm:$0xff] }
  0x70   :  { %537 = vmatprep.subr.mxu0 %v4382_v7  ;;  %608 = vmatprep.subr.mxu1 %v4384_v8  ;;  %v4502_v48 = vld [vmem:[#allocation9 + $0xa8] sm:$0xff]  ;;  %v4504_v49 = vld [vmem:[#allocation9 + $0xb8] sm:$0xff]  ;;  %v4508_v50 = vld [vmem:[#allocation9 + $0xa0] sm:$0xff] }
  0x71   :  { %279 = vmatprep.mubr.f32.mxu0 %v6375_v0  ;;  %392 = vmatprep.mubr.f32.mxu1 %v6375_v0  ;;  %v4510_v51 = vld [vmem:[#allocation9 + $0xb0] sm:$0xff]  ;;  %v4512_v52 = vld [vmem:[#allocation9 + $0x88] sm:$0xff]  ;;  %v4514_v53 = vld [vmem:[#allocation9 + $0x98] sm:$0xff] }
  0x72   :  { %538 = vmatpush1.msra.mxu0 %v4390_v9  ;;  %609 = vmatpush1.msra.mxu1 %v4392_v10  ;;  %6586 = vst [vmem:[#allocation23_spill] sm:$0xff] %v4510_v51  ;;  %6587 = vst [vmem:[#allocation24_spill] sm:$0xff] %v4512_v52  ;;  %v4520_v54 = vld [vmem:[#allocation9 + $0x80] sm:$0xff]  ;;  %v4522_v55 = vld [vmem:[#allocation9 + $0x90] sm:$0xff] }
  0x73   :  { %280 = vmatmul.mubr.f32.gmra.mxu0 %v116_v11  ;;  %393 = vmatmul.mubr.f32.gmra.mxu1 %v116_v11  ;;  %6588 = vst [vmem:[#allocation25_spill] sm:$0xff] %v4514_v53  ;;  %6589 = vst [vmem:[#allocation26_spill] sm:$0xff] %v4520_v54  ;;  %v121_v56 = vld [vmem:[#allocation4 + $0x30] sm:$0xff]  ;;  %v4528_v57 = vld [vmem:[#allocation9 + $0x68] sm:$0xff] }
  0x74   :  { %539 = vmatprep.subr.mxu0 %v4398_v12  ;;  %610 = vmatprep.subr.mxu1 %v4400_v13  ;;  %6590 = vst [vmem:[#allocation27_spill] sm:$0xff] %v4522_v55  ;;  %6591 = vst [vmem:[#allocation28_spill] sm:$0xff] %v4528_v57  ;;  %v4530_v58 = vld [vmem:[#allocation9 + $0x78] sm:$0xff]  ;;  %v4534_v59 = vld [vmem:[#allocation9 + $0x60] sm:$0xff] }
  0x75   :  { %540 = vmatpush1.msra.mxu0 %v4404_v14  ;;  %611 = vmatpush1.msra.mxu1 %v4406_v15  ;;  %6592 = vst [vmem:[#allocation29_spill] sm:$0xff] %v4530_v58  ;;  %6593 = vst [vmem:[#allocation30_spill] sm:$0xff] %v4534_v59  ;;  %v4536_v60 = vld [vmem:[#allocation9 + $0x70] sm:$0xff]  ;;  %v4538_v61 = vld [vmem:[#allocation9 + $0x48] sm:$0xff] }
  0x76   :  { %541 = vmatprep.subr.mxu0 %v4408_v16  ;;  %612 = vmatprep.subr.mxu1 %v4410_v17  ;;  %6594 = vst [vmem:[#allocation31_spill] sm:$0xff] %v4536_v60  ;;  %6595 = vst [vmem:[#allocation32_spill] sm:$0xff] %v4538_v61  ;;  %v4540_v62 = vld [vmem:[#allocation9 + $0x58] sm:$0xff]  ;;  %v4546_v63 = vld [vmem:[#allocation9 + $0x40] sm:$0xff] }
  0x77   :  { %285 = vmatprep.mubr.f32.mxu0 %v6375_v0  ;;  %398 = vmatprep.mubr.f32.mxu1 %v6375_v0  ;;  %6596 = vst [vmem:[#allocation33_spill] sm:$0xff] %v4540_v62  ;;  %6597 = vst [vmem:[#allocation34_spill] sm:$0xff] %v4546_v63  ;;  %v4548_v1 = vld [vmem:[#allocation9 + $0x50] sm:$0xff]  ;;  %v122_v2 = vld [vmem:[#allocation4 + $0x38] sm:$0xff] }
  0x78   :  { %542 = vmatpush1.msra.mxu0 %v4416_v18  ;;  %613 = vmatpush1.msra.mxu1 %v4418_v19  ;;  %6598 = vst [vmem:[#allocation35_spill] sm:$0xff] %v4548_v1  ;;  %v4554_v11 = vld [vmem:[#allocation9 + $0x28] sm:$0xff] }
  0x79   :  { %286 = vmatmul.mubr.f32.gmra.mxu0 %v117_v20  ;;  %399 = vmatmul.mubr.f32.gmra.mxu1 %v117_v20  ;;  %6599 = vst [vmem:[#allocation36_spill] sm:$0xff] %v4554_v11  ;;  %v4556_v20 = vld [vmem:[#allocation9 + $0x38] sm:$0xff] }
  0x7a   :  { %543 = vmatprep.subr.mxu0 %v4424_v21  ;;  %614 = vmatprep.subr.mxu1 %v4426_v22  ;;  %6600 = vst [vmem:[#allocation37_spill] sm:$0xff] %v4556_v20 }
  0x7b   :  { %544 = vmatpush1.msra.mxu0 %v4430_v23  ;;  %615 = vmatpush1.msra.mxu1 %v4432_v24 }
  0x7c   :  { %545 = vmatprep.subr.mxu0 %v4434_v25  ;;  %616 = vmatprep.subr.mxu1 %v4436_v26 }
  0x7d   :  { %291 = vmatprep.mubr.f32.mxu0 %v6375_v0  ;;  %404 = vmatprep.mubr.f32.mxu1 %v6375_v0 }
  0x7e   :  { %546 = vmatpush1.msra.mxu0 %v4442_v27  ;;  %617 = vmatpush1.msra.mxu1 %v4444_v28 }
  0x7f   :  { %292 = vmatmul.mubr.f32.gmra.mxu0 %v118_v29  ;;  %405 = vmatmul.mubr.f32.gmra.mxu1 %v118_v29  ;;  %v4560_v29 = vld [vmem:[#allocation9 + $0x20] sm:$0xff] }
  0x80   :  { %547 = vmatprep.subr.mxu0 %v4450_v30  ;;  %618 = vmatprep.subr.mxu1 %v4452_v31  ;;  %6601 = vst [vmem:[#allocation38_spill] sm:$0xff] %v4560_v29 }
  0x81   :  { %548 = vmatpush1.msra.mxu0 %v4456_v32  ;;  %619 = vmatpush1.msra.mxu1 %v4458_v33 }
  0x82   :  { %549 = vmatprep.subr.mxu0 %v4460_v34  ;;  %620 = vmatprep.subr.mxu1 %v4462_v35 }
  0x83   :  { %297 = vmatprep.mubr.f32.mxu0 %v6375_v0  ;;  %410 = vmatprep.mubr.f32.mxu1 %v6375_v0 }
  0x84   :  { %550 = vmatpush1.msra.mxu0 %v4468_v36  ;;  %621 = vmatpush1.msra.mxu1 %v4470_v37 }
  0x85   :  { %298 = vmatmul.mubr.f32.gmra.mxu0 %v119_v38  ;;  %411 = vmatmul.mubr.f32.gmra.mxu1 %v119_v38  ;;  %v4562_v38 = vld [vmem:[#allocation9 + $0x30] sm:$0xff] }
  0x86   :  { %551 = vmatprep.subr.mxu0 %v4476_v39  ;;  %622 = vmatprep.subr.mxu1 %v4478_v40  ;;  %6602 = vst [vmem:[#allocation39_spill] sm:$0xff] %v4562_v38 }
  0x87   :  { %552 = vmatpush1.msra.mxu0 %v4482_v41  ;;  %623 = vmatpush1.msra.mxu1 %v4484_v42 }
  0x88   :  { %553 = vmatprep.subr.mxu0 %v4486_v43  ;;  %624 = vmatprep.subr.mxu1 %v4488_v44 }
  0x89   :  { %303 = vmatprep.mubr.f32.mxu0 %v6375_v0  ;;  %416 = vmatprep.mubr.f32.mxu1 %v6375_v0 }
  0x8a   :  { %554 = vmatpush1.msra.mxu0 %v4494_v45  ;;  %625 = vmatpush1.msra.mxu1 %v4496_v46 }
  0x8b   :  { %304 = vmatmul.mubr.f32.gmra.mxu0 %v120_v47  ;;  %417 = vmatmul.mubr.f32.gmra.mxu1 %v120_v47  ;;  %v4564_v47 = vld [vmem:[#allocation9 + $0x8] sm:$0xff] }
  0x8c   :  { %555 = vmatprep.subr.mxu0 %v4502_v48  ;;  %626 = vmatprep.subr.mxu1 %v4504_v49  ;;  %6603 = vst [vmem:[#allocation40_spill] sm:$0xff] %v4564_v47 }
  0x8d   :  { %556 = vmatpush1.msra.mxu0 %v4508_v50  ;;  %627 = vmatpush1.msra.mxu1 %v4510_v51 }
  0x8e   :  { %557 = vmatprep.subr.mxu0 %v4512_v52  ;;  %628 = vmatprep.subr.mxu1 %v4514_v53 }
  0x8f   :  { %309 = vmatprep.mubr.f32.mxu0 %v6375_v0  ;;  %422 = vmatprep.mubr.f32.mxu1 %v6375_v0 }
  0x90   :  { %558 = vmatpush1.msra.mxu0 %v4520_v54  ;;  %629 = vmatpush1.msra.mxu1 %v4522_v55 }
  0x91   :  { %310 = vmatmul.mubr.f32.gmra.mxu0 %v121_v56  ;;  %423 = vmatmul.mubr.f32.gmra.mxu1 %v121_v56  ;;  %v4566_v56 = vld [vmem:[#allocation9 + $0x18] sm:$0xff] }
  0x92   :  { %559 = vmatprep.subr.mxu0 %v4528_v57  ;;  %630 = vmatprep.subr.mxu1 %v4530_v58  ;;  %6604 = vst [vmem:[#allocation41_spill] sm:$0xff] %v4566_v56 }
  0x93   :  { %560 = vmatpush1.msra.mxu0 %v4534_v59  ;;  %631 = vmatpush1.msra.mxu1 %v4536_v60 }
  0x94   :  { %561 = vmatprep.subr.mxu0 %v4538_v61  ;;  %632 = vmatprep.subr.mxu1 %v4540_v62 }
  0x95   :  { %315 = vmatprep.mubr.f32.mxu0 %v6375_v0  ;;  %428 = vmatprep.mubr.f32.mxu1 %v6375_v0  ;;  %v4570_v0 = vld [vmem:[#allocation9] sm:$0xff] }
  0x96   :  { %562 = vmatpush1.msra.mxu0 %v4546_v63  ;;  %633 = vmatpush1.msra.mxu1 %v4548_v1  ;;  %6605 = vst [vmem:[#allocation42_spill] sm:$0xff] %v4570_v0  ;;  %v4574_v1 = vld [vmem:[#allocation9 + $0x10] sm:$0xff] }
  0x97   :  { %316 = vmatmul.mubr.f32.gmra.mxu0 %v122_v2  ;;  %429 = vmatmul.mubr.f32.gmra.mxu1 %v122_v2  ;;  %6606 = vst [vmem:[#allocation43_spill] sm:$0xff] %v4574_v1  ;;  %v6607_v2 = vmov 0.0  }
  0x98   :  { %563 = vmatprep.subr.mxu0 %v4554_v11  ;;  %634 = vmatprep.subr.mxu1 %v4556_v20 }
  0x99   :  { %564 = vmatpush1.msra.mxu0 %v4560_v29  ;;  %635 = vmatpush1.msra.mxu1 %v4562_v38 }
  0x9a   :  { %565 = vmatprep.subr.mxu0 %v4564_v47  ;;  %636 = vmatprep.subr.mxu1 %v4566_v56 }
  0x9b   :  { %566 = vmatpush1.msra.mxu0 %v4570_v0  ;;  %599 = vmatprep.mubr.f32.mxu0 %v6607_v2 }
  0x9c   :  { %637 = vmatpush1.msra.mxu1 %v4574_v1  ;;  %670 = vmatprep.mubr.f32.mxu1 %v6607_v2 }
  0x9d   :  { %600 = vmatmul.mubr.f32.vlgmr.msra.gmra.mxu0 %v6607_v2  ;;  %671 = vmatmul.mubr.f32.vlgmr.msra.gmra.mxu1 %v6607_v2 }
  0x9e   :  { %704 = vmatprep.subr.mxu0 %v4374_v3  ;;  %775 = vmatprep.subr.mxu1 %v4376_v4 }
  0x9f   :  { %705 = vmatpush1.msra.mxu0 %v4378_v5  ;;  %776 = vmatpush1.msra.mxu1 %v4380_v6 }
  0xa0   :  { %706 = vmatprep.subr.mxu0 %v4382_v7  ;;  %777 = vmatprep.subr.mxu1 %v4384_v8 }
  0xa1   :  { %707 = vmatpush1.msra.mxu0 %v4390_v9  ;;  %778 = vmatpush1.msra.mxu1 %v4392_v10 }
  0xa2   :  { %708 = vmatprep.subr.mxu0 %v4398_v12  ;;  %779 = vmatprep.subr.mxu1 %v4400_v13 }
  0xa3   :  { %709 = vmatpush1.msra.mxu0 %v4404_v14  ;;  %780 = vmatpush1.msra.mxu1 %v4406_v15 }
  0xa4   :  { %710 = vmatprep.subr.mxu0 %v4408_v16  ;;  %781 = vmatprep.subr.mxu1 %v4410_v17 }
  0xa5   :  { %711 = vmatpush1.msra.mxu0 %v4416_v18  ;;  %782 = vmatpush1.msra.mxu1 %v4418_v19 }
  0xa6   :  { %712 = vmatprep.subr.mxu0 %v4424_v21  ;;  %783 = vmatprep.subr.mxu1 %v4426_v22 }
  0xa7   :  { %713 = vmatpush1.msra.mxu0 %v4430_v23  ;;  %784 = vmatpush1.msra.mxu1 %v4432_v24 }
  0xa8   :  { %714 = vmatprep.subr.mxu0 %v4434_v25  ;;  %785 = vmatprep.subr.mxu1 %v4436_v26 }
  0xa9   :  { %715 = vmatpush1.msra.mxu0 %v4442_v27  ;;  %786 = vmatpush1.msra.mxu1 %v4444_v28 }
  0xaa   :  { %716 = vmatprep.subr.mxu0 %v4450_v30  ;;  %787 = vmatprep.subr.mxu1 %v4452_v31 }
  0xab   :  { %717 = vmatpush1.msra.mxu0 %v4456_v32  ;;  %788 = vmatpush1.msra.mxu1 %v4458_v33 }
  0xac   :  { %718 = vmatprep.subr.mxu0 %v4460_v34  ;;  %789 = vmatprep.subr.mxu1 %v4462_v35 }
  0xad   :  { %719 = vmatpush1.msra.mxu0 %v4468_v36  ;;  %790 = vmatpush1.msra.mxu1 %v4470_v37 }
  0xae   :  { %720 = vmatprep.subr.mxu0 %v4476_v39  ;;  %791 = vmatprep.subr.mxu1 %v4478_v40 }
  0xaf   :  { %721 = vmatpush1.msra.mxu0 %v4482_v41  ;;  %792 = vmatpush1.msra.mxu1 %v4484_v42 }
  0xb0   :  { %722 = vmatprep.subr.mxu0 %v4486_v43  ;;  %793 = vmatprep.subr.mxu1 %v4488_v44 }
  0xb1   :  { %723 = vmatpush1.msra.mxu0 %v4494_v45  ;;  %794 = vmatpush1.msra.mxu1 %v4496_v46 }
  0xb2   :  { %724 = vmatprep.subr.mxu0 %v4502_v48  ;;  %795 = vmatprep.subr.mxu1 %v4504_v49 }
  0xb3   :  { %725 = vmatpush1.msra.mxu0 %v4508_v50  ;;  %796 = vmatpush1.msra.mxu1 %v4510_v51 }
  0xb4   :  { %726 = vmatprep.subr.mxu0 %v4512_v52  ;;  %797 = vmatprep.subr.mxu1 %v4514_v53  ;;  %v6608_v52 = vld [vmem:[#allocation35_spill] sm:$0xff] }
  0xb5   :  { %727 = vmatpush1.msra.mxu0 %v4520_v54  ;;  %798 = vmatpush1.msra.mxu1 %v4522_v55 }
  0xb6   :  { %728 = vmatprep.subr.mxu0 %v4528_v57  ;;  %799 = vmatprep.subr.mxu1 %v4530_v58 }
  0xb7   :  { %729 = vmatpush1.msra.mxu0 %v4534_v59  ;;  %800 = vmatpush1.msra.mxu1 %v4536_v60 }
  0xb8   :  { %730 = vmatprep.subr.mxu0 %v4538_v61  ;;  %801 = vmatprep.subr.mxu1 %v4540_v62 }
  0xb9   :  { %731 = vmatpush1.msra.mxu0 %v4546_v63  ;;  %802 = vmatpush1.msra.mxu1 %v6608_v52 }
  0xba   :  { %732 = vmatprep.subr.mxu0 %v4554_v11  ;;  %803 = vmatprep.subr.mxu1 %v4556_v20  ;;  %v189_v20 = vlaneseq }
  0xbb   :  { %733 = vmatpush1.msra.mxu0 %v4560_v29  ;;  %804 = vmatpush1.msra.mxu1 %v4562_v38 }
  0xbc   :  { %734 = vmatprep.subr.mxu0 %v4564_v47  ;;  %805 = vmatprep.subr.mxu1 %v4566_v56  ;;  %v4652_v29 = vshrl.u32 %v189_v20, 7 }
  0xbd   :  { %735 = vmatpush1.msra.mxu0 %v4570_v0  ;;  %768 = vmatprep.mubr.f32.mxu0 %v6607_v2 }
  0xbe   :  { %806 = vmatpush1.msra.mxu1 %v4574_v1  ;;  %839 = vmatprep.mubr.f32.mxu1 %v6607_v2  ;;  %6609 = vst [vmem:[#allocation44_spill] sm:$0xff] %v4652_v29  ;;  %v6416_v56 = vsub.s32 0, %v4652_v29  ;;  %v6419_v0 = vsub.s32 2, %v4652_v29  ;;  %v187_v1 = vld [vmem:[%s6368_s3] sm:$0xf]  ;;  %v6427_v20 = vsub.s32 3, %v4652_v29 }
  0xbf   :  { %873 = vmatprep.subr.mxu0 %v4374_v3  ;;  %944 = vmatprep.subr.mxu1 %v4376_v4  ;;  %v6426_v4 = vsub.s32 1, %v4652_v29 }
  0xc0   :  { %v192_v11 = vrot.slane %v187_v1, %v6416_v56  ;;  %v4673_v52 = vrot.slane %v187_v1, %v6419_v0  ;;  %v4679_v60 = vrot.slane %v187_v1, %v6427_v20 }
  0xc1   :  { %v196_v61 = vrot.slane %v187_v1, %v6426_v4 }
 0x12d   :  { %v4654_v38 = vpop.f32.mrf.mxu0  ;;  %v4656_v47 = vpop.f32.mrf.mxu1 }
 0x12f   :  { %v4663_v2 = vpop.f32.mrf.mxu0  ;;  %v4665_v3 = vpop.f32.mrf.mxu1 }
 0x133   :  { %v281_v63 = vpop.f32.mrf.mxu0  ;;  %v394_v62 = vpop.f32.mrf.mxu1 }
 0x134   :  { %v4681_v59 = vadd.f32 %v281_v63, %v192_v11  ;;  %v4684_v58 = vadd.f32 %v394_v62, %v4673_v52 }
 0x135   :  { %v283_v57 = vpop.f32.mrf.mxu0  ;;  %v396_v56 = vpop.f32.mrf.mxu1 }
 0x136   :  { %6610 = vst [vmem:[#allocation45_spill] sm:$0xff] %v4684_v58  ;;  %v4686_v55 = vadd.f32 %v283_v57, %v196_v61  ;;  %v4689_v0 = vadd.f32 %v396_v56, %v4679_v60 }
 0x138   :  { %6611 = vst [vmem:[#allocation46_spill] sm:$0xff] %v4686_v55  ;;  %6612 = vst [vmem:[#allocation47_spill] sm:$0xff] %v4689_v0 }
 0x139   :  { %v287_v54 = vpop.f32.mrf.mxu0  ;;  %v400_v53 = vpop.f32.mrf.mxu1 }
 0x13a   :  { %v4691_v51 = vadd.f32 %v287_v54, %v192_v11  ;;  %v4694_v4 = vadd.f32 %v400_v53, %v4673_v52 }
 0x13b   :  { %v289_v1 = vpop.f32.mrf.mxu0  ;;  %v402_v63 = vpop.f32.mrf.mxu1 }
 0x13c   :  { %6613 = vst [vmem:[#allocation48_spill] sm:$0xff] %v4691_v51  ;;  %6614 = vst [vmem:[#allocation49_spill] sm:$0xff] %v4694_v4  ;;  %v4696_v20 = vadd.f32 %v289_v1, %v196_v61  ;;  %v4699_v62 = vadd.f32 %v402_v63, %v4679_v60 }
 0x13e   :  { %6615 = vst [vmem:[#allocation50_spill] sm:$0xff] %v4696_v20  ;;  %6616 = vst [vmem:[#allocation51_spill] sm:$0xff] %v4699_v62 }
 0x13f   :  { %v293_v29 = vpop.f32.mrf.mxu0  ;;  %v406_v57 = vpop.f32.mrf.mxu1 }
 0x140   :  { %v4701_v58 = vadd.f32 %v293_v29, %v192_v11  ;;  %v4704_v56 = vadd.f32 %v406_v57, %v4673_v52 }
 0x141   :  { %v295_v0 = vpop.f32.mrf.mxu0  ;;  %v408_v54 = vpop.f32.mrf.mxu1 }
 0x142   :  { %6617 = vst [vmem:[#allocation52_spill] sm:$0xff] %v4701_v58  ;;  %6618 = vst [vmem:[#allocation53_spill] sm:$0xff] %v4704_v56  ;;  %v4706_v51 = vadd.f32 %v295_v0, %v196_v61  ;;  %v4709_v53 = vadd.f32 %v408_v54, %v4679_v60 }
 0x144   :  { %6619 = vst [vmem:[#allocation54_spill] sm:$0xff] %v4706_v51  ;;  %6620 = vst [vmem:[#allocation55_spill] sm:$0xff] %v4709_v53 }
 0x145   :  { %v299_v4 = vpop.f32.mrf.mxu0  ;;  %v412_v1 = vpop.f32.mrf.mxu1 }
 0x146   :  { %v4711_v20 = vadd.f32 %v299_v4, %v192_v11  ;;  %v4714_v63 = vadd.f32 %v412_v1, %v4673_v52 }
 0x147   :  { %v301_v62 = vpop.f32.mrf.mxu0  ;;  %v414_v29 = vpop.f32.mrf.mxu1 }
 0x148   :  { %6621 = vst [vmem:[#allocation56_spill] sm:$0xff] %v4711_v20  ;;  %6622 = vst [vmem:[#allocation57_spill] sm:$0xff] %v4714_v63  ;;  %v4716_v58 = vadd.f32 %v301_v62, %v196_v61  ;;  %v4719_v57 = vadd.f32 %v414_v29, %v4679_v60 }
 0x14a   :  { %6623 = vst [vmem:[#allocation58_spill] sm:$0xff] %v4716_v58  ;;  %6624 = vst [vmem:[#allocation59_spill] sm:$0xff] %v4719_v57 }
 0x14b   :  { %v305_v56 = vpop.f32.mrf.mxu0  ;;  %v418_v0 = vpop.f32.mrf.mxu1 }
 0x14c   :  { %v4721_v51 = vadd.f32 %v305_v56, %v192_v11  ;;  %v4724_v54 = vadd.f32 %v418_v0, %v4673_v52 }
 0x14d   :  { %v307_v53 = vpop.f32.mrf.mxu0  ;;  %v420_v4 = vpop.f32.mrf.mxu1 }
 0x14e   :  { %6625 = vst [vmem:[#allocation60_spill] sm:$0xff] %v4721_v51  ;;  %6626 = vst [vmem:[#allocation61_spill] sm:$0xff] %v4724_v54  ;;  %v4726_v20 = vadd.f32 %v307_v53, %v196_v61  ;;  %v4729_v1 = vadd.f32 %v420_v4, %v4679_v60 }
 0x150   :  { %6627 = vst [vmem:[#allocation62_spill] sm:$0xff] %v4726_v20  ;;  %6628 = vst [vmem:[#allocation63_spill] sm:$0xff] %v4729_v1 }
 0x151   :  { %v311_v63 = vpop.f32.mrf.mxu0  ;;  %v424_v62 = vpop.f32.mrf.mxu1 }
 0x152   :  { %v4731_v58 = vadd.f32 %v311_v63, %v192_v11  ;;  %v4734_v29 = vadd.f32 %v424_v62, %v4673_v52 }
 0x153   :  { %v313_v57 = vpop.f32.mrf.mxu0  ;;  %v426_v56 = vpop.f32.mrf.mxu1 }
 0x154   :  { %6629 = vst [vmem:[#allocation64_spill] sm:$0xff] %v4731_v58  ;;  %6630 = vst [vmem:[#allocation65_spill] sm:$0xff] %v4734_v29  ;;  %v4736_v51 = vadd.f32 %v313_v57, %v196_v61  ;;  %v4739_v0 = vadd.f32 %v426_v56, %v4679_v60  ;;  %v276_v57 = vadd.f32 %v4654_v38, %v192_v11 }
 0x155   :  { %v278_v56 = vadd.f32 %v4663_v2, %v196_v61 }
 0x156   :  { %6631 = vst [vmem:[#allocation66_spill] sm:$0xff] %v4736_v51  ;;  %6632 = vst [vmem:[#allocation67_spill] sm:$0xff] %v4739_v0 }
 0x157   :  { %v317_v54 = vpop.f32.mrf.mxu0  ;;  %v430_v53 = vpop.f32.mrf.mxu1 }
 0x158   :  { %v4741_v20 = vadd.f32 %v317_v54, %v192_v11  ;;  %v4744_v4 = vadd.f32 %v430_v53, %v4673_v52  ;;  %v389_v53 = vadd.f32 %v4656_v47, %v4673_v52 }
 0x159   :  { %v319_v1 = vpop.f32.mrf.mxu0  ;;  %v432_v63 = vpop.f32.mrf.mxu1 }
 0x15a   :  { %6633 = vst [vmem:[#allocation68_spill] sm:$0xff] %v4741_v20  ;;  %6634 = vst [vmem:[#allocation69_spill] sm:$0xff] %v4744_v4  ;;  %v4746_v58 = vadd.f32 %v319_v1, %v196_v61  ;;  %v4749_v62 = vadd.f32 %v432_v63, %v4679_v60  ;;  %v391_v63 = vadd.f32 %v4665_v3, %v4679_v60 }
 0x15c   :  { %6635 = vst [vmem:[#allocation70_spill] sm:$0xff] %v4746_v58  ;;  %6636 = vst [vmem:[#allocation71_spill] sm:$0xff] %v4749_v62  ;;  %v6657_v62 = vld [vmem:[#allocation42_spill] sm:$0xff] }
 0x15d   :  { %v601_v29 = vpop.f32.mrf.mxu0  ;;  %v672_v20 = vpop.f32.mrf.mxu1 }
 0x15e   :  { %v677_v0 = vadd.f32 %v601_v29, %v276_v57  ;;  %v679_v1 = vadd.f32 %v672_v20, %v389_v53  ;;  %v6639_v53 = vld [vmem:[#allocation24_spill] sm:$0xff] }
 0x15f   :  { %v603_v51 = vpop.f32.mrf.mxu0  ;;  %v674_v58 = vpop.f32.mrf.mxu1 }
 0x160   :  { %v681_v55 = vmul.f32 0.5, %v677_v0  ;;  %v678_v54 = vadd.f32 %v603_v51, %v278_v56  ;;  %v680_v11 = vadd.f32 %v674_v58, %v391_v63  ;;  %v6641_v63 = vld [vmem:[#allocation26_spill] sm:$0xff] }
 0x162   :  { %3831 = vtanh.f32 %v681_v55  ;;  %v685_v4 = vmul.f32 0.5, %v678_v54  ;;  %v690_v38 = vmul.f32 0.5, %v680_v11  ;;  %v6638_v54 = vld [vmem:[#allocation23_spill] sm:$0xff] }
 0x163   :  { %v6642_v11 = vld [vmem:[#allocation27_spill] sm:$0xff] }
 0x164   :  { %3833 = vtanh.f32 %v685_v4 }
 0x165   :  { %3835 = vtanh.f32 %v679_v1  ;;  %v6640_v1 = vld [vmem:[#allocation25_spill] sm:$0xff] }
 0x166   :  { %3837 = vtanh.f32 %v690_v38  ;;  %v6643_v38 = vld [vmem:[#allocation28_spill] sm:$0xff] }
 0x16f   :  { %v3832_v61 = vpop.eup %3831 }
 0x170   :  { %v683_v2 = vadd.f32 1.0, %v3832_v61  ;;  %v6644_v61 = vld [vmem:[#allocation29_spill] sm:$0xff] }
 0x171   :  { %v3834_v29 = vpop.eup %3833 }
 0x172   :  { %v684_v0 = vmul.f32 0.5, %v683_v2  ;;  %v687_v51 = vadd.f32 1.0, %v3834_v29  ;;  %v3836_v56 = vpop.eup %3835  ;;  %v6645_v2 = vld [vmem:[#allocation30_spill] sm:$0xff]  ;;  %v6646_v29 = vld [vmem:[#allocation31_spill] sm:$0xff] }
 0x173   :  { %v3838_v20 = vpop.eup %3837 }
 0x174   :  { %v688_v57 = vmul.f32 0.5, %v687_v51  ;;  %v695_v55 = vmul.f32 %v3836_v56, %v684_v0  ;;  %v692_v4 = vadd.f32 1.0, %v3838_v20  ;;  %v6647_v0 = vld [vmem:[#allocation32_spill] sm:$0xff]  ;;  %v6648_v51 = vld [vmem:[#allocation33_spill] sm:$0xff]  ;;  %v6650_v56 = vld [vmem:[#allocation35_spill] sm:$0xff] }
 0x175   :  { %v6653_v20 = vld [vmem:[#allocation38_spill] sm:$0xff] }
 0x176   :  { %v694_v52 = vmul.f32 0.0, %v688_v57  ;;  %v693_v3 = vmul.f32 0.5, %v692_v4  ;;  %v6649_v57 = vld [vmem:[#allocation34_spill] sm:$0xff]  ;;  %v6654_v4 = vld [vmem:[#allocation39_spill] sm:$0xff] }
 0x178   :  { %v4757_v47 = vadd.f32 %v695_v55, %v694_v52  ;;  %v6651_v52 = vld [vmem:[#allocation36_spill] sm:$0xff]  ;;  %v6652_v55 = vld [vmem:[#allocation37_spill] sm:$0xff] }
 0x17a   :  { %3839 = vtanh.f32 %v4757_v47 }
 0x187   :  { %v3840_v60 = vpop.eup %3839 }
 0x188   :  { %v4760_v58 = vmul.f32 %v3840_v60, %v693_v3  ;;  %v6655_v3 = vld [vmem:[#allocation40_spill] sm:$0xff]  ;;  %v6656_v60 = vld [vmem:[#allocation41_spill] sm:$0xff] }
 0x18a   :  { %6637 = vst [vmem:[#allocation72_spill] sm:$0xff] %v4760_v58  ;;  %769 = vmatmul.mubr.f32.vlgmr.msra.gmra.mxu0 %v4760_v58  ;;  %840 = vmatmul.mubr.f32.vlgmr.msra.gmra.mxu1 %v4760_v58  ;;  %v6658_v58 = vmov 0.0  }
 0x18b   :  { %874 = vmatpush1.msra.mxu0 %v4378_v5  ;;  %945 = vmatpush1.msra.mxu1 %v4380_v6 }
 0x18c   :  { %875 = vmatprep.subr.mxu0 %v4382_v7  ;;  %946 = vmatprep.subr.mxu1 %v4384_v8 }
 0x18d   :  { %876 = vmatpush1.msra.mxu0 %v4390_v9  ;;  %947 = vmatpush1.msra.mxu1 %v4392_v10 }
 0x18e   :  { %877 = vmatprep.subr.mxu0 %v4398_v12  ;;  %948 = vmatprep.subr.mxu1 %v4400_v13 }
 0x18f   :  { %878 = vmatpush1.msra.mxu0 %v4404_v14  ;;  %949 = vmatpush1.msra.mxu1 %v4406_v15 }
 0x190   :  { %879 = vmatprep.subr.mxu0 %v4408_v16  ;;  %950 = vmatprep.subr.mxu1 %v4410_v17 }
 0x191   :  { %880 = vmatpush1.msra.mxu0 %v4416_v18  ;;  %951 = vmatpush1.msra.mxu1 %v4418_v19 }
 0x192   :  { %881 = vmatprep.subr.mxu0 %v4424_v21  ;;  %952 = vmatprep.subr.mxu1 %v4426_v22 }
 0x193   :  { %882 = vmatpush1.msra.mxu0 %v4430_v23  ;;  %953 = vmatpush1.msra.mxu1 %v4432_v24 }
 0x194   :  { %883 = vmatprep.subr.mxu0 %v4434_v25  ;;  %954 = vmatprep.subr.mxu1 %v4436_v26 }
 0x195   :  { %884 = vmatpush1.msra.mxu0 %v4442_v27  ;;  %955 = vmatpush1.msra.mxu1 %v4444_v28 }
 0x196   :  { %885 = vmatprep.subr.mxu0 %v4450_v30  ;;  %956 = vmatprep.subr.mxu1 %v4452_v31 }
 0x197   :  { %886 = vmatpush1.msra.mxu0 %v4456_v32  ;;  %957 = vmatpush1.msra.mxu1 %v4458_v33 }
 0x198   :  { %887 = vmatprep.subr.mxu0 %v4460_v34  ;;  %958 = vmatprep.subr.mxu1 %v4462_v35 }
 0x199   :  { %888 = vmatpush1.msra.mxu0 %v4468_v36  ;;  %959 = vmatpush1.msra.mxu1 %v4470_v37 }
 0x19a   :  { %889 = vmatprep.subr.mxu0 %v4476_v39  ;;  %960 = vmatprep.subr.mxu1 %v4478_v40 }
 0x19b   :  { %890 = vmatpush1.msra.mxu0 %v4482_v41  ;;  %961 = vmatpush1.msra.mxu1 %v4484_v42 }
 0x19c   :  { %891 = vmatprep.subr.mxu0 %v4486_v43  ;;  %962 = vmatprep.subr.mxu1 %v4488_v44 }
 0x19d   :  { %892 = vmatpush1.msra.mxu0 %v4494_v45  ;;  %963 = vmatpush1.msra.mxu1 %v4496_v46 }
 0x19e   :  { %893 = vmatprep.subr.mxu0 %v4502_v48  ;;  %964 = vmatprep.subr.mxu1 %v4504_v49 }
 0x19f   :  { %894 = vmatpush1.msra.mxu0 %v4508_v50  ;;  %965 = vmatpush1.msra.mxu1 %v6638_v54 }
 0x1a0   :  { %895 = vmatprep.subr.mxu0 %v6639_v53  ;;  %966 = vmatprep.subr.mxu1 %v6640_v1 }
 0x1a1   :  { %896 = vmatpush1.msra.mxu0 %v6641_v63  ;;  %967 = vmatpush1.msra.mxu1 %v6642_v11 }
 0x1a2   :  { %897 = vmatprep.subr.mxu0 %v6643_v38  ;;  %968 = vmatprep.subr.mxu1 %v6644_v61 }
 0x1a3   :  { %898 = vmatpush1.msra.mxu0 %v6645_v2  ;;  %969 = vmatpush1.msra.mxu1 %v6646_v29 }
 0x1a4   :  { %899 = vmatprep.subr.mxu0 %v6647_v0  ;;  %970 = vmatprep.subr.mxu1 %v6648_v51  ;;  %v6659_v51 = vld [vmem:[#allocation43_spill] sm:$0xff]  ;;  %v6662_v0 = vld [vmem:[#allocation46_spill] sm:$0xff] }
 0x1a5   :  { %900 = vmatpush1.msra.mxu0 %v6649_v57  ;;  %971 = vmatpush1.msra.mxu1 %v6650_v56  ;;  %v6660_v56 = vld [vmem:[#allocation21_spill] sm:$0xff] }
 0x1a6   :  { %901 = vmatprep.subr.mxu0 %v6651_v52  ;;  %972 = vmatprep.subr.mxu1 %v6652_v55  ;;  %v6661_v52 = vld [vmem:[#allocation22_spill] sm:$0xff] }
 0x1a7   :  { %902 = vmatpush1.msra.mxu0 %v6653_v20  ;;  %973 = vmatpush1.msra.mxu1 %v6654_v4 }
 0x1a8   :  { %903 = vmatprep.subr.mxu0 %v6655_v3  ;;  %974 = vmatprep.subr.mxu1 %v6656_v60 }
 0x1a9   :  { %904 = vmatpush1.msra.mxu0 %v6657_v62  ;;  %937 = vmatprep.mubr.f32.mxu0 %v6658_v58  ;;  %v6663_v62 = vld [vmem:[#allocation45_spill] sm:$0xff] }
 0x1aa   :  { %975 = vmatpush1.msra.mxu1 %v6659_v51  ;;  %1008 = vmatprep.mubr.f32.mxu1 %v6658_v58  ;;  %v6664_v58 = vld [vmem:[#allocation47_spill] sm:$0xff] }
 0x1ab   :  { %1042 = vmatprep.subr.mxu0 %v6660_v56  ;;  %1113 = vmatprep.subr.mxu1 %v6661_v52 }
 0x24a   :  { %v770_v55 = vpop.f32.mrf.mxu0  ;;  %v841_v4 = vpop.f32.mrf.mxu1 }
 0x24b   :  { %v846_v20 = vadd.f32 %v770_v55, %v4681_v59  ;;  %v848_v29 = vadd.f32 %v841_v4, %v6663_v62  ;;  %v6689_v4 = vld [vmem:[#allocation50_spill] sm:$0xff] }
 0x24c   :  { %v772_v57 = vpop.f32.mrf.mxu0  ;;  %v843_v51 = vpop.f32.mrf.mxu1 }
 0x24d   :  { %v850_v3 = vmul.f32 0.5, %v846_v20  ;;  %v847_v60 = vadd.f32 %v772_v57, %v6662_v0  ;;  %v849_v61 = vadd.f32 %v843_v51, %v6664_v58 }
 0x24f   :  { %3841 = vtanh.f32 %v850_v3  ;;  %v854_v2 = vmul.f32 0.5, %v847_v60  ;;  %v859_v56 = vmul.f32 0.5, %v849_v61  ;;  %v6690_v60 = vld [vmem:[#allocation49_spill] sm:$0xff] }
 0x251   :  { %3843 = vtanh.f32 %v854_v2 }
 0x252   :  { %3845 = vtanh.f32 %v848_v29 }
 0x253   :  { %3847 = vtanh.f32 %v859_v56 }
 0x25c   :  { %v3842_v38 = vpop.eup %3841 }
 0x25d   :  { %v852_v52 = vadd.f32 1.0, %v3842_v38 }
 0x25e   :  { %v3844_v11 = vpop.eup %3843 }
 0x25f   :  { %v853_v63 = vmul.f32 0.5, %v852_v52  ;;  %v856_v59 = vadd.f32 1.0, %v3844_v11  ;;  %v3846_v55 = vpop.eup %3845  ;;  %v6688_v11 = vld [vmem:[#allocation48_spill] sm:$0xff] }
 0x260   :  { %v3848_v62 = vpop.eup %3847 }
 0x261   :  { %v857_v20 = vmul.f32 0.5, %v856_v59  ;;  %v864_v1 = vmul.f32 %v3846_v55, %v853_v63  ;;  %v861_v2 = vadd.f32 1.0, %v3848_v62 }
 0x263   :  { %v863_v0 = vmul.f32 %v857_v20, %v4757_v47  ;;  %v862_v29 = vmul.f32 0.5, %v861_v2  ;;  %v6686_v47 = vld [vmem:[#allocation21_spill] sm:$0xff] }
 0x265   :  { %v4835_v57 = vadd.f32 %v864_v1, %v863_v0  ;;  %v6687_v1 = vld [vmem:[#allocation22_spill] sm:$0xff]  ;;  %v6691_v0 = vld [vmem:[#allocation51_spill] sm:$0xff] }
 0x267   :  { %3849 = vtanh.f32 %v4835_v57 }
 0x274   :  { %v3850_v58 = vpop.eup %3849 }
 0x275   :  { %v4838_v61 = vmul.f32 %v3850_v58, %v862_v29 }
 0x277   :  { %6665 = vst [vmem:[#allocation23_spill] sm:$0xff] %v4838_v61  ;;  %938 = vmatmul.mubr.f32.vlgmr.msra.gmra.mxu0 %v4838_v61  ;;  %1009 = vmatmul.mubr.f32.vlgmr.msra.gmra.mxu1 %v4838_v61 }
 0x278   :  { %1043 = vmatpush1.msra.mxu0 %v4378_v5  ;;  %1114 = vmatpush1.msra.mxu1 %v4380_v6  ;;  %v6666_v5 = vld [vmem:[#allocation25_spill] sm:$0xff]  ;;  %v6667_v6 = vld [vmem:[#allocation26_spill] sm:$0xff] }
 0x279   :  { %1044 = vmatprep.subr.mxu0 %v4382_v7  ;;  %1115 = vmatprep.subr.mxu1 %v4384_v8  ;;  %v6668_v7 = vld [vmem:[#allocation27_spill] sm:$0xff]  ;;  %v6669_v8 = vld [vmem:[#allocation28_spill] sm:$0xff] }
 0x27a   :  { %1045 = vmatpush1.msra.mxu0 %v4390_v9  ;;  %1116 = vmatpush1.msra.mxu1 %v4392_v10  ;;  %v6670_v9 = vld [vmem:[#allocation29_spill] sm:$0xff]  ;;  %v6671_v10 = vld [vmem:[#allocation30_spill] sm:$0xff] }
 0x27b   :  { %1046 = vmatprep.subr.mxu0 %v4398_v12  ;;  %1117 = vmatprep.subr.mxu1 %v4400_v13  ;;  %v6672_v12 = vld [vmem:[#allocation31_spill] sm:$0xff]  ;;  %v6673_v13 = vld [vmem:[#allocation32_spill] sm:$0xff] }
 0x27c   :  { %1047 = vmatpush1.msra.mxu0 %v4404_v14  ;;  %1118 = vmatpush1.msra.mxu1 %v4406_v15  ;;  %v6674_v14 = vld [vmem:[#allocation33_spill] sm:$0xff]  ;;  %v6675_v15 = vld [vmem:[#allocation34_spill] sm:$0xff] }
 0x27d   :  { %1048 = vmatprep.subr.mxu0 %v4408_v16  ;;  %1119 = vmatprep.subr.mxu1 %v4410_v17  ;;  %v6676_v16 = vld [vmem:[#allocation35_spill] sm:$0xff]  ;;  %v6677_v17 = vld [vmem:[#allocation36_spill] sm:$0xff] }
 0x27e   :  { %1049 = vmatpush1.msra.mxu0 %v4416_v18  ;;  %1120 = vmatpush1.msra.mxu1 %v4418_v19  ;;  %v6678_v18 = vld [vmem:[#allocation37_spill] sm:$0xff]  ;;  %v6679_v19 = vld [vmem:[#allocation38_spill] sm:$0xff] }
 0x27f   :  { %1050 = vmatprep.subr.mxu0 %v4424_v21  ;;  %1121 = vmatprep.subr.mxu1 %v4426_v22  ;;  %v6680_v21 = vld [vmem:[#allocation39_spill] sm:$0xff]  ;;  %v6681_v22 = vld [vmem:[#allocation40_spill] sm:$0xff] }
 0x280   :  { %1051 = vmatpush1.msra.mxu0 %v4430_v23  ;;  %1122 = vmatpush1.msra.mxu1 %v4432_v24  ;;  %v6682_v23 = vld [vmem:[#allocation41_spill] sm:$0xff]  ;;  %v6683_v24 = vld [vmem:[#allocation42_spill] sm:$0xff] }
 0x281   :  { %1052 = vmatprep.subr.mxu0 %v4434_v25  ;;  %1123 = vmatprep.subr.mxu1 %v4436_v26  ;;  %v6684_v25 = vmov 0.0   ;;  %v6685_v26 = vld [vmem:[#allocation43_spill] sm:$0xff] }
 0x282   :  { %1053 = vmatpush1.msra.mxu0 %v4442_v27  ;;  %1124 = vmatpush1.msra.mxu1 %v4444_v28 }
 0x283   :  { %1054 = vmatprep.subr.mxu0 %v4450_v30  ;;  %1125 = vmatprep.subr.mxu1 %v4452_v31 }
 0x284   :  { %1055 = vmatpush1.msra.mxu0 %v4456_v32  ;;  %1126 = vmatpush1.msra.mxu1 %v4458_v33 }
 0x285   :  { %1056 = vmatprep.subr.mxu0 %v4460_v34  ;;  %1127 = vmatprep.subr.mxu1 %v4462_v35 }
 0x286   :  { %1057 = vmatpush1.msra.mxu0 %v4468_v36  ;;  %1128 = vmatpush1.msra.mxu1 %v4470_v37 }
 0x287   :  { %1058 = vmatprep.subr.mxu0 %v4476_v39  ;;  %1129 = vmatprep.subr.mxu1 %v4478_v40 }
 0x288   :  { %1059 = vmatpush1.msra.mxu0 %v4482_v41  ;;  %1130 = vmatpush1.msra.mxu1 %v4484_v42 }
 0x289   :  { %1060 = vmatprep.subr.mxu0 %v4486_v43  ;;  %1131 = vmatprep.subr.mxu1 %v4488_v44 }
 0x28a   :  { %1061 = vmatpush1.msra.mxu0 %v4494_v45  ;;  %1132 = vmatpush1.msra.mxu1 %v4496_v46 }
 0x28b   :  { %1062 = vmatprep.subr.mxu0 %v4502_v48  ;;  %1133 = vmatprep.subr.mxu1 %v4504_v49 }
 0x28c   :  { %1063 = vmatpush1.msra.mxu0 %v4508_v50  ;;  %1134 = vmatpush1.msra.mxu1 %v6638_v54 }
 0x28d   :  { %1064 = vmatprep.subr.mxu0 %v6639_v53  ;;  %1135 = vmatprep.subr.mxu1 %v6666_v5 }
 0x28e   :  { %1065 = vmatpush1.msra.mxu0 %v6667_v6  ;;  %1136 = vmatpush1.msra.mxu1 %v6668_v7 }
 0x28f   :  { %1066 = vmatprep.subr.mxu0 %v6669_v8  ;;  %1137 = vmatprep.subr.mxu1 %v6670_v9 }
 0x290   :  { %1067 = vmatpush1.msra.mxu0 %v6671_v10  ;;  %1138 = vmatpush1.msra.mxu1 %v6672_v12 }
 0x291   :  { %1068 = vmatprep.subr.mxu0 %v6673_v13  ;;  %1139 = vmatprep.subr.mxu1 %v6674_v14 }
 0x292   :  { %1069 = vmatpush1.msra.mxu0 %v6675_v15  ;;  %1140 = vmatpush1.msra.mxu1 %v6676_v16 }
 0x293   :  { %1070 = vmatprep.subr.mxu0 %v6677_v17  ;;  %1141 = vmatprep.subr.mxu1 %v6678_v18 }
 0x294   :  { %1071 = vmatpush1.msra.mxu0 %v6679_v19  ;;  %1142 = vmatpush1.msra.mxu1 %v6680_v21 }
 0x295   :  { %1072 = vmatprep.subr.mxu0 %v6681_v22  ;;  %1143 = vmatprep.subr.mxu1 %v6682_v23 }
 0x296   :  { %1073 = vmatpush1.msra.mxu0 %v6683_v24  ;;  %1106 = vmatprep.mubr.f32.mxu0 %v6684_v25 }
 0x297   :  { %1144 = vmatpush1.msra.mxu1 %v6685_v26  ;;  %1177 = vmatprep.mubr.f32.mxu1 %v6684_v25 }
 0x298   :  { %1211 = vmatprep.subr.mxu0 %v6686_v47  ;;  %1282 = vmatprep.subr.mxu1 %v6687_v1 }
 0x337   :  { %v939_v63 = vpop.f32.mrf.mxu0  ;;  %v1010_v51 = vpop.f32.mrf.mxu1 }
 0x338   :  { %v1015_v38 = vadd.f32 %v939_v63, %v6688_v11  ;;  %v1017_v59 = vadd.f32 %v1010_v51, %v6690_v60 }
 0x339   :  { %v941_v56 = vpop.f32.mrf.mxu0  ;;  %v1012_v20 = vpop.f32.mrf.mxu1 }
 0x33a   :  { %v1019_v52 = vmul.f32 0.5, %v1015_v38  ;;  %v1016_v3 = vadd.f32 %v941_v56, %v6689_v4  ;;  %v1018_v62 = vadd.f32 %v1012_v20, %v6691_v0  ;;  %v4923_v20 = vld [vmem:[#allocation9 + $0x1f0] sm:$0xff]  ;;  %v4932_v0 = vld [vmem:[#allocation9 + $0x1c0] sm:$0xff] }
 0x33c   :  { %3851 = vtanh.f32 %v1019_v52  ;;  %v1023_v55 = vmul.f32 0.5, %v1016_v3  ;;  %v1028_v2 = vmul.f32 0.5, %v1018_v62  ;;  %v4935_v62 = vld [vmem:[#allocation9 + $0x1d0] sm:$0xff] }
 0x33e   :  { %3853 = vtanh.f32 %v1023_v55  ;;  %v4920_v55 = vld [vmem:[#allocation9 + $0x1e0] sm:$0xff] }
 0x33f   :  { %3855 = vtanh.f32 %v1017_v59 }
 0x340   :  { %3857 = vtanh.f32 %v1028_v2  ;;  %v4938_v2 = vld [vmem:[#allocation9 + $0x1a8] sm:$0xff] }
 0x349   :  { %v3852_v29 = vpop.eup %3851 }
 0x34a   :  { %v1021_v58 = vadd.f32 1.0, %v3852_v29  ;;  %v4941_v29 = vld [vmem:[#allocation9 + $0x1b8] sm:$0xff] }
 0x34b   :  { %v3854_v47 = vpop.eup %3853 }
 0x34c   :  { %v1022_v1 = vmul.f32 0.5, %v1021_v58  ;;  %v1025_v63 = vadd.f32 1.0, %v3854_v47  ;;  %v3856_v11 = vpop.eup %3855  ;;  %v4944_v58 = vld [vmem:[#allocation9 + $0x1a0] sm:$0xff]  ;;  %v4947_v47 = vld [vmem:[#allocation9 + $0x1b0] sm:$0xff] }
 0x34d   :  { %v3858_v51 = vpop.eup %3857 }
 0x34e   :  { %v1026_v38 = vmul.f32 0.5, %v1025_v63  ;;  %v1033_v61 = vmul.f32 %v3856_v11, %v1022_v1  ;;  %v1030_v4 = vadd.f32 1.0, %v3858_v51  ;;  %v4950_v1 = vld [vmem:[#allocation9 + $0x188] sm:$0xff]  ;;  %v4953_v63 = vld [vmem:[#allocation9 + $0x198] sm:$0xff]  ;;  %v4956_v11 = vld [vmem:[#allocation9 + $0x180] sm:$0xff] }
 0x34f   :  { %v4965_v51 = vld [vmem:[#allocation9 + $0x178] sm:$0xff] }
 0x350   :  { %v1032_v56 = vmul.f32 %v1026_v38, %v4835_v57  ;;  %v1031_v3 = vmul.f32 0.5, %v1030_v4  ;;  %v4926_v57 = vld [vmem:[#allocation9 + $0x1c8] sm:$0xff]  ;;  %v4959_v38 = vld [vmem:[#allocation9 + $0x190] sm:$0xff]  ;;  %v4968_v4 = vld [vmem:[#allocation9 + $0x160] sm:$0xff] }
 0x352   :  { %v4913_v52 = vadd.f32 %v1033_v61, %v1032_v56  ;;  %v4929_v61 = vld [vmem:[#allocation9 + $0x1d8] sm:$0xff]  ;;  %v4962_v56 = vld [vmem:[#allocation9 + $0x168] sm:$0xff] }
 0x354   :  { %3859 = vtanh.f32 %v4913_v52 }
 0x361   :  { %v3860_v60 = vpop.eup %3859 }
 0x362   :  { %v4916_v59 = vmul.f32 %v3860_v60, %v1031_v3  ;;  %v4971_v3 = vld [vmem:[#allocation9 + $0x170] sm:$0xff]  ;;  %v4974_v60 = vld [vmem:[#allocation9 + $0x148] sm:$0xff] }
 0x364   :  { %6692 = vst [vmem:[#allocation24_spill] sm:$0xff] %v4916_v59  ;;  %1107 = vmatmul.mubr.f32.vlgmr.msra.gmra.mxu0 %v4916_v59  ;;  %1178 = vmatmul.mubr.f32.vlgmr.msra.gmra.mxu1 %v4916_v59  ;;  %v4977_v59 = vld [vmem:[#allocation9 + $0x158] sm:$0xff] }
 0x365   :  { %1212 = vmatpush1.msra.mxu0 %v4920_v55  ;;  %1283 = vmatpush1.msra.mxu1 %v4923_v20 }
 0x366   :  { %1213 = vmatprep.subr.mxu0 %v4926_v57  ;;  %1284 = vmatprep.subr.mxu1 %v4929_v61 }
 0x367   :  { %1214 = vmatpush1.msra.mxu0 %v4932_v0  ;;  %1285 = vmatpush1.msra.mxu1 %v4935_v62 }
 0x368   :  { %1215 = vmatprep.subr.mxu0 %v4938_v2  ;;  %1286 = vmatprep.subr.mxu1 %v4941_v29 }
 0x369   :  { %1216 = vmatpush1.msra.mxu0 %v4944_v58  ;;  %1287 = vmatpush1.msra.mxu1 %v4947_v47 }
 0x36a   :  { %1217 = vmatprep.subr.mxu0 %v4950_v1  ;;  %1288 = vmatprep.subr.mxu1 %v4953_v63 }
 0x36b   :  { %1218 = vmatpush1.msra.mxu0 %v4956_v11  ;;  %1289 = vmatpush1.msra.mxu1 %v4959_v38 }
 0x36c   :  { %1219 = vmatprep.subr.mxu0 %v4962_v56  ;;  %1290 = vmatprep.subr.mxu1 %v4965_v51 }
 0x36d   :  { %1220 = vmatpush1.msra.mxu0 %v4968_v4  ;;  %1291 = vmatpush1.msra.mxu1 %v4971_v3 }
 0x36e   :  { %1221 = vmatprep.subr.mxu0 %v4974_v60  ;;  %1292 = vmatprep.subr.mxu1 %v4977_v59 }
 0x36f   :  { %1222 = vmatpush1.msra.mxu0 %v4442_v27  ;;  %1293 = vmatpush1.msra.mxu1 %v4444_v28  ;;  %v5024_v27 = vld [vmem:[#allocation9 + $0x1e8] sm:$0xff]  ;;  %v5027_v28 = vld [vmem:[#allocation9 + $0x1f8] sm:$0xff] }
 0x370   :  { %1223 = vmatprep.subr.mxu0 %v4450_v30  ;;  %1294 = vmatprep.subr.mxu1 %v4452_v31  ;;  %6693 = vst [vmem:[#allocation46_spill] sm:$0xff] %v5024_v27  ;;  %6694 = vst [vmem:[#allocation45_spill] sm:$0xff] %v5027_v28  ;;  %v6695_v31 = vld [vmem:[#allocation52_spill] sm:$0xff] }
 0x371   :  { %1224 = vmatpush1.msra.mxu0 %v4456_v32  ;;  %1295 = vmatpush1.msra.mxu1 %v4458_v33 }
 0x372   :  { %1225 = vmatprep.subr.mxu0 %v4460_v34  ;;  %1296 = vmatprep.subr.mxu1 %v4462_v35 }
 0x373   :  { %1226 = vmatpush1.msra.mxu0 %v4468_v36  ;;  %1297 = vmatpush1.msra.mxu1 %v4470_v37  ;;  %v6696_v36 = vld [vmem:[#allocation54_spill] sm:$0xff] }
 0x374   :  { %1227 = vmatprep.subr.mxu0 %v4476_v39  ;;  %1298 = vmatprep.subr.mxu1 %v4478_v40  ;;  %v6697_v39 = vld [vmem:[#allocation53_spill] sm:$0xff] }
 0x375   :  { %1228 = vmatpush1.msra.mxu0 %v4482_v41  ;;  %1299 = vmatpush1.msra.mxu1 %v4484_v42 }
 0x376   :  { %1229 = vmatprep.subr.mxu0 %v4486_v43  ;;  %1300 = vmatprep.subr.mxu1 %v4488_v44  ;;  %v6698_v43 = vld [vmem:[#allocation55_spill] sm:$0xff] }
 0x377   :  { %1230 = vmatpush1.msra.mxu0 %v4494_v45  ;;  %1301 = vmatpush1.msra.mxu1 %v4496_v46 }
 0x378   :  { %1231 = vmatprep.subr.mxu0 %v4502_v48  ;;  %1302 = vmatprep.subr.mxu1 %v4504_v49 }
 0x379   :  { %1232 = vmatpush1.msra.mxu0 %v4508_v50  ;;  %1303 = vmatpush1.msra.mxu1 %v6638_v54 }
 0x37a   :  { %1233 = vmatprep.subr.mxu0 %v6639_v53  ;;  %1304 = vmatprep.subr.mxu1 %v6666_v5 }
 0x37b   :  { %1234 = vmatpush1.msra.mxu0 %v6667_v6  ;;  %1305 = vmatpush1.msra.mxu1 %v6668_v7 }
 0x37c   :  { %1235 = vmatprep.subr.mxu0 %v6669_v8  ;;  %1306 = vmatprep.subr.mxu1 %v6670_v9 }
 0x37d   :  { %1236 = vmatpush1.msra.mxu0 %v6671_v10  ;;  %1307 = vmatpush1.msra.mxu1 %v6672_v12 }
 0x37e   :  { %1237 = vmatprep.subr.mxu0 %v6673_v13  ;;  %1308 = vmatprep.subr.mxu1 %v6674_v14 }
 0x37f   :  { %1238 = vmatpush1.msra.mxu0 %v6675_v15  ;;  %1309 = vmatpush1.msra.mxu1 %v6676_v16  ;;  %v5062_v15 = vld [vmem:[#allocation9 + $0x140] sm:$0xff]  ;;  %v5065_v16 = vld [vmem:[#allocation9 + $0x150] sm:$0xff] }
 0x380   :  { %1239 = vmatprep.subr.mxu0 %v6677_v17  ;;  %1310 = vmatprep.subr.mxu1 %v6678_v18  ;;  %v5068_v17 = vld [vmem:[#allocation9 + $0x128] sm:$0xff]  ;;  %v5071_v18 = vld [vmem:[#allocation9 + $0x138] sm:$0xff] }
 0x381   :  { %1240 = vmatpush1.msra.mxu0 %v6679_v19  ;;  %1311 = vmatpush1.msra.mxu1 %v6680_v21  ;;  %v5074_v19 = vld [vmem:[#allocation9 + $0x120] sm:$0xff]  ;;  %v5077_v21 = vld [vmem:[#allocation9 + $0x130] sm:$0xff] }
 0x382   :  { %1241 = vmatprep.subr.mxu0 %v6681_v22  ;;  %1312 = vmatprep.subr.mxu1 %v6682_v23  ;;  %v5080_v22 = vld [vmem:[#allocation9 + $0x108] sm:$0xff]  ;;  %v5083_v23 = vld [vmem:[#allocation9 + $0x118] sm:$0xff] }
 0x383   :  { %1242 = vmatpush1.msra.mxu0 %v6683_v24  ;;  %1275 = vmatprep.mubr.f32.mxu0 %v6684_v25  ;;  %v5086_v24 = vld [vmem:[#allocation9 + $0x100] sm:$0xff] }
 0x384   :  { %1313 = vmatpush1.msra.mxu1 %v6685_v26  ;;  %1346 = vmatprep.mubr.f32.mxu1 %v6684_v25  ;;  %v5089_v26 = vld [vmem:[#allocation9 + $0x110] sm:$0xff] }
 0x385   :  { %1380 = vmatprep.subr.mxu0 %v5024_v27  ;;  %1451 = vmatprep.subr.mxu1 %v5027_v28 }
 0x424   :  { %v1108_v30 = vpop.f32.mrf.mxu0  ;;  %v1179_v33 = vpop.f32.mrf.mxu1 }
 0x425   :  { %v1184_v32 = vadd.f32 %v1108_v30, %v6695_v31  ;;  %v1186_v40 = vadd.f32 %v1179_v33, %v6697_v39  ;;  %v5095_v30 = vld [vmem:[#allocation9 + $0xf8] sm:$0xff]  ;;  %v5098_v31 = vld [vmem:[#allocation9 + $0xe0] sm:$0xff]  ;;  %v5104_v33 = vld [vmem:[#allocation9 + $0xc8] sm:$0xff] }
 0x426   :  { %v1110_v34 = vpop.f32.mrf.mxu0  ;;  %v1181_v42 = vpop.f32.mrf.mxu1  ;;  %v5119_v39 = vld [vmem:[#allocation9 + $0xb8] sm:$0xff] }
 0x427   :  { %v1188_v35 = vmul.f32 0.5, %v1184_v32  ;;  %v1185_v37 = vadd.f32 %v1110_v34, %v6696_v36  ;;  %v1187_v44 = vadd.f32 %v1181_v42, %v6698_v43  ;;  %v5101_v32 = vld [vmem:[#allocation9 + $0xf0] sm:$0xff]  ;;  %v5107_v34 = vld [vmem:[#allocation9 + $0xd8] sm:$0xff]  ;;  %v5128_v42 = vld [vmem:[#allocation9 + $0x88] sm:$0xff] }
 0x428   :  { %v5113_v36 = vld [vmem:[#allocation9 + $0xd0] sm:$0xff]  ;;  %v5131_v43 = vld [vmem:[#allocation9 + $0x98] sm:$0xff] }
 0x429   :  { %3861 = vtanh.f32 %v1188_v35  ;;  %v1192_v41 = vmul.f32 0.5, %v1185_v37  ;;  %v1197_v45 = vmul.f32 0.5, %v1187_v44  ;;  %v5110_v35 = vld [vmem:[#allocation9 + $0xc0] sm:$0xff]  ;;  %v5116_v37 = vld [vmem:[#allocation9 + $0xa8] sm:$0xff]  ;;  %6700 = vst [vmem:[#allocation25_spill] sm:$0xff] %v5131_v43 }
 0x42a   :  { %v5134_v44 = vld [vmem:[#allocation9 + $0x80] sm:$0xff] }
 0x42b   :  { %3863 = vtanh.f32 %v1192_v41  ;;  %v5125_v41 = vld [vmem:[#allocation9 + $0xb0] sm:$0xff]  ;;  %6701 = vst [vmem:[#allocation26_spill] sm:$0xff] %v5134_v44 }
 0x42c   :  { %3865 = vtanh.f32 %v1186_v40  ;;  %v5122_v40 = vld [vmem:[#allocation9 + $0xa0] sm:$0xff] }
 0x42d   :  { %3867 = vtanh.f32 %v1197_v45  ;;  %v5137_v45 = vld [vmem:[#allocation9 + $0x90] sm:$0xff] }
 0x42e   :  { %6702 = vst [vmem:[#allocation27_spill] sm:$0xff] %v5137_v45 }
 0x436   :  { %v3862_v46 = vpop.eup %3861 }
 0x437   :  { %v1190_v48 = vadd.f32 1.0, %v3862_v46  ;;  %v5140_v46 = vld [vmem:[#allocation9 + $0x68] sm:$0xff] }
 0x438   :  { %v3864_v49 = vpop.eup %3863  ;;  %6703 = vst [vmem:[#allocation28_spill] sm:$0xff] %v5140_v46 }
 0x439   :  { %v1191_v50 = vmul.f32 0.5, %v1190_v48  ;;  %v1194_v54 = vadd.f32 1.0, %v3864_v49  ;;  %v3866_v53 = vpop.eup %3865  ;;  %v5143_v48 = vld [vmem:[#allocation9 + $0x78] sm:$0xff]  ;;  %v5146_v49 = vld [vmem:[#allocation9 + $0x60] sm:$0xff] }
 0x43a   :  { %v3868_v9 = vpop.eup %3867  ;;  %6704 = vst [vmem:[#allocation29_spill] sm:$0xff] %v5143_v48  ;;  %6705 = vst [vmem:[#allocation30_spill] sm:$0xff] %v5146_v49 }
 0x43b   :  { %v1195_v5 = vmul.f32 0.5, %v1194_v54  ;;  %v1202_v6 = vmul.f32 %v3866_v53, %v1191_v50  ;;  %v1199_v10 = vadd.f32 1.0, %v3868_v9  ;;  %v5149_v50 = vld [vmem:[#allocation9 + $0x70] sm:$0xff]  ;;  %v5152_v54 = vld [vmem:[#allocation9 + $0x48] sm:$0xff]  ;;  %v5155_v53 = vld [vmem:[#allocation9 + $0x58] sm:$0xff] }
 0x43c   :  { %6706 = vst [vmem:[#allocation31_spill] sm:$0xff] %v5149_v50  ;;  %6707 = vst [vmem:[#allocation32_spill] sm:$0xff] %v5152_v54  ;;  %v5167_v9 = vld [vmem:[#allocation9 + $0x38] sm:$0xff] }
 0x43d   :  { %v1201_v7 = vmul.f32 %v1195_v5, %v4913_v52  ;;  %v1200_v12 = vmul.f32 0.5, %v1199_v10  ;;  %v5092_v52 = vld [vmem:[#allocation9 + $0xe8] sm:$0xff]  ;;  %6708 = vst [vmem:[#allocation33_spill] sm:$0xff] %v5155_v53  ;;  %v5158_v5 = vld [vmem:[#allocation9 + $0x40] sm:$0xff]  ;;  %6712 = vst [vmem:[#allocation37_spill] sm:$0xff] %v5167_v9 }
 0x43e   :  { %6709 = vst [vmem:[#allocation34_spill] sm:$0xff] %v5158_v5  ;;  %v5170_v10 = vld [vmem:[#allocation9 + $0x20] sm:$0xff] }
 0x43f   :  { %v5035_v8 = vadd.f32 %v1202_v6, %v1201_v7  ;;  %v5161_v6 = vld [vmem:[#allocation9 + $0x50] sm:$0xff]  ;;  %v5164_v7 = vld [vmem:[#allocation9 + $0x28] sm:$0xff]  ;;  %6713 = vst [vmem:[#allocation38_spill] sm:$0xff] %v5170_v10 }
 0x440   :  { %6710 = vst [vmem:[#allocation35_spill] sm:$0xff] %v5161_v6  ;;  %6711 = vst [vmem:[#allocation36_spill] sm:$0xff] %v5164_v7 }
 0x441   :  { %3869 = vtanh.f32 %v5035_v8 }
 0x44e   :  { %v3870_v13 = vpop.eup %3869 }
 0x44f   :  { %v5038_v14 = vmul.f32 %v3870_v13, %v1200_v12  ;;  %v5173_v12 = vld [vmem:[#allocation9 + $0x30] sm:$0xff]  ;;  %v5176_v13 = vld [vmem:[#allocation9 + $0x8] sm:$0xff] }
 0x450   :  { %6714 = vst [vmem:[#allocation39_spill] sm:$0xff] %v5173_v12  ;;  %6715 = vst [vmem:[#allocation40_spill] sm:$0xff] %v5176_v13 }
 0x451   :  { %6699 = vst [vmem:[#allocation47_spill] sm:$0xff] %v5038_v14  ;;  %1276 = vmatmul.mubr.f32.vlgmr.msra.gmra.mxu0 %v5038_v14  ;;  %1347 = vmatmul.mubr.f32.vlgmr.msra.gmra.mxu1 %v5038_v14  ;;  %v5179_v14 = vld [vmem:[#allocation9 + $0x18] sm:$0xff] }
 0x452   :  { %1381 = vmatpush1.msra.mxu0 %v4920_v55  ;;  %1452 = vmatpush1.msra.mxu1 %v4923_v20  ;;  %6716 = vst [vmem:[#allocation41_spill] sm:$0xff] %v5179_v14 }
 0x453   :  { %1382 = vmatprep.subr.mxu0 %v4926_v57  ;;  %1453 = vmatprep.subr.mxu1 %v4929_v61 }
 0x454   :  { %1383 = vmatpush1.msra.mxu0 %v4932_v0  ;;  %1454 = vmatpush1.msra.mxu1 %v4935_v62 }
 0x455   :  { %1384 = vmatprep.subr.mxu0 %v4938_v2  ;;  %1455 = vmatprep.subr.mxu1 %v4941_v29 }
 0x456   :  { %1385 = vmatpush1.msra.mxu0 %v4944_v58  ;;  %1456 = vmatpush1.msra.mxu1 %v4947_v47 }
 0x457   :  { %1386 = vmatprep.subr.mxu0 %v4950_v1  ;;  %1457 = vmatprep.subr.mxu1 %v4953_v63 }
 0x458   :  { %1387 = vmatpush1.msra.mxu0 %v4956_v11  ;;  %1458 = vmatpush1.msra.mxu1 %v4959_v38 }
 0x459   :  { %1388 = vmatprep.subr.mxu0 %v4962_v56  ;;  %1459 = vmatprep.subr.mxu1 %v4965_v51 }
 0x45a   :  { %1389 = vmatpush1.msra.mxu0 %v4968_v4  ;;  %1460 = vmatpush1.msra.mxu1 %v4971_v3 }
 0x45b   :  { %1390 = vmatprep.subr.mxu0 %v4974_v60  ;;  %1461 = vmatprep.subr.mxu1 %v4977_v59 }
 0x45c   :  { %1391 = vmatpush1.msra.mxu0 %v5062_v15  ;;  %1462 = vmatpush1.msra.mxu1 %v5065_v16 }
 0x45d   :  { %1392 = vmatprep.subr.mxu0 %v5068_v17  ;;  %1463 = vmatprep.subr.mxu1 %v5071_v18 }
 0x45e   :  { %1393 = vmatpush1.msra.mxu0 %v5074_v19  ;;  %1464 = vmatpush1.msra.mxu1 %v5077_v21 }
 0x45f   :  { %1394 = vmatprep.subr.mxu0 %v5080_v22  ;;  %1465 = vmatprep.subr.mxu1 %v5083_v23 }
 0x460   :  { %1395 = vmatpush1.msra.mxu0 %v5086_v24  ;;  %1466 = vmatpush1.msra.mxu1 %v5089_v26 }
 0x461   :  { %1396 = vmatprep.subr.mxu0 %v5092_v52  ;;  %1467 = vmatprep.subr.mxu1 %v5095_v30 }
 0x462   :  { %1397 = vmatpush1.msra.mxu0 %v5098_v31  ;;  %1468 = vmatpush1.msra.mxu1 %v5101_v32 }
 0x463   :  { %1398 = vmatprep.subr.mxu0 %v5104_v33  ;;  %1469 = vmatprep.subr.mxu1 %v5107_v34 }
 0x464   :  { %1399 = vmatpush1.msra.mxu0 %v5110_v35  ;;  %1470 = vmatpush1.msra.mxu1 %v5113_v36 }
 0x465   :  { %1400 = vmatprep.subr.mxu0 %v5116_v37  ;;  %1471 = vmatprep.subr.mxu1 %v5119_v39 }
 0x466   :  { %1401 = vmatpush1.msra.mxu0 %v5122_v40  ;;  %1472 = vmatpush1.msra.mxu1 %v5125_v41 }
 0x467   :  { %1402 = vmatprep.subr.mxu0 %v5128_v42  ;;  %1473 = vmatprep.subr.mxu1 %v5131_v43 }
 0x468   :  { %1403 = vmatpush1.msra.mxu0 %v5134_v44  ;;  %1474 = vmatpush1.msra.mxu1 %v5137_v45 }
 0x469   :  { %1404 = vmatprep.subr.mxu0 %v5140_v46  ;;  %1475 = vmatprep.subr.mxu1 %v5143_v48 }
 0x46a   :  { %1405 = vmatpush1.msra.mxu0 %v5146_v49  ;;  %1476 = vmatpush1.msra.mxu1 %v5149_v50 }
 0x46b   :  { %1406 = vmatprep.subr.mxu0 %v5152_v54  ;;  %1477 = vmatprep.subr.mxu1 %v5155_v53  ;;  %v6720_v53 = vld [vmem:[#allocation58_spill] sm:$0xff]  ;;  %v6721_v54 = vld [vmem:[#allocation57_spill] sm:$0xff] }
 0x46c   :  { %1407 = vmatpush1.msra.mxu0 %v5158_v5  ;;  %1478 = vmatpush1.msra.mxu1 %v5161_v6 }
 0x46d   :  { %1408 = vmatprep.subr.mxu0 %v5164_v7  ;;  %1479 = vmatprep.subr.mxu1 %v5167_v9  ;;  %v5182_v7 = vld [vmem:[#allocation9] sm:$0xff]  ;;  %v5186_v9 = vld [vmem:[#allocation9 + $0x10] sm:$0xff] }
 0x46e   :  { %1409 = vmatpush1.msra.mxu0 %v5170_v10  ;;  %1480 = vmatpush1.msra.mxu1 %v5173_v12  ;;  %6717 = vst [vmem:[#allocation42_spill] sm:$0xff] %v5182_v7  ;;  %6718 = vst [vmem:[#allocation43_spill] sm:$0xff] %v5186_v9  ;;  %v6719_v12 = vld [vmem:[#allocation56_spill] sm:$0xff] }
 0x46f   :  { %1410 = vmatprep.subr.mxu0 %v5176_v13  ;;  %1481 = vmatprep.subr.mxu1 %v5179_v14 }
 0x470   :  { %1411 = vmatpush1.msra.mxu0 %v5182_v7  ;;  %1444 = vmatprep.mubr.f32.mxu0 %v6684_v25 }
 0x471   :  { %1482 = vmatpush1.msra.mxu1 %v5186_v9  ;;  %1515 = vmatprep.mubr.f32.mxu1 %v6684_v25  ;;  %v6722_v25 = vld [vmem:[#allocation59_spill] sm:$0xff] }
 0x472   :  { %1549 = vmatprep.subr.mxu0 %v5024_v27  ;;  %1620 = vmatprep.subr.mxu1 %v5027_v28 }
 0x511   :  { %v1277_v13 = vpop.f32.mrf.mxu0  ;;  %v1348_v14 = vpop.f32.mrf.mxu1 }
 0x512   :  { %v1353_v10 = vadd.f32 %v1277_v13, %v6719_v12  ;;  %v1355_v50 = vadd.f32 %v1348_v14, %v6721_v54  ;;  %v6731_v54 = vld [vmem:[#allocation32_spill] sm:$0xff] }
 0x513   :  { %v1279_v6 = vpop.f32.mrf.mxu0  ;;  %v1350_v9 = vpop.f32.mrf.mxu1 }
 0x514   :  { %v1357_v5 = vmul.f32 0.5, %v1353_v10  ;;  %v1354_v7 = vadd.f32 %v1279_v6, %v6720_v53  ;;  %v1356_v48 = vadd.f32 %v1350_v9, %v6722_v25  ;;  %v6732_v6 = vld [vmem:[#allocation33_spill] sm:$0xff]  ;;  %v6734_v9 = vld [vmem:[#allocation35_spill] sm:$0xff] }
 0x516   :  { %3871 = vtanh.f32 %v1357_v5  ;;  %v1361_v49 = vmul.f32 0.5, %v1354_v7  ;;  %v1366_v27 = vmul.f32 0.5, %v1356_v48  ;;  %v6733_v7 = vld [vmem:[#allocation34_spill] sm:$0xff] }
 0x518   :  { %3873 = vtanh.f32 %v1361_v49 }
 0x519   :  { %3875 = vtanh.f32 %v1355_v50 }
 0x51a   :  { %3877 = vtanh.f32 %v1366_v27  ;;  %v6724_v27 = vld [vmem:[#allocation25_spill] sm:$0xff] }
 0x523   :  { %v3872_v46 = vpop.eup %3871 }
 0x524   :  { %v1359_v28 = vadd.f32 1.0, %v3872_v46  ;;  %v6730_v46 = vld [vmem:[#allocation31_spill] sm:$0xff] }
 0x525   :  { %v3874_v45 = vpop.eup %3873 }
 0x526   :  { %v1360_v44 = vmul.f32 0.5, %v1359_v28  ;;  %v1363_v12 = vadd.f32 1.0, %v3874_v45  ;;  %v3876_v13 = vpop.eup %3875  ;;  %v6725_v28 = vld [vmem:[#allocation26_spill] sm:$0xff] }
 0x527   :  { %v3878_v14 = vpop.eup %3877  ;;  %v6729_v45 = vld [vmem:[#allocation30_spill] sm:$0xff] }
 0x528   :  { %v1364_v10 = vmul.f32 0.5, %v1363_v12  ;;  %v1371_v43 = vmul.f32 %v3876_v13, %v1360_v44  ;;  %v1368_v49 = vadd.f32 1.0, %v3878_v14  ;;  %v6728_v44 = vld [vmem:[#allocation29_spill] sm:$0xff]  ;;  %v6735_v12 = vld [vmem:[#allocation36_spill] sm:$0xff] }
 0x529   :  { %v6736_v13 = vld [vmem:[#allocation37_spill] sm:$0xff]  ;;  %v6739_v14 = vld [vmem:[#allocation40_spill] sm:$0xff] }
 0x52a   :  { %v1370_v53 = vmul.f32 %v1364_v10, %v5035_v8  ;;  %v1369_v50 = vmul.f32 0.5, %v1368_v49  ;;  %v6726_v8 = vld [vmem:[#allocation27_spill] sm:$0xff]  ;;  %v6737_v10 = vld [vmem:[#allocation38_spill] sm:$0xff]  ;;  %v6740_v49 = vld [vmem:[#allocation41_spill] sm:$0xff] }
 0x52c   :  { %v5197_v5 = vadd.f32 %v1371_v43, %v1370_v53  ;;  %v6727_v43 = vld [vmem:[#allocation28_spill] sm:$0xff]  ;;  %v6738_v53 = vld [vmem:[#allocation39_spill] sm:$0xff] }
 0x52e   :  { %3879 = vtanh.f32 %v5197_v5 }
 0x53b   :  { %v3880_v25 = vpop.eup %3879 }
 0x53c   :  { %v5200_v48 = vmul.f32 %v3880_v25, %v1369_v50  ;;  %v6741_v50 = vld [vmem:[#allocation42_spill] sm:$0xff]  ;;  %v6742_v25 = vmov 0.0  }
 0x53e   :  { %6723 = vst [vmem:[#allocation21_spill] sm:$0xff] %v5200_v48  ;;  %1445 = vmatmul.mubr.f32.vlgmr.msra.gmra.mxu0 %v5200_v48  ;;  %1516 = vmatmul.mubr.f32.vlgmr.msra.gmra.mxu1 %v5200_v48  ;;  %v6743_v48 = vld [vmem:[#allocation43_spill] sm:$0xff] }
 0x53f   :  { %1550 = vmatpush1.msra.mxu0 %v4920_v55  ;;  %1621 = vmatpush1.msra.mxu1 %v4923_v20 }
 0x540   :  { %1551 = vmatprep.subr.mxu0 %v4926_v57  ;;  %1622 = vmatprep.subr.mxu1 %v4929_v61 }
 0x541   :  { %1552 = vmatpush1.msra.mxu0 %v4932_v0  ;;  %1623 = vmatpush1.msra.mxu1 %v4935_v62 }
 0x542   :  { %1553 = vmatprep.subr.mxu0 %v4938_v2  ;;  %1624 = vmatprep.subr.mxu1 %v4941_v29 }
 0x543   :  { %1554 = vmatpush1.msra.mxu0 %v4944_v58  ;;  %1625 = vmatpush1.msra.mxu1 %v4947_v47 }
 0x544   :  { %1555 = vmatprep.subr.mxu0 %v4950_v1  ;;  %1626 = vmatprep.subr.mxu1 %v4953_v63 }
 0x545   :  { %1556 = vmatpush1.msra.mxu0 %v4956_v11  ;;  %1627 = vmatpush1.msra.mxu1 %v4959_v38 }
 0x546   :  { %1557 = vmatprep.subr.mxu0 %v4962_v56  ;;  %1628 = vmatprep.subr.mxu1 %v4965_v51 }
 0x547   :  { %1558 = vmatpush1.msra.mxu0 %v4968_v4  ;;  %1629 = vmatpush1.msra.mxu1 %v4971_v3 }
 0x548   :  { %1559 = vmatprep.subr.mxu0 %v4974_v60  ;;  %1630 = vmatprep.subr.mxu1 %v4977_v59 }
 0x549   :  { %1560 = vmatpush1.msra.mxu0 %v5062_v15  ;;  %1631 = vmatpush1.msra.mxu1 %v5065_v16 }
 0x54a   :  { %1561 = vmatprep.subr.mxu0 %v5068_v17  ;;  %1632 = vmatprep.subr.mxu1 %v5071_v18 }
 0x54b   :  { %1562 = vmatpush1.msra.mxu0 %v5074_v19  ;;  %1633 = vmatpush1.msra.mxu1 %v5077_v21 }
 0x54c   :  { %1563 = vmatprep.subr.mxu0 %v5080_v22  ;;  %1634 = vmatprep.subr.mxu1 %v5083_v23 }
 0x54d   :  { %1564 = vmatpush1.msra.mxu0 %v5086_v24  ;;  %1635 = vmatpush1.msra.mxu1 %v5089_v26 }
 0x54e   :  { %1565 = vmatprep.subr.mxu0 %v5092_v52  ;;  %1636 = vmatprep.subr.mxu1 %v5095_v30 }
 0x54f   :  { %1566 = vmatpush1.msra.mxu0 %v5098_v31  ;;  %1637 = vmatpush1.msra.mxu1 %v5101_v32 }
 0x550   :  { %1567 = vmatprep.subr.mxu0 %v5104_v33  ;;  %1638 = vmatprep.subr.mxu1 %v5107_v34 }
 0x551   :  { %1568 = vmatpush1.msra.mxu0 %v5110_v35  ;;  %1639 = vmatpush1.msra.mxu1 %v5113_v36 }
 0x552   :  { %1569 = vmatprep.subr.mxu0 %v5116_v37  ;;  %1640 = vmatprep.subr.mxu1 %v5119_v39 }
 0x553   :  { %1570 = vmatpush1.msra.mxu0 %v5122_v40  ;;  %1641 = vmatpush1.msra.mxu1 %v5125_v41 }
 0x554   :  { %1571 = vmatprep.subr.mxu0 %v5128_v42  ;;  %1642 = vmatprep.subr.mxu1 %v6724_v27 }
 0x555   :  { %1572 = vmatpush1.msra.mxu0 %v6725_v28  ;;  %1643 = vmatpush1.msra.mxu1 %v6726_v8 }
 0x556   :  { %1573 = vmatprep.subr.mxu0 %v6727_v43  ;;  %1644 = vmatprep.subr.mxu1 %v6728_v44 }
 0x557   :  { %1574 = vmatpush1.msra.mxu0 %v6729_v45  ;;  %1645 = vmatpush1.msra.mxu1 %v6730_v46 }
 0x558   :  { %1575 = vmatprep.subr.mxu0 %v6731_v54  ;;  %1646 = vmatprep.subr.mxu1 %v6732_v6  ;;  %v6747_v54 = vld [vmem:[#allocation62_spill] sm:$0xff] }
 0x559   :  { %1576 = vmatpush1.msra.mxu0 %v6733_v7  ;;  %1647 = vmatpush1.msra.mxu1 %v6734_v9  ;;  %v6744_v9 = vld [vmem:[#allocation46_spill] sm:$0xff] }
 0x55a   :  { %1577 = vmatprep.subr.mxu0 %v6735_v12  ;;  %1648 = vmatprep.subr.mxu1 %v6736_v13  ;;  %v6745_v12 = vld [vmem:[#allocation45_spill] sm:$0xff] }
 0x55b   :  { %1578 = vmatpush1.msra.mxu0 %v6737_v10  ;;  %1649 = vmatpush1.msra.mxu1 %v6738_v53  ;;  %v6746_v10 = vld [vmem:[#allocation60_spill] sm:$0xff] }
 0x55c   :  { %1579 = vmatprep.subr.mxu0 %v6739_v14  ;;  %1650 = vmatprep.subr.mxu1 %v6740_v49 }
 0x55d   :  { %1580 = vmatpush1.msra.mxu0 %v6741_v50  ;;  %1613 = vmatprep.mubr.f32.mxu0 %v6742_v25  ;;  %v6748_v50 = vld [vmem:[#allocation61_spill] sm:$0xff] }
 0x55e   :  { %1651 = vmatpush1.msra.mxu1 %v6743_v48  ;;  %1684 = vmatprep.mubr.f32.mxu1 %v6742_v25  ;;  %v6749_v25 = vld [vmem:[#allocation63_spill] sm:$0xff] }
 0x55f   :  { %1718 = vmatprep.subr.mxu0 %v6744_v9  ;;  %1789 = vmatprep.subr.mxu1 %v6745_v12 }
 0x5fe   :  { %v1446_v13 = vpop.f32.mrf.mxu0  ;;  %v1517_v53 = vpop.f32.mrf.mxu1 }
 0x5ff   :  { %v1522_v7 = vadd.f32 %v1446_v13, %v6746_v10  ;;  %v1524_v46 = vadd.f32 %v1517_v53, %v6748_v50 }
 0x600   :  { %v1448_v6 = vpop.f32.mrf.mxu0  ;;  %v1519_v48 = vpop.f32.mrf.mxu1 }
 0x601   :  { %v1526_v14 = vmul.f32 0.5, %v1522_v7  ;;  %v1523_v49 = vadd.f32 %v1448_v6, %v6747_v54  ;;  %v1525_v44 = vadd.f32 %v1519_v48, %v6749_v25 }
 0x603   :  { %3881 = vtanh.f32 %v1526_v14  ;;  %v1530_v45 = vmul.f32 0.5, %v1523_v49  ;;  %v1535_v9 = vmul.f32 0.5, %v1525_v44 }
 0x605   :  { %3883 = vtanh.f32 %v1530_v45 }
 0x606   :  { %3885 = vtanh.f32 %v1524_v46 }
 0x607   :  { %3887 = vtanh.f32 %v1535_v9  ;;  %v1951_v9 = vld [vmem:[#allocation10 + $0x1e0] sm:$0xff] }
 0x610   :  { %v3882_v43 = vpop.eup %3881 }
 0x611   :  { %v1528_v12 = vadd.f32 1.0, %v3882_v43 }
 0x612   :  { %v3884_v8 = vpop.eup %3883 }
 0x613   :  { %v1529_v28 = vmul.f32 0.5, %v1528_v12  ;;  %v1532_v13 = vadd.f32 1.0, %v3884_v8  ;;  %v3886_v10 = vpop.eup %3885  ;;  %v1953_v12 = vld [vmem:[#allocation10 + $0x1f0] sm:$0xff] }
 0x614   :  { %v3888_v45 = vpop.eup %3887 }
 0x615   :  { %v1533_v7 = vmul.f32 0.5, %v1532_v13  ;;  %v1540_v27 = vmul.f32 %v3886_v10, %v1529_v28  ;;  %v1537_v46 = vadd.f32 1.0, %v3888_v45  ;;  %v1948_v13 = vld [vmem:[#allocation10 + $0x1c8] sm:$0xff]  ;;  %v1950_v10 = vld [vmem:[#allocation10 + $0x1d8] sm:$0xff] }
 0x616   :  { %v1946_v45 = vld [vmem:[#allocation10 + $0x1b8] sm:$0xff] }
 0x617   :  { %v1539_v54 = vmul.f32 %v1533_v7, %v5197_v5  ;;  %v1538_v53 = vmul.f32 0.5, %v1537_v46  ;;  %v1947_v7 = vld [vmem:[#allocation10 + $0x1c0] sm:$0xff] }
 0x618   :  { %v1943_v46 = vld [vmem:[#allocation10 + $0x1a0] sm:$0xff] }
 0x619   :  { %v5275_v6 = vadd.f32 %v1540_v27, %v1539_v54  ;;  %v1949_v54 = vld [vmem:[#allocation10 + $0x1d0] sm:$0xff] }
 0x61b   :  { %3889 = vtanh.f32 %v5275_v6 }
 0x628   :  { %v3890_v48 = vpop.eup %3889 }
 0x629   :  { %v5278_v44 = vmul.f32 %v3890_v48, %v1538_v53  ;;  %v1945_v53 = vld [vmem:[#allocation10 + $0x1b0] sm:$0xff]  ;;  %v1940_v48 = vld [vmem:[#allocation10 + $0x188] sm:$0xff] }
 0x62b   :  { %1614 = vmatmul.mubr.f32.vlgmr.msra.gmra.mxu0 %v5278_v44  ;;  %1685 = vmatmul.mubr.f32.vlgmr.msra.gmra.mxu1 %v5278_v44 }
 0x62c   :  { %1719 = vmatpush1.msra.mxu0 %v4920_v55  ;;  %1790 = vmatpush1.msra.mxu1 %v4923_v20  ;;  %v6751_v55 = vld [vmem:[#allocation26_spill] sm:$0xff]  ;;  %v6752_v20 = vld [vmem:[#allocation27_spill] sm:$0xff] }
 0x62d   :  { %1720 = vmatprep.subr.mxu0 %v4926_v57  ;;  %1791 = vmatprep.subr.mxu1 %v4929_v61  ;;  %v6753_v57 = vld [vmem:[#allocation28_spill] sm:$0xff]  ;;  %v6754_v61 = vld [vmem:[#allocation29_spill] sm:$0xff] }
 0x62e   :  { %1721 = vmatpush1.msra.mxu0 %v4932_v0  ;;  %1792 = vmatpush1.msra.mxu1 %v4935_v62  ;;  %v6755_v0 = vld [vmem:[#allocation30_spill] sm:$0xff]  ;;  %v6756_v62 = vld [vmem:[#allocation31_spill] sm:$0xff] }
 0x62f   :  { %1722 = vmatprep.subr.mxu0 %v4938_v2  ;;  %1793 = vmatprep.subr.mxu1 %v4941_v29  ;;  %v6757_v2 = vld [vmem:[#allocation32_spill] sm:$0xff]  ;;  %v6758_v29 = vld [vmem:[#allocation33_spill] sm:$0xff] }
 0x630   :  { %1723 = vmatpush1.msra.mxu0 %v4944_v58  ;;  %1794 = vmatpush1.msra.mxu1 %v4947_v47  ;;  %v6759_v58 = vld [vmem:[#allocation34_spill] sm:$0xff]  ;;  %v6760_v47 = vld [vmem:[#allocation35_spill] sm:$0xff] }
 0x631   :  { %1724 = vmatprep.subr.mxu0 %v4950_v1  ;;  %1795 = vmatprep.subr.mxu1 %v4953_v63  ;;  %v6761_v1 = vld [vmem:[#allocation36_spill] sm:$0xff]  ;;  %v6762_v63 = vld [vmem:[#allocation37_spill] sm:$0xff] }
 0x632   :  { %1725 = vmatpush1.msra.mxu0 %v4956_v11  ;;  %1796 = vmatpush1.msra.mxu1 %v4959_v38  ;;  %v6763_v11 = vld [vmem:[#allocation38_spill] sm:$0xff]  ;;  %v6764_v38 = vld [vmem:[#allocation39_spill] sm:$0xff] }
 0x633   :  { %1726 = vmatprep.subr.mxu0 %v4962_v56  ;;  %1797 = vmatprep.subr.mxu1 %v4965_v51  ;;  %v6765_v56 = vld [vmem:[#allocation40_spill] sm:$0xff]  ;;  %v6766_v51 = vld [vmem:[#allocation41_spill] sm:$0xff] }
 0x634   :  { %1727 = vmatpush1.msra.mxu0 %v4968_v4  ;;  %1798 = vmatpush1.msra.mxu1 %v4971_v3  ;;  %v6767_v4 = vld [vmem:[#allocation42_spill] sm:$0xff]  ;;  %v6768_v3 = vld [vmem:[#allocation43_spill] sm:$0xff] }
 0x635   :  { %1728 = vmatprep.subr.mxu0 %v4974_v60  ;;  %1799 = vmatprep.subr.mxu1 %v4977_v59  ;;  %v6750_v59 = vld [vmem:[#allocation25_spill] sm:$0xff]  ;;  %v6769_v60 = vmov 0.0  }
 0x636   :  { %1729 = vmatpush1.msra.mxu0 %v5062_v15  ;;  %1800 = vmatpush1.msra.mxu1 %v5065_v16  ;;  %v1952_v15 = vld [vmem:[#allocation10 + $0x1e8] sm:$0xff]  ;;  %v1954_v16 = vld [vmem:[#allocation10 + $0x1f8] sm:$0xff] }
 0x637   :  { %1730 = vmatprep.subr.mxu0 %v5068_v17  ;;  %1801 = vmatprep.subr.mxu1 %v5071_v18  ;;  %v6770_v18 = vld [vmem:[#allocation64_spill] sm:$0xff] }
 0x638   :  { %1731 = vmatpush1.msra.mxu0 %v5074_v19  ;;  %1802 = vmatpush1.msra.mxu1 %v5077_v21 }
 0x639   :  { %1732 = vmatprep.subr.mxu0 %v5080_v22  ;;  %1803 = vmatprep.subr.mxu1 %v5083_v23 }
 0x63a   :  { %1733 = vmatpush1.msra.mxu0 %v5086_v24  ;;  %1804 = vmatpush1.msra.mxu1 %v5089_v26  ;;  %v6771_v24 = vld [vmem:[#allocation66_spill] sm:$0xff] }
 0x63b   :  { %1734 = vmatprep.subr.mxu0 %v5092_v52  ;;  %1805 = vmatprep.subr.mxu1 %v5095_v30  ;;  %v6772_v52 = vld [vmem:[#allocation65_spill] sm:$0xff] }
 0x63c   :  { %1735 = vmatpush1.msra.mxu0 %v5098_v31  ;;  %1806 = vmatpush1.msra.mxu1 %v5101_v32 }
 0x63d   :  { %1736 = vmatprep.subr.mxu0 %v5104_v33  ;;  %1807 = vmatprep.subr.mxu1 %v5107_v34  ;;  %v6773_v33 = vld [vmem:[#allocation67_spill] sm:$0xff] }
 0x63e   :  { %1737 = vmatpush1.msra.mxu0 %v5110_v35  ;;  %1808 = vmatpush1.msra.mxu1 %v5113_v36 }
 0x63f   :  { %1738 = vmatprep.subr.mxu0 %v5116_v37  ;;  %1809 = vmatprep.subr.mxu1 %v5119_v39 }
 0x640   :  { %1739 = vmatpush1.msra.mxu0 %v5122_v40  ;;  %1810 = vmatpush1.msra.mxu1 %v5125_v41 }
 0x641   :  { %1740 = vmatprep.subr.mxu0 %v5128_v42  ;;  %1811 = vmatprep.subr.mxu1 %v6750_v59  ;;  %v1942_v59 = vld [vmem:[#allocation10 + $0x198] sm:$0xff] }
 0x642   :  { %1741 = vmatpush1.msra.mxu0 %v6751_v55  ;;  %1812 = vmatpush1.msra.mxu1 %v6752_v20  ;;  %v1939_v55 = vld [vmem:[#allocation10 + $0x180] sm:$0xff]  ;;  %v1941_v20 = vld [vmem:[#allocation10 + $0x190] sm:$0xff] }
 0x643   :  { %1742 = vmatprep.subr.mxu0 %v6753_v57  ;;  %1813 = vmatprep.subr.mxu1 %v6754_v61  ;;  %v1936_v57 = vld [vmem:[#allocation10 + $0x168] sm:$0xff]  ;;  %v1938_v61 = vld [vmem:[#allocation10 + $0x178] sm:$0xff] }
 0x644   :  { %1743 = vmatpush1.msra.mxu0 %v6755_v0  ;;  %1814 = vmatpush1.msra.mxu1 %v6756_v62  ;;  %v1935_v0 = vld [vmem:[#allocation10 + $0x160] sm:$0xff]  ;;  %v1937_v62 = vld [vmem:[#allocation10 + $0x170] sm:$0xff] }
 0x645   :  { %1744 = vmatprep.subr.mxu0 %v6757_v2  ;;  %1815 = vmatprep.subr.mxu1 %v6758_v29  ;;  %v1932_v2 = vld [vmem:[#allocation10 + $0x148] sm:$0xff]  ;;  %v1934_v29 = vld [vmem:[#allocation10 + $0x158] sm:$0xff] }
 0x646   :  { %1745 = vmatpush1.msra.mxu0 %v6759_v58  ;;  %1816 = vmatpush1.msra.mxu1 %v6760_v47  ;;  %v1931_v58 = vld [vmem:[#allocation10 + $0x140] sm:$0xff]  ;;  %v1933_v47 = vld [vmem:[#allocation10 + $0x150] sm:$0xff] }
 0x647   :  { %1746 = vmatprep.subr.mxu0 %v6761_v1  ;;  %1817 = vmatprep.subr.mxu1 %v6762_v63  ;;  %v1928_v1 = vld [vmem:[#allocation10 + $0x128] sm:$0xff]  ;;  %v1930_v63 = vld [vmem:[#allocation10 + $0x138] sm:$0xff] }
 0x648   :  { %1747 = vmatpush1.msra.mxu0 %v6763_v11  ;;  %1818 = vmatpush1.msra.mxu1 %v6764_v38  ;;  %v1927_v11 = vld [vmem:[#allocation10 + $0x120] sm:$0xff]  ;;  %v1929_v38 = vld [vmem:[#allocation10 + $0x130] sm:$0xff] }
 0x649   :  { %1748 = vmatprep.subr.mxu0 %v6765_v56  ;;  %1819 = vmatprep.subr.mxu1 %v6766_v51  ;;  %v1924_v56 = vld [vmem:[#allocation10 + $0x108] sm:$0xff]  ;;  %v1926_v51 = vld [vmem:[#allocation10 + $0x118] sm:$0xff] }
 0x64a   :  { %1749 = vmatpush1.msra.mxu0 %v6767_v4  ;;  %1820 = vmatpush1.msra.mxu1 %v6768_v3  ;;  %v1923_v4 = vld [vmem:[#allocation10 + $0x100] sm:$0xff]  ;;  %v1925_v3 = vld [vmem:[#allocation10 + $0x110] sm:$0xff] }
 0x64b   :  { %1782 = vmatprep.mubr.f32.mxu0 %v6769_v60  ;;  %1853 = vmatprep.mubr.f32.mxu1 %v6769_v60 }
 0x64c   :  { %1977 = vmatprep.subr.mxu0 %v1952_v15  ;;  %2090 = vmatprep.subr.mxu1 %v1954_v16  ;;  %v1920_v15 = vld [vmem:[#allocation10 + $0xe8] sm:$0xff]  ;;  %v1922_v16 = vld [vmem:[#allocation10 + $0xf8] sm:$0xff] }
 0x6eb   :  { %v1615_v17 = vpop.f32.mrf.mxu0  ;;  %v1686_v21 = vpop.f32.mrf.mxu1 }
 0x6ec   :  { %v1691_v19 = vadd.f32 %v1615_v17, %v6770_v18  ;;  %v1693_v30 = vadd.f32 %v1686_v21, %v6772_v52  ;;  %v1919_v17 = vld [vmem:[#allocation10 + $0xe0] sm:$0xff]  ;;  %v1921_v18 = vld [vmem:[#allocation10 + $0xf0] sm:$0xff]  ;;  %v1918_v21 = vld [vmem:[#allocation10 + $0xd8] sm:$0xff] }
 0x6ed   :  { %v1617_v22 = vpop.f32.mrf.mxu0  ;;  %v1688_v32 = vpop.f32.mrf.mxu1  ;;  %v1911_v52 = vld [vmem:[#allocation10 + $0xa0] sm:$0xff] }
 0x6ee   :  { %v1695_v23 = vmul.f32 0.5, %v1691_v19  ;;  %v1692_v26 = vadd.f32 %v1617_v22, %v6771_v24  ;;  %v1694_v34 = vadd.f32 %v1688_v32, %v6773_v33  ;;  %v1916_v19 = vld [vmem:[#allocation10 + $0xc8] sm:$0xff]  ;;  %v1915_v22 = vld [vmem:[#allocation10 + $0xc0] sm:$0xff]  ;;  %v1910_v32 = vld [vmem:[#allocation10 + $0x98] sm:$0xff] }
 0x6ef   :  { %v1912_v24 = vld [vmem:[#allocation10 + $0xa8] sm:$0xff]  ;;  %v1907_v33 = vld [vmem:[#allocation10 + $0x80] sm:$0xff] }
 0x6f0   :  { %3891 = vtanh.f32 %v1695_v23  ;;  %v1699_v31 = vmul.f32 0.5, %v1692_v26  ;;  %v1704_v35 = vmul.f32 0.5, %v1694_v34  ;;  %v1917_v23 = vld [vmem:[#allocation10 + $0xd0] sm:$0xff]  ;;  %v1914_v26 = vld [vmem:[#allocation10 + $0xb8] sm:$0xff] }
 0x6f1   :  { %v1909_v34 = vld [vmem:[#allocation10 + $0x90] sm:$0xff] }
 0x6f2   :  { %3893 = vtanh.f32 %v1699_v31  ;;  %v1908_v31 = vld [vmem:[#allocation10 + $0x88] sm:$0xff] }
 0x6f3   :  { %3895 = vtanh.f32 %v1693_v30  ;;  %v1913_v30 = vld [vmem:[#allocation10 + $0xb0] sm:$0xff] }
 0x6f4   :  { %3897 = vtanh.f32 %v1704_v35  ;;  %v1904_v35 = vld [vmem:[#allocation10 + $0x68] sm:$0xff] }
 0x6fd   :  { %v3892_v36 = vpop.eup %3891 }
 0x6fe   :  { %v1697_v37 = vadd.f32 1.0, %v3892_v36  ;;  %v1906_v36 = vld [vmem:[#allocation10 + $0x78] sm:$0xff] }
 0x6ff   :  { %v3894_v39 = vpop.eup %3893 }
 0x700   :  { %v1698_v40 = vmul.f32 0.5, %v1697_v37  ;;  %v1701_v41 = vadd.f32 1.0, %v3894_v39  ;;  %v3896_v42 = vpop.eup %3895  ;;  %v1903_v37 = vld [vmem:[#allocation10 + $0x60] sm:$0xff]  ;;  %v1905_v39 = vld [vmem:[#allocation10 + $0x70] sm:$0xff] }
 0x701   :  { %v3898_v43 = vpop.eup %3897 }
 0x702   :  { %v1702_v5 = vmul.f32 0.5, %v1701_v41  ;;  %v1709_v27 = vmul.f32 %v3896_v42, %v1698_v40  ;;  %v1706_v14 = vadd.f32 1.0, %v3898_v43  ;;  %v1900_v40 = vld [vmem:[#allocation10 + $0x48] sm:$0xff]  ;;  %v1902_v41 = vld [vmem:[#allocation10 + $0x58] sm:$0xff]  ;;  %v1899_v42 = vld [vmem:[#allocation10 + $0x40] sm:$0xff] }
 0x703   :  { %v1895_v43 = vld [vmem:[#allocation10 + $0x20] sm:$0xff] }
 0x704   :  { %v1708_v28 = vmul.f32 %v1702_v5, %v5275_v6  ;;  %v1707_v49 = vmul.f32 0.5, %v1706_v14  ;;  %v1944_v6 = vld [vmem:[#allocation10 + $0x1a8] sm:$0xff]  ;;  %v1901_v5 = vld [vmem:[#allocation10 + $0x50] sm:$0xff] }
 0x705   :  { %v1897_v14 = vld [vmem:[#allocation10 + $0x30] sm:$0xff] }
 0x706   :  { %v5351_v8 = vadd.f32 %v1709_v27, %v1708_v28  ;;  %v1896_v27 = vld [vmem:[#allocation10 + $0x28] sm:$0xff]  ;;  %v1898_v28 = vld [vmem:[#allocation10 + $0x38] sm:$0xff] }
 0x708   :  { %3899 = vtanh.f32 %v5351_v8 }
 0x715   :  { %v3900_v50 = vpop.eup %3899 }
 0x716   :  { %v5354_v25 = vmul.f32 %v3900_v50, %v1707_v49  ;;  %v1892_v49 = vld [vmem:[#allocation10 + $0x8] sm:$0xff]  ;;  %v1894_v50 = vld [vmem:[#allocation10 + $0x18] sm:$0xff] }
 0x718   :  { %1783 = vmatmul.mubr.f32.vlgmr.msra.gmra.mxu0 %v5354_v25  ;;  %1854 = vmatmul.mubr.f32.vlgmr.msra.gmra.mxu1 %v5354_v25 }
 0x719   :  { %1978 = vmatpush1.msra.mxu0 %v1951_v9  ;;  %2091 = vmatpush1.msra.mxu1 %v1953_v12  ;;  %v1891_v9 = vld [vmem:[#allocation10] sm:$0xff]  ;;  %v1893_v12 = vld [vmem:[#allocation10 + $0x10] sm:$0xff] }
 0x71a   :  { %1979 = vmatprep.subr.mxu0 %v1948_v13  ;;  %2092 = vmatprep.subr.mxu1 %v1950_v10  ;;  %v6774_v13 = vld [vmem:[#allocation72_spill] sm:$0xff]  ;;  %v6775_v10 = vld [vmem:[#allocation23_spill] sm:$0xff] }
 0x71b   :  { %1980 = vmatpush1.msra.mxu0 %v1947_v7  ;;  %2093 = vmatpush1.msra.mxu1 %v1949_v54  ;;  %v6776_v7 = vld [vmem:[#allocation24_spill] sm:$0xff]  ;;  %v6777_v54 = vld [vmem:[#allocation47_spill] sm:$0xff] }
 0x71c   :  { %1981 = vmatprep.subr.mxu0 %v1944_v6  ;;  %2094 = vmatprep.subr.mxu1 %v1946_v45  ;;  %v6778_v6 = vld [vmem:[#allocation21_spill] sm:$0xff] }
 0x71d   :  { %1982 = vmatpush1.msra.mxu0 %v1943_v46  ;;  %2095 = vmatpush1.msra.mxu1 %v1945_v53  ;;  %v5388_v45 = vld [vmem:[#allocation12 + $0x1e8] sm:$0xff]  ;;  %v5390_v46 = vld [vmem:[#allocation12 + $0x1f8] sm:$0xff]  ;;  %v5396_v53 = vld [vmem:[#allocation12 + $0x1f0] sm:$0xff] }
 0x71e   :  { %1983 = vmatprep.subr.mxu0 %v1940_v48  ;;  %2096 = vmatprep.subr.mxu1 %v1942_v59  ;;  %6779 = vst [vmem:[#allocation22_spill] sm:$0xff] %v5388_v45  ;;  %6780 = vst [vmem:[#allocation48_spill] sm:$0xff] %v5390_v46  ;;  %v5402_v48 = vld [vmem:[#allocation12 + $0x1d8] sm:$0xff]  ;;  %v5406_v59 = vld [vmem:[#allocation12 + $0x1c0] sm:$0xff] }
 0x71f   :  { %1984 = vmatpush1.msra.mxu0 %v1939_v55  ;;  %2097 = vmatpush1.msra.mxu1 %v1941_v20  ;;  %v5408_v55 = vld [vmem:[#allocation12 + $0x1d0] sm:$0xff]  ;;  %v5412_v20 = vld [vmem:[#allocation12 + $0x1a8] sm:$0xff] }
 0x720   :  { %1985 = vmatprep.subr.mxu0 %v1936_v57  ;;  %2098 = vmatprep.subr.mxu1 %v1938_v61  ;;  %v5414_v57 = vld [vmem:[#allocation12 + $0x1b8] sm:$0xff]  ;;  %v5418_v61 = vld [vmem:[#allocation12 + $0x1a0] sm:$0xff] }
 0x721   :  { %1986 = vmatpush1.msra.mxu0 %v1935_v0  ;;  %2099 = vmatpush1.msra.mxu1 %v1937_v62  ;;  %v5420_v0 = vld [vmem:[#allocation12 + $0x1b0] sm:$0xff]  ;;  %v5424_v62 = vld [vmem:[#allocation12 + $0x188] sm:$0xff] }
 0x722   :  { %1987 = vmatprep.subr.mxu0 %v1932_v2  ;;  %2100 = vmatprep.subr.mxu1 %v1934_v29  ;;  %v5426_v2 = vld [vmem:[#allocation12 + $0x198] sm:$0xff]  ;;  %v5430_v29 = vld [vmem:[#allocation12 + $0x180] sm:$0xff] }
 0x723   :  { %1988 = vmatpush1.msra.mxu0 %v1931_v58  ;;  %2101 = vmatpush1.msra.mxu1 %v1933_v47  ;;  %v5432_v58 = vld [vmem:[#allocation12 + $0x190] sm:$0xff]  ;;  %v5436_v47 = vld [vmem:[#allocation12 + $0x168] sm:$0xff] }
 0x724   :  { %1989 = vmatprep.subr.mxu0 %v1928_v1  ;;  %2102 = vmatprep.subr.mxu1 %v1930_v63  ;;  %v5438_v1 = vld [vmem:[#allocation12 + $0x178] sm:$0xff]  ;;  %v5442_v63 = vld [vmem:[#allocation12 + $0x160] sm:$0xff] }
 0x725   :  { %1990 = vmatpush1.msra.mxu0 %v1927_v11  ;;  %2103 = vmatpush1.msra.mxu1 %v1929_v38  ;;  %v5444_v11 = vld [vmem:[#allocation12 + $0x170] sm:$0xff]  ;;  %v5448_v38 = vld [vmem:[#allocation12 + $0x148] sm:$0xff] }
 0x726   :  { %1991 = vmatprep.subr.mxu0 %v1924_v56  ;;  %2104 = vmatprep.subr.mxu1 %v1926_v51  ;;  %v5450_v56 = vld [vmem:[#allocation12 + $0x158] sm:$0xff]  ;;  %v5454_v51 = vld [vmem:[#allocation12 + $0x140] sm:$0xff] }
 0x727   :  { %1992 = vmatpush1.msra.mxu0 %v1923_v4  ;;  %2105 = vmatpush1.msra.mxu1 %v1925_v3  ;;  %v5456_v4 = vld [vmem:[#allocation12 + $0x150] sm:$0xff]  ;;  %v5458_v3 = vld [vmem:[#allocation12 + $0x128] sm:$0xff] }
 0x728   :  { %1993 = vmatprep.subr.mxu0 %v1920_v15  ;;  %2106 = vmatprep.subr.mxu1 %v1922_v16  ;;  %v5462_v15 = vld [vmem:[#allocation12 + $0x138] sm:$0xff]  ;;  %v5464_v16 = vld [vmem:[#allocation12 + $0x120] sm:$0xff] }
 0x729   :  { %1994 = vmatpush1.msra.mxu0 %v1919_v17  ;;  %2107 = vmatpush1.msra.mxu1 %v1921_v18  ;;  %v5466_v17 = vld [vmem:[#allocation12 + $0x130] sm:$0xff]  ;;  %v5472_v18 = vld [vmem:[#allocation12 + $0x108] sm:$0xff] }
 0x72a   :  { %1995 = vmatprep.subr.mxu0 %v1916_v19  ;;  %2108 = vmatprep.subr.mxu1 %v1918_v21  ;;  %v5474_v19 = vld [vmem:[#allocation12 + $0x118] sm:$0xff]  ;;  %v5478_v21 = vld [vmem:[#allocation12 + $0x100] sm:$0xff] }
 0x72b   :  { %1996 = vmatpush1.msra.mxu0 %v1915_v22  ;;  %2109 = vmatpush1.msra.mxu1 %v1917_v23  ;;  %v5480_v22 = vld [vmem:[#allocation12 + $0x110] sm:$0xff]  ;;  %v5484_v23 = vld [vmem:[#allocation12 + $0xe8] sm:$0xff] }
 0x72c   :  { %1997 = vmatprep.subr.mxu0 %v1912_v24  ;;  %2110 = vmatprep.subr.mxu1 %v1914_v26  ;;  %v5486_v24 = vld [vmem:[#allocation12 + $0xf8] sm:$0xff]  ;;  %v5490_v26 = vld [vmem:[#allocation12 + $0xe0] sm:$0xff] }
 0x72d   :  { %1998 = vmatpush1.msra.mxu0 %v1911_v52  ;;  %2111 = vmatpush1.msra.mxu1 %v1913_v30  ;;  %v5492_v52 = vld [vmem:[#allocation12 + $0xf0] sm:$0xff]  ;;  %v5496_v30 = vld [vmem:[#allocation12 + $0xc8] sm:$0xff] }
 0x72e   :  { %1999 = vmatprep.subr.mxu0 %v1908_v31  ;;  %2112 = vmatprep.subr.mxu1 %v1910_v32  ;;  %v5498_v31 = vld [vmem:[#allocation12 + $0xd8] sm:$0xff]  ;;  %v5502_v32 = vld [vmem:[#allocation12 + $0xc0] sm:$0xff] }
 0x72f   :  { %2000 = vmatpush1.msra.mxu0 %v1907_v33  ;;  %2113 = vmatpush1.msra.mxu1 %v1909_v34  ;;  %v5504_v33 = vld [vmem:[#allocation12 + $0xd0] sm:$0xff]  ;;  %v5508_v34 = vld [vmem:[#allocation12 + $0xa8] sm:$0xff] }
 0x730   :  { %2001 = vmatprep.subr.mxu0 %v1904_v35  ;;  %2114 = vmatprep.subr.mxu1 %v1906_v36  ;;  %v5510_v35 = vld [vmem:[#allocation12 + $0xb8] sm:$0xff]  ;;  %v5514_v36 = vld [vmem:[#allocation12 + $0xa0] sm:$0xff] }
 0x731   :  { %2002 = vmatpush1.msra.mxu0 %v1903_v37  ;;  %2115 = vmatpush1.msra.mxu1 %v1905_v39  ;;  %v5516_v37 = vld [vmem:[#allocation12 + $0xb0] sm:$0xff]  ;;  %v5520_v39 = vld [vmem:[#allocation12 + $0x88] sm:$0xff] }
 0x732   :  { %2003 = vmatprep.subr.mxu0 %v1900_v40  ;;  %2116 = vmatprep.subr.mxu1 %v1902_v41  ;;  %6781 = vst [vmem:[#allocation50_spill] sm:$0xff] %v5516_v37  ;;  %6782 = vst [vmem:[#allocation49_spill] sm:$0xff] %v5520_v39  ;;  %v5522_v40 = vld [vmem:[#allocation12 + $0x98] sm:$0xff]  ;;  %v5526_v41 = vld [vmem:[#allocation12 + $0x80] sm:$0xff] }
 0x733   :  { %2004 = vmatpush1.msra.mxu0 %v1899_v42  ;;  %2117 = vmatpush1.msra.mxu1 %v1901_v5  ;;  %6783 = vst [vmem:[#allocation51_spill] sm:$0xff] %v5522_v40  ;;  %6784 = vst [vmem:[#allocation52_spill] sm:$0xff] %v5526_v41  ;;  %v5528_v42 = vld [vmem:[#allocation12 + $0x90] sm:$0xff]  ;;  %v5532_v5 = vld [vmem:[#allocation12 + $0x68] sm:$0xff] }
 0x734   :  { %2005 = vmatprep.subr.mxu0 %v1896_v27  ;;  %2118 = vmatprep.subr.mxu1 %v1898_v28  ;;  %6785 = vst [vmem:[#allocation54_spill] sm:$0xff] %v5528_v42  ;;  %6786 = vst [vmem:[#allocation53_spill] sm:$0xff] %v5532_v5  ;;  %v5534_v27 = vld [vmem:[#allocation12 + $0x78] sm:$0xff]  ;;  %v5538_v28 = vld [vmem:[#allocation12 + $0x60] sm:$0xff] }
 0x735   :  { %2006 = vmatpush1.msra.mxu0 %v1895_v43  ;;  %2119 = vmatpush1.msra.mxu1 %v1897_v14  ;;  %6787 = vst [vmem:[#allocation55_spill] sm:$0xff] %v5534_v27  ;;  %6788 = vst [vmem:[#allocation56_spill] sm:$0xff] %v5538_v28  ;;  %v5540_v43 = vld [vmem:[#allocation12 + $0x70] sm:$0xff]  ;;  %v5544_v14 = vld [vmem:[#allocation12 + $0x48] sm:$0xff] }
 0x736   :  { %2007 = vmatprep.subr.mxu0 %v1892_v49  ;;  %2120 = vmatprep.subr.mxu1 %v1894_v50  ;;  %6789 = vst [vmem:[#allocation58_spill] sm:$0xff] %v5540_v43  ;;  %6790 = vst [vmem:[#allocation57_spill] sm:$0xff] %v5544_v14  ;;  %v5546_v49 = vld [vmem:[#allocation12 + $0x58] sm:$0xff]  ;;  %v5550_v50 = vld [vmem:[#allocation12 + $0x40] sm:$0xff] }
 0x737   :  { %2008 = vmatpush1.msra.mxu0 %v1891_v9  ;;  %2041 = vmatprep.mubr.f32.mxu0 %v6769_v60  ;;  %6791 = vst [vmem:[#allocation59_spill] sm:$0xff] %v5546_v49  ;;  %6792 = vst [vmem:[#allocation46_spill] sm:$0xff] %v5550_v50  ;;  %v5552_v9 = vld [vmem:[#allocation12 + $0x50] sm:$0xff] }
 0x738   :  { %2121 = vmatpush1.msra.mxu1 %v1893_v12  ;;  %2154 = vmatprep.mubr.f32.mxu1 %v6769_v60  ;;  %6793 = vst [vmem:[#allocation45_spill] sm:$0xff] %v5552_v9  ;;  %v5556_v12 = vld [vmem:[#allocation12 + $0x28] sm:$0xff] }
 0x739   :  { %2042 = vmatmul.mubr.f32.vlgmr.msra.gmra.mxu0 %v6774_v13  ;;  %2155 = vmatmul.mubr.f32.vlgmr.msra.gmra.mxu1 %v6774_v13  ;;  %6794 = vst [vmem:[#allocation60_spill] sm:$0xff] %v5556_v12  ;;  %v5558_v13 = vld [vmem:[#allocation12 + $0x38] sm:$0xff] }
 0x73a   :  { %2047 = vmatprep.mubr.f32.mxu0 %v6769_v60  ;;  %2160 = vmatprep.mubr.f32.mxu1 %v6769_v60  ;;  %6795 = vst [vmem:[#allocation62_spill] sm:$0xff] %v5558_v13 }
 0x73b   :  { %2303 = vmatprep.subr.mxu0 %v5388_v45  ;;  %2374 = vmatprep.subr.mxu1 %v5390_v46 }
 0x73c   :  { %2375 = vmatpush1.msra.mxu1 %v5396_v53 }
 0x73d   :  { %2048 = vmatmul.mubr.f32.gmra.mxu0 %v6775_v10  ;;  %2161 = vmatmul.mubr.f32.gmra.mxu1 %v6775_v10  ;;  %v5562_v10 = vld [vmem:[#allocation12 + $0x20] sm:$0xff] }
 0x73e   :  { %2053 = vmatprep.mubr.f32.mxu0 %v6769_v60  ;;  %2166 = vmatprep.mubr.f32.mxu1 %v6769_v60  ;;  %6796 = vst [vmem:[#allocation61_spill] sm:$0xff] %v5562_v10 }
 0x73f   :  { %2376 = vmatprep.subr.mxu1 %v5402_v48 }
 0x740   :  { %2377 = vmatpush1.msra.mxu1 %v5408_v55 }
 0x741   :  { %2054 = vmatmul.mubr.f32.gmra.mxu0 %v6776_v7  ;;  %2167 = vmatmul.mubr.f32.gmra.mxu1 %v6776_v7  ;;  %v5564_v7 = vld [vmem:[#allocation12 + $0x30] sm:$0xff] }
 0x742   :  { %2059 = vmatprep.mubr.f32.mxu0 %v6769_v60  ;;  %2172 = vmatprep.mubr.f32.mxu1 %v6769_v60  ;;  %6797 = vst [vmem:[#allocation63_spill] sm:$0xff] %v5564_v7 }
 0x743   :  { %2378 = vmatprep.subr.mxu1 %v5414_v57 }
 0x744   :  { %2379 = vmatpush1.msra.mxu1 %v5420_v0 }
 0x745   :  { %2060 = vmatmul.mubr.f32.gmra.mxu0 %v6777_v54  ;;  %2173 = vmatmul.mubr.f32.gmra.mxu1 %v6777_v54  ;;  %v5568_v54 = vld [vmem:[#allocation12 + $0x8] sm:$0xff] }
 0x746   :  { %2065 = vmatprep.mubr.f32.mxu0 %v6769_v60  ;;  %2178 = vmatprep.mubr.f32.mxu1 %v6769_v60  ;;  %6798 = vst [vmem:[#allocation25_spill] sm:$0xff] %v5568_v54 }
 0x747   :  { %2380 = vmatprep.subr.mxu1 %v5426_v2 }
 0x748   :  { %2381 = vmatpush1.msra.mxu1 %v5432_v58 }
 0x749   :  { %2066 = vmatmul.mubr.f32.gmra.mxu0 %v6778_v6  ;;  %2179 = vmatmul.mubr.f32.gmra.mxu1 %v6778_v6  ;;  %v5570_v6 = vld [vmem:[#allocation12 + $0x18] sm:$0xff] }
 0x74a   :  { %2071 = vmatprep.mubr.f32.mxu0 %v6769_v60  ;;  %2184 = vmatprep.mubr.f32.mxu1 %v6769_v60  ;;  %6799 = vst [vmem:[#allocation26_spill] sm:$0xff] %v5570_v6 }
 0x74b   :  { %2382 = vmatprep.subr.mxu1 %v5438_v1 }
 0x74c   :  { %2383 = vmatpush1.msra.mxu1 %v5444_v11 }
 0x74d   :  { %2072 = vmatmul.mubr.f32.gmra.mxu0 %v5278_v44  ;;  %2185 = vmatmul.mubr.f32.gmra.mxu1 %v5278_v44  ;;  %v5394_v44 = vld [vmem:[#allocation12 + $0x1e0] sm:$0xff] }
 0x74e   :  { %2077 = vmatprep.mubr.f32.mxu0 %v6769_v60  ;;  %2190 = vmatprep.mubr.f32.mxu1 %v6769_v60 }
 0x74f   :  { %2304 = vmatpush1.msra.mxu0 %v5394_v44  ;;  %2384 = vmatprep.subr.mxu1 %v5450_v56 }
 0x750   :  { %2385 = vmatpush1.msra.mxu1 %v5456_v4 }
 0x751   :  { %2078 = vmatmul.mubr.f32.gmra.mxu0 %v5354_v25  ;;  %2191 = vmatmul.mubr.f32.gmra.mxu1 %v5354_v25  ;;  %v5400_v25 = vld [vmem:[#allocation12 + $0x1c8] sm:$0xff] }
 0x752   :  { %2083 = vmatprep.mubr.f32.mxu0 %v6769_v60  ;;  %2196 = vmatprep.mubr.f32.mxu1 %v6769_v60 }
 0x753   :  { %2305 = vmatprep.subr.mxu0 %v5400_v25  ;;  %2386 = vmatprep.subr.mxu1 %v5462_v15 }
 0x754   :  { %2306 = vmatpush1.msra.mxu0 %v5406_v59  ;;  %2387 = vmatpush1.msra.mxu1 %v5466_v17 }
 0x755   :  { %2307 = vmatprep.subr.mxu0 %v5412_v20  ;;  %2388 = vmatprep.subr.mxu1 %v5474_v19 }
 0x756   :  { %2308 = vmatpush1.msra.mxu0 %v5418_v61  ;;  %2389 = vmatpush1.msra.mxu1 %v5480_v22 }
 0x757   :  { %2309 = vmatprep.subr.mxu0 %v5424_v62  ;;  %2390 = vmatprep.subr.mxu1 %v5486_v24 }
 0x758   :  { %2310 = vmatpush1.msra.mxu0 %v5430_v29  ;;  %2391 = vmatpush1.msra.mxu1 %v5492_v52 }
 0x759   :  { %2311 = vmatprep.subr.mxu0 %v5436_v47  ;;  %2392 = vmatprep.subr.mxu1 %v5498_v31 }
 0x75a   :  { %2312 = vmatpush1.msra.mxu0 %v5442_v63  ;;  %2393 = vmatpush1.msra.mxu1 %v5504_v33 }
 0x75b   :  { %2313 = vmatprep.subr.mxu0 %v5448_v38  ;;  %2394 = vmatprep.subr.mxu1 %v5510_v35 }
 0x75c   :  { %2314 = vmatpush1.msra.mxu0 %v5454_v51  ;;  %2395 = vmatpush1.msra.mxu1 %v5516_v37 }
 0x75d   :  { %2315 = vmatprep.subr.mxu0 %v5458_v3  ;;  %2396 = vmatprep.subr.mxu1 %v5522_v40 }
 0x75e   :  { %2316 = vmatpush1.msra.mxu0 %v5464_v16  ;;  %2397 = vmatpush1.msra.mxu1 %v5528_v42 }
 0x75f   :  { %2317 = vmatprep.subr.mxu0 %v5472_v18  ;;  %2398 = vmatprep.subr.mxu1 %v5534_v27 }
 0x760   :  { %2318 = vmatpush1.msra.mxu0 %v5478_v21  ;;  %2399 = vmatpush1.msra.mxu1 %v5540_v43  ;;  %v6804_v43 = vld [vmem:[#allocation69_spill] sm:$0xff] }
 0x761   :  { %2319 = vmatprep.subr.mxu0 %v5484_v23  ;;  %2400 = vmatprep.subr.mxu1 %v5546_v49 }
 0x762   :  { %2320 = vmatpush1.msra.mxu0 %v5490_v26  ;;  %2401 = vmatpush1.msra.mxu1 %v5552_v9  ;;  %v5574_v9 = vld [vmem:[#allocation12] sm:$0xff] }
 0x763   :  { %2321 = vmatprep.subr.mxu0 %v5496_v30  ;;  %2402 = vmatprep.subr.mxu1 %v5558_v13  ;;  %6800 = vst [vmem:[#allocation27_spill] sm:$0xff] %v5574_v9 }
 0x764   :  { %2322 = vmatpush1.msra.mxu0 %v5502_v32  ;;  %2403 = vmatpush1.msra.mxu1 %v5564_v7 }
 0x765   :  { %2323 = vmatprep.subr.mxu0 %v5508_v34  ;;  %2404 = vmatprep.subr.mxu1 %v5570_v6 }
 0x766   :  { %2324 = vmatpush1.msra.mxu0 %v5514_v36 }
 0x767   :  { %2325 = vmatprep.subr.mxu0 %v5520_v39 }
 0x768   :  { %2326 = vmatpush1.msra.mxu0 %v5526_v41 }
 0x769   :  { %2327 = vmatprep.subr.mxu0 %v5532_v5 }
 0x76a   :  { %2328 = vmatpush1.msra.mxu0 %v5538_v28 }
 0x76b   :  { %2329 = vmatprep.subr.mxu0 %v5544_v14  ;;  %v6803_v14 = vld [vmem:[#allocation70_spill] sm:$0xff] }
 0x76c   :  { %2330 = vmatpush1.msra.mxu0 %v5550_v50 }
 0x76d   :  { %2331 = vmatprep.subr.mxu0 %v5556_v12  ;;  %v5576_v12 = vld [vmem:[#allocation12 + $0x10] sm:$0xff] }
 0x76e   :  { %2332 = vmatpush1.msra.mxu0 %v5562_v10  ;;  %6801 = vst [vmem:[#allocation28_spill] sm:$0xff] %v5576_v12  ;;  %2405 = vmatpush1.msra.mxu1 %v5576_v12  ;;  %v6802_v10 = vld [vmem:[#allocation68_spill] sm:$0xff]  ;;  %v6805_v12 = vld [vmem:[#allocation71_spill] sm:$0xff] }
 0x76f   :  { %2333 = vmatprep.subr.mxu0 %v5568_v54  ;;  %2542 = vmatprep.subr.mxu1 %v5390_v46 }
 0x770   :  { %2334 = vmatpush1.msra.mxu0 %v5574_v9 }
 0x771   :  { %2471 = vmatprep.subr.mxu0 %v5388_v45 }
 0x7d8   :  { %v1784_v7 = vpop.f32.mrf.mxu0  ;;  %v1855_v50 = vpop.f32.mrf.mxu1 }
 0x7d9   :  { %v1860_v13 = vadd.f32 %v1784_v7, %v6802_v10  ;;  %v1862_v28 = vadd.f32 %v1855_v50, %v6804_v43 }
 0x7da   :  { %v1786_v49 = vpop.f32.mrf.mxu0  ;;  %v1857_v9 = vpop.f32.mrf.mxu1 }
 0x7db   :  { %v1864_v54 = vmul.f32 0.5, %v1860_v13  ;;  %v1861_v6 = vadd.f32 %v1786_v49, %v6803_v14  ;;  %v1863_v5 = vadd.f32 %v1857_v9, %v6805_v12  ;;  %v6814_v9 = vld [vmem:[#allocation57_spill] sm:$0xff]  ;;  %v6815_v12 = vld [vmem:[#allocation59_spill] sm:$0xff] }
 0x7dd   :  { %3901 = vtanh.f32 %v1864_v54  ;;  %v1868_v27 = vmul.f32 0.5, %v1861_v6  ;;  %v1873_v45 = vmul.f32 0.5, %v1863_v5  ;;  %v6813_v5 = vld [vmem:[#allocation58_spill] sm:$0xff] }
 0x7de   :  { %v6816_v6 = vld [vmem:[#allocation46_spill] sm:$0xff] }
 0x7df   :  { %3903 = vtanh.f32 %v1868_v27 }
 0x7e0   :  { %3905 = vtanh.f32 %v1862_v28 }
 0x7e1   :  { %3907 = vtanh.f32 %v1873_v45  ;;  %v6807_v45 = vld [vmem:[#allocation51_spill] sm:$0xff] }
 0x7ea   :  { %v3902_v42 = vpop.eup %3901 }
 0x7eb   :  { %v1866_v46 = vadd.f32 1.0, %v3902_v42  ;;  %v6812_v42 = vld [vmem:[#allocation56_spill] sm:$0xff] }
 0x7ec   :  { %v3904_v41 = vpop.eup %3903 }
 0x7ed   :  { %v1867_v40 = vmul.f32 0.5, %v1866_v46  ;;  %v1870_v10 = vadd.f32 1.0, %v3904_v41  ;;  %v3906_v7 = vpop.eup %3905  ;;  %v6808_v46 = vld [vmem:[#allocation52_spill] sm:$0xff]  ;;  %v6811_v41 = vld [vmem:[#allocation55_spill] sm:$0xff] }
 0x7ee   :  { %v3908_v43 = vpop.eup %3907 }
 0x7ef   :  { %v1871_v13 = vmul.f32 0.5, %v1870_v10  ;;  %v1878_v39 = vmul.f32 %v3906_v7, %v1867_v40  ;;  %v1875_v27 = vadd.f32 1.0, %v3908_v43  ;;  %v6810_v40 = vld [vmem:[#allocation53_spill] sm:$0xff]  ;;  %v6818_v7 = vld [vmem:[#allocation60_spill] sm:$0xff] }
 0x7f0   :  { %v6817_v10 = vld [vmem:[#allocation45_spill] sm:$0xff] }
 0x7f1   :  { %v1877_v14 = vmul.f32 %v1871_v13, %v5351_v8  ;;  %v1876_v28 = vmul.f32 0.5, %v1875_v27  ;;  %v6806_v8 = vld [vmem:[#allocation49_spill] sm:$0xff]  ;;  %v6819_v13 = vld [vmem:[#allocation62_spill] sm:$0xff] }
 0x7f2   :  { %v6822_v43 = vld [vmem:[#allocation25_spill] sm:$0xff]  ;;  %v6823_v27 = vld [vmem:[#allocation26_spill] sm:$0xff] }
 0x7f3   :  { %v1879_v49 = vadd.f32 %v1878_v39, %v1877_v14  ;;  %v6809_v39 = vld [vmem:[#allocation54_spill] sm:$0xff]  ;;  %v6820_v14 = vld [vmem:[#allocation61_spill] sm:$0xff] }
 0x7f5   :  { %3909 = vtanh.f32 %v1879_v49  ;;  %v6821_v49 = vld [vmem:[#allocation63_spill] sm:$0xff] }
 0x802   :  { %v3910_v50 = vpop.eup %3909 }
 0x803   :  { %v1881_v54 = vmul.f32 %v3910_v50, %v1876_v28  ;;  %v6824_v28 = vld [vmem:[#allocation27_spill] sm:$0xff]  ;;  %v6825_v50 = vld [vmem:[#allocation28_spill] sm:$0xff] }
 0x805   :  { %2084 = vmatmul.mubr.f32.gmra.mxu0 %v1881_v54  ;;  %2197 = vmatmul.mubr.f32.gmra.mxu1 %v1881_v54  ;;  %v6826_v54 = vld [vmem:[#allocation22_spill] sm:$0xff] }
 0x806   :  { %2367 = vmatprep.mubr.f32.mxu0 %v6769_v60  ;;  %2438 = vmatprep.mubr.f32.mxu1 %v6769_v60 }
 0x809   :  { %2368 = vmatmul.mubr.f32.vlgmr.msra.gmra.mxu0 %v6769_v60  ;;  %2439 = vmatmul.mubr.f32.vlgmr.msra.gmra.mxu1 %v6769_v60 }
 0x80a   :  { %2472 = vmatpush1.msra.mxu0 %v5394_v44  ;;  %2543 = vmatpush1.msra.mxu1 %v5396_v53 }
 0x80b   :  { %2473 = vmatprep.subr.mxu0 %v5400_v25  ;;  %2544 = vmatprep.subr.mxu1 %v5402_v48 }
 0x80c   :  { %2474 = vmatpush1.msra.mxu0 %v5406_v59  ;;  %2545 = vmatpush1.msra.mxu1 %v5408_v55 }
 0x80d   :  { %2475 = vmatprep.subr.mxu0 %v5412_v20  ;;  %2546 = vmatprep.subr.mxu1 %v5414_v57 }
 0x80e   :  { %2476 = vmatpush1.msra.mxu0 %v5418_v61  ;;  %2547 = vmatpush1.msra.mxu1 %v5420_v0 }
 0x80f   :  { %2477 = vmatprep.subr.mxu0 %v5424_v62  ;;  %2548 = vmatprep.subr.mxu1 %v5426_v2 }
 0x810   :  { %2478 = vmatpush1.msra.mxu0 %v5430_v29  ;;  %2549 = vmatpush1.msra.mxu1 %v5432_v58 }
 0x811   :  { %2479 = vmatprep.subr.mxu0 %v5436_v47  ;;  %2550 = vmatprep.subr.mxu1 %v5438_v1 }
 0x812   :  { %2480 = vmatpush1.msra.mxu0 %v5442_v63  ;;  %2551 = vmatpush1.msra.mxu1 %v5444_v11 }
 0x813   :  { %2481 = vmatprep.subr.mxu0 %v5448_v38  ;;  %2552 = vmatprep.subr.mxu1 %v5450_v56 }
 0x814   :  { %2482 = vmatpush1.msra.mxu0 %v5454_v51  ;;  %2553 = vmatpush1.msra.mxu1 %v5456_v4 }
 0x815   :  { %2483 = vmatprep.subr.mxu0 %v5458_v3  ;;  %2554 = vmatprep.subr.mxu1 %v5462_v15 }
 0x816   :  { %2484 = vmatpush1.msra.mxu0 %v5464_v16  ;;  %2555 = vmatpush1.msra.mxu1 %v5466_v17 }
 0x817   :  { %2485 = vmatprep.subr.mxu0 %v5472_v18  ;;  %2556 = vmatprep.subr.mxu1 %v5474_v19 }
 0x818   :  { %2486 = vmatpush1.msra.mxu0 %v5478_v21  ;;  %2557 = vmatpush1.msra.mxu1 %v5480_v22 }
 0x819   :  { %2487 = vmatprep.subr.mxu0 %v5484_v23  ;;  %2558 = vmatprep.subr.mxu1 %v5486_v24 }
 0x81a   :  { %2488 = vmatpush1.msra.mxu0 %v5490_v26  ;;  %2559 = vmatpush1.msra.mxu1 %v5492_v52 }
 0x81b   :  { %2489 = vmatprep.subr.mxu0 %v5496_v30  ;;  %2560 = vmatprep.subr.mxu1 %v5498_v31 }
 0x81c   :  { %2490 = vmatpush1.msra.mxu0 %v5502_v32  ;;  %2561 = vmatpush1.msra.mxu1 %v5504_v33 }
 0x81d   :  { %2491 = vmatprep.subr.mxu0 %v5508_v34  ;;  %2562 = vmatprep.subr.mxu1 %v5510_v35 }
 0x81e   :  { %2492 = vmatpush1.msra.mxu0 %v5514_v36  ;;  %2563 = vmatpush1.msra.mxu1 %v5516_v37 }
 0x81f   :  { %2493 = vmatprep.subr.mxu0 %v6806_v8  ;;  %2564 = vmatprep.subr.mxu1 %v6807_v45 }
 0x820   :  { %2494 = vmatpush1.msra.mxu0 %v6808_v46  ;;  %2565 = vmatpush1.msra.mxu1 %v6809_v39 }
 0x821   :  { %2495 = vmatprep.subr.mxu0 %v6810_v40  ;;  %2566 = vmatprep.subr.mxu1 %v6811_v41 }
 0x822   :  { %2496 = vmatpush1.msra.mxu0 %v6812_v42  ;;  %2567 = vmatpush1.msra.mxu1 %v6813_v5 }
 0x823   :  { %2497 = vmatprep.subr.mxu0 %v6814_v9  ;;  %2568 = vmatprep.subr.mxu1 %v6815_v12 }
 0x824   :  { %2498 = vmatpush1.msra.mxu0 %v6816_v6  ;;  %2569 = vmatpush1.msra.mxu1 %v6817_v10 }
 0x825   :  { %2499 = vmatprep.subr.mxu0 %v6818_v7  ;;  %2570 = vmatprep.subr.mxu1 %v6819_v13  ;;  %v6827_v7 = vld [vmem:[#allocation48_spill] sm:$0xff]  ;;  %v2043_v13 = vpop.f32.mrf.mxu0 }
 0x826   :  { %2500 = vmatpush1.msra.mxu0 %v6820_v14  ;;  %2571 = vmatpush1.msra.mxu1 %v6821_v49  ;;  %v2156_v14 = vpop.f32.mrf.mxu1 }
 0x827   :  { %2501 = vmatprep.subr.mxu0 %v6822_v43  ;;  %2572 = vmatprep.subr.mxu1 %v6823_v27  ;;  %v2045_v10 = vpop.f32.mrf.mxu0 }
 0x828   :  { %2502 = vmatpush1.msra.mxu0 %v6824_v28  ;;  %2535 = vmatprep.mubr.f32.mxu0 %v6769_v60  ;;  %v2158_v49 = vpop.f32.mrf.mxu1 }
 0x829   :  { %2573 = vmatpush1.msra.mxu1 %v6825_v50  ;;  %2606 = vmatprep.mubr.f32.mxu1 %v6769_v60  ;;  %v5657_v6 = vpop.f32.mrf.mxu0 }
 0x82a   :  { %2639 = vmatprep.subr.mxu0 %v6826_v54  ;;  %2710 = vmatprep.subr.mxu1 %v6827_v7  ;;  %6828 = vst [vmem:[#allocation29_spill] sm:$0xff] %v5657_v6  ;;  %v5659_v43 = vpop.f32.mrf.mxu1 }
 0x82b   :  { %6829 = vst [vmem:[#allocation30_spill] sm:$0xff] %v5659_v43  ;;  %v5661_v27 = vpop.f32.mrf.mxu0 }
 0x82c   :  { %6830 = vst [vmem:[#allocation31_spill] sm:$0xff] %v5661_v27  ;;  %v5663_v28 = vpop.f32.mrf.mxu1 }
 0x82d   :  { %6831 = vst [vmem:[#allocation32_spill] sm:$0xff] %v5663_v28  ;;  %v5665_v12 = vpop.f32.mrf.mxu0 }
 0x82e   :  { %6832 = vst [vmem:[#allocation33_spill] sm:$0xff] %v5665_v12  ;;  %v5667_v50 = vpop.f32.mrf.mxu1 }
 0x82f   :  { %6833 = vst [vmem:[#allocation34_spill] sm:$0xff] %v5667_v50  ;;  %v5669_v60 = vpop.f32.mrf.mxu0 }
 0x830   :  { %6834 = vst [vmem:[#allocation35_spill] sm:$0xff] %v5669_v60  ;;  %v5671_v54 = vpop.f32.mrf.mxu1 }
 0x831   :  { %6835 = vst [vmem:[#allocation36_spill] sm:$0xff] %v5671_v54  ;;  %v5673_v7 = vpop.f32.mrf.mxu0 }
 0x832   :  { %6836 = vst [vmem:[#allocation37_spill] sm:$0xff] %v5673_v7  ;;  %v5675_v9 = vpop.f32.mrf.mxu1 }
 0x833   :  { %6837 = vst [vmem:[#allocation38_spill] sm:$0xff] %v5675_v9  ;;  %v5677_v5 = vpop.f32.mrf.mxu0 }
 0x834   :  { %6838 = vst [vmem:[#allocation39_spill] sm:$0xff] %v5677_v5  ;;  %v5679_v6 = vpop.f32.mrf.mxu1 }
 0x835   :  { %6839 = vst [vmem:[#allocation40_spill] sm:$0xff] %v5679_v6  ;;  %v5681_v43 = vpop.f32.mrf.mxu0 }
 0x836   :  { %6840 = vst [vmem:[#allocation41_spill] sm:$0xff] %v5681_v43  ;;  %v5683_v27 = vpop.f32.mrf.mxu1 }
 0x837   :  { %6841 = vst [vmem:[#allocation42_spill] sm:$0xff] %v5683_v27  ;;  %v5685_v28 = vpop.f32.mrf.mxu0  ;;  %v1955_v27 = vld [vmem:[%s6371_s6] sm:$0xf] }
 0x838   :  { %6842 = vst [vmem:[#allocation43_spill] sm:$0xff] %v5685_v28  ;;  %v5687_v12 = vpop.f32.mrf.mxu1 }
 0x839   :  { %6843 = vst [vmem:[#allocation64_spill] sm:$0xff] %v5687_v12  ;;  %v5689_v50 = vpop.f32.mrf.mxu0  ;;  %v6852_v12 = vld [vmem:[#allocation44_spill] sm:$0xff] }
 0x83a   :  { %6844 = vst [vmem:[#allocation66_spill] sm:$0xff] %v5689_v50  ;;  %v5691_v60 = vpop.f32.mrf.mxu1  ;;  %v6853_v50 = vsub.s32 0, %v6852_v12 }
 0x83b   :  { %6845 = vst [vmem:[#allocation65_spill] sm:$0xff] %v5691_v60  ;;  %v5693_v54 = vpop.f32.mrf.mxu0 }
 0x83c   :  { %6846 = vst [vmem:[#allocation67_spill] sm:$0xff] %v5693_v54  ;;  %v5695_v7 = vpop.f32.mrf.mxu1  ;;  %v5710_v6 = vrot.slane %v1955_v27, %v6853_v50 }
 0x83d   :  { %6847 = vst [vmem:[#allocation72_spill] sm:$0xff] %v5695_v7  ;;  %v5697_v9 = vpop.f32.mrf.mxu0 }
 0x83e   :  { %6848 = vst [vmem:[#allocation23_spill] sm:$0xff] %v5697_v9  ;;  %v5699_v5 = vpop.f32.mrf.mxu1  ;;  %6854 = vst [vmem:[#allocation68_spill] sm:$0xff] %v5710_v6  ;;  %v6857_v9 = vsub.s32 1, %v6852_v12  ;;  %v2044_v42 = vadd.f32 %v2043_v13, %v5710_v6  ;;  %v6862_v13 = vsub.s32 3, %v6852_v12 }
 0x83f   :  { %6849 = vst [vmem:[#allocation24_spill] sm:$0xff] %v5699_v5  ;;  %v5704_v43 = vpop.f32.mrf.mxu0 }
 0x840   :  { %6850 = vst [vmem:[#allocation47_spill] sm:$0xff] %v5704_v43  ;;  %v5706_v28 = vpop.f32.mrf.mxu1  ;;  %v5718_v7 = vrot.slane %v1955_v27, %v6857_v9  ;;  %v5733_v6 = vrot.slane %v1955_v27, %v6862_v13  ;;  %v6865_v13 = vld [vmem:[#allocation52_spill] sm:$0xff] }
 0x841   :  { %6851 = vst [vmem:[#allocation21_spill] sm:$0xff] %v5706_v28  ;;  %v6861_v28 = vsub.s32 2, %v6852_v12 }
 0x842   :  { %6858 = vst [vmem:[#allocation71_spill] sm:$0xff] %v5718_v7  ;;  %v2046_v50 = vadd.f32 %v2045_v10, %v5718_v7 }
 0x843   :  { %v5727_v40 = vrot.slane %v1955_v27, %v6861_v28  ;;  %v2159_v28 = vadd.f32 %v2158_v49, %v5733_v6 }
 0x845   :  { %v2157_v9 = vadd.f32 %v2156_v14, %v5727_v40 }
 0x8c5   :  { %v5712_v60 = vpop.f32.mrf.mxu0  ;;  %v5714_v54 = vpop.f32.mrf.mxu1 }
 0x8c6   :  { %6855 = vst [vmem:[#allocation70_spill] sm:$0xff] %v5712_v60  ;;  %6856 = vst [vmem:[#allocation69_spill] sm:$0xff] %v5714_v54 }
 0x8c7   :  { %v5720_v5 = vpop.f32.mrf.mxu0  ;;  %v5723_v41 = vpop.f32.mrf.mxu1 }
 0x8c8   :  { %6859 = vst [vmem:[#allocation44_spill] sm:$0xff] %v5720_v5  ;;  %6860 = vst [vmem:[#allocation73_spill] sm:$0xff] %v5723_v41 }
 0x8c9   :  { %v2369_v43 = vpop.f32.mrf.mxu0  ;;  %v2440_v45 = vpop.f32.mrf.mxu1 }
 0x8ca   :  { %v2445_v60 = vadd.f32 %v2369_v43, %v2044_v42  ;;  %v2447_v41 = vadd.f32 %v2440_v45, %v2157_v9  ;;  %v6864_v9 = vld [vmem:[#allocation51_spill] sm:$0xff] }
 0x8cb   :  { %v2371_v39 = vpop.f32.mrf.mxu0  ;;  %v2442_v8 = vpop.f32.mrf.mxu1 }
 0x8cc   :  { %v2449_v54 = vmul.f32 0.5, %v2445_v60  ;;  %v2446_v46 = vadd.f32 %v2371_v39, %v2046_v50  ;;  %v2448_v10 = vadd.f32 %v2442_v8, %v2159_v28  ;;  %v6866_v28 = vld [vmem:[#allocation54_spill] sm:$0xff] }
 0x8ce   :  { %3911 = vtanh.f32 %v2449_v54  ;;  %v2453_v5 = vmul.f32 0.5, %v2446_v46  ;;  %v2458_v42 = vmul.f32 0.5, %v2448_v10  ;;  %v6867_v10 = vld [vmem:[#allocation53_spill] sm:$0xff] }
 0x8d0   :  { %3913 = vtanh.f32 %v2453_v5 }
 0x8d1   :  { %3915 = vtanh.f32 %v2447_v41 }
 0x8d2   :  { %3917 = vtanh.f32 %v2458_v42  ;;  %v6868_v42 = vld [vmem:[#allocation55_spill] sm:$0xff] }
 0x8db   :  { %v3912_v43 = vpop.eup %3911 }
 0x8dc   :  { %v2451_v60 = vadd.f32 1.0, %v3912_v43  ;;  %v6869_v43 = vld [vmem:[#allocation56_spill] sm:$0xff] }
 0x8dd   :  { %v3914_v39 = vpop.eup %3913 }
 0x8de   :  { %v2452_v50 = vmul.f32 0.5, %v2451_v60  ;;  %v2455_v7 = vadd.f32 1.0, %v3914_v39  ;;  %v3916_v46 = vpop.eup %3915  ;;  %v6870_v60 = vld [vmem:[#allocation58_spill] sm:$0xff]  ;;  %v6871_v39 = vld [vmem:[#allocation57_spill] sm:$0xff] }
 0x8df   :  { %v3918_v45 = vpop.eup %3917 }
 0x8e0   :  { %v2456_v14 = vmul.f32 0.5, %v2455_v7  ;;  %v2463_v12 = vmul.f32 %v3916_v46, %v2452_v50  ;;  %v2460_v5 = vadd.f32 1.0, %v3918_v45  ;;  %v6863_v7 = vld [vmem:[#allocation49_spill] sm:$0xff]  ;;  %v6872_v50 = vld [vmem:[#allocation59_spill] sm:$0xff] }
 0x8e1   :  { %v6874_v46 = vld [vmem:[#allocation45_spill] sm:$0xff] }
 0x8e2   :  { %v2462_v54 = vmul.f32 0.0, %v2456_v14  ;;  %v2461_v49 = vmul.f32 0.5, %v2460_v5  ;;  %v6873_v14 = vld [vmem:[#allocation46_spill] sm:$0xff]  ;;  %v6877_v45 = vld [vmem:[#allocation61_spill] sm:$0xff]  ;;  %v6878_v5 = vld [vmem:[#allocation63_spill] sm:$0xff] }
 0x8e4   :  { %v5736_v27 = vadd.f32 %v2463_v12, %v2462_v54  ;;  %v6875_v54 = vld [vmem:[#allocation60_spill] sm:$0xff]  ;;  %v6876_v12 = vld [vmem:[#allocation62_spill] sm:$0xff] }
 0x8e6   :  { %3919 = vtanh.f32 %v5736_v27 }
 0x8f3   :  { %v3920_v41 = vpop.eup %3919 }
 0x8f4   :  { %v2466_v8 = vmul.f32 %v3920_v41, %v2461_v49  ;;  %v6879_v49 = vld [vmem:[#allocation25_spill] sm:$0xff]  ;;  %v6880_v41 = vld [vmem:[#allocation26_spill] sm:$0xff] }
 0x8f6   :  { %2536 = vmatmul.mubr.f32.vlgmr.msra.gmra.mxu0 %v2466_v8  ;;  %2607 = vmatmul.mubr.f32.vlgmr.msra.gmra.mxu1 %v2466_v8  ;;  %v6881_v8 = vld [vmem:[#allocation27_spill] sm:$0xff] }
 0x8f7   :  { %2640 = vmatpush1.msra.mxu0 %v5394_v44  ;;  %2711 = vmatpush1.msra.mxu1 %v5396_v53 }
 0x8f8   :  { %2641 = vmatprep.subr.mxu0 %v5400_v25  ;;  %2712 = vmatprep.subr.mxu1 %v5402_v48 }
 0x8f9   :  { %2642 = vmatpush1.msra.mxu0 %v5406_v59  ;;  %2713 = vmatpush1.msra.mxu1 %v5408_v55 }
 0x8fa   :  { %2643 = vmatprep.subr.mxu0 %v5412_v20  ;;  %2714 = vmatprep.subr.mxu1 %v5414_v57 }
 0x8fb   :  { %2644 = vmatpush1.msra.mxu0 %v5418_v61  ;;  %2715 = vmatpush1.msra.mxu1 %v5420_v0 }
 0x8fc   :  { %2645 = vmatprep.subr.mxu0 %v5424_v62  ;;  %2716 = vmatprep.subr.mxu1 %v5426_v2 }
 0x8fd   :  { %2646 = vmatpush1.msra.mxu0 %v5430_v29  ;;  %2717 = vmatpush1.msra.mxu1 %v5432_v58 }
 0x8fe   :  { %2647 = vmatprep.subr.mxu0 %v5436_v47  ;;  %2718 = vmatprep.subr.mxu1 %v5438_v1 }
 0x8ff   :  { %2648 = vmatpush1.msra.mxu0 %v5442_v63  ;;  %2719 = vmatpush1.msra.mxu1 %v5444_v11 }
 0x900   :  { %2649 = vmatprep.subr.mxu0 %v5448_v38  ;;  %2720 = vmatprep.subr.mxu1 %v5450_v56 }
 0x901   :  { %2650 = vmatpush1.msra.mxu0 %v5454_v51  ;;  %2721 = vmatpush1.msra.mxu1 %v5456_v4 }
 0x902   :  { %2651 = vmatprep.subr.mxu0 %v5458_v3  ;;  %2722 = vmatprep.subr.mxu1 %v5462_v15 }
 0x903   :  { %2652 = vmatpush1.msra.mxu0 %v5464_v16  ;;  %2723 = vmatpush1.msra.mxu1 %v5466_v17 }
 0x904   :  { %2653 = vmatprep.subr.mxu0 %v5472_v18  ;;  %2724 = vmatprep.subr.mxu1 %v5474_v19 }
 0x905   :  { %2654 = vmatpush1.msra.mxu0 %v5478_v21  ;;  %2725 = vmatpush1.msra.mxu1 %v5480_v22 }
 0x906   :  { %2655 = vmatprep.subr.mxu0 %v5484_v23  ;;  %2726 = vmatprep.subr.mxu1 %v5486_v24 }
 0x907   :  { %2656 = vmatpush1.msra.mxu0 %v5490_v26  ;;  %2727 = vmatpush1.msra.mxu1 %v5492_v52 }
 0x908   :  { %2657 = vmatprep.subr.mxu0 %v5496_v30  ;;  %2728 = vmatprep.subr.mxu1 %v5498_v31 }
 0x909   :  { %2658 = vmatpush1.msra.mxu0 %v5502_v32  ;;  %2729 = vmatpush1.msra.mxu1 %v5504_v33 }
 0x90a   :  { %2659 = vmatprep.subr.mxu0 %v5508_v34  ;;  %2730 = vmatprep.subr.mxu1 %v5510_v35 }
 0x90b   :  { %2660 = vmatpush1.msra.mxu0 %v5514_v36  ;;  %2731 = vmatpush1.msra.mxu1 %v5516_v37 }
 0x90c   :  { %2661 = vmatprep.subr.mxu0 %v6863_v7  ;;  %2732 = vmatprep.subr.mxu1 %v6864_v9 }
 0x90d   :  { %2662 = vmatpush1.msra.mxu0 %v6865_v13  ;;  %2733 = vmatpush1.msra.mxu1 %v6866_v28 }
 0x90e   :  { %2663 = vmatprep.subr.mxu0 %v6867_v10  ;;  %2734 = vmatprep.subr.mxu1 %v6868_v42  ;;  %v6890_v10 = vld [vmem:[#allocation30_spill] sm:$0xff] }
 0x90f   :  { %2664 = vmatpush1.msra.mxu0 %v6869_v43  ;;  %2735 = vmatpush1.msra.mxu1 %v6870_v60  ;;  %v6888_v60 = vld [vmem:[#allocation71_spill] sm:$0xff]  ;;  %v2163_v28 = vadd.f32 %v6890_v10, %v5727_v40 }
 0x910   :  { %2665 = vmatprep.subr.mxu0 %v6871_v39  ;;  %2736 = vmatprep.subr.mxu1 %v6872_v50  ;;  %v6882_v39 = vmov 0.0   ;;  %v6883_v50 = vld [vmem:[#allocation28_spill] sm:$0xff] }
 0x911   :  { %2666 = vmatpush1.msra.mxu0 %v6873_v14  ;;  %2737 = vmatpush1.msra.mxu1 %v6874_v46  ;;  %v6884_v46 = vld [vmem:[#allocation22_spill] sm:$0xff] }
 0x912   :  { %2667 = vmatprep.subr.mxu0 %v6875_v54  ;;  %2738 = vmatprep.subr.mxu1 %v6876_v12  ;;  %v6885_v54 = vld [vmem:[#allocation48_spill] sm:$0xff] }
 0x913   :  { %2668 = vmatpush1.msra.mxu0 %v6877_v45  ;;  %2739 = vmatpush1.msra.mxu1 %v6878_v5  ;;  %v6886_v12 = vld [vmem:[#allocation68_spill] sm:$0xff]  ;;  %v6887_v45 = vld [vmem:[#allocation29_spill] sm:$0xff] }
 0x914   :  { %2669 = vmatprep.subr.mxu0 %v6879_v49  ;;  %2740 = vmatprep.subr.mxu1 %v6880_v41  ;;  %v2050_v14 = vadd.f32 %v6887_v45, %v6886_v12  ;;  %v6889_v49 = vld [vmem:[#allocation31_spill] sm:$0xff]  ;;  %v6891_v45 = vld [vmem:[#allocation32_spill] sm:$0xff] }
 0x915   :  { %2670 = vmatpush1.msra.mxu0 %v6881_v8  ;;  %2703 = vmatprep.mubr.f32.mxu0 %v6882_v39  ;;  %v2052_v43 = vadd.f32 %v6889_v49, %v6888_v60  ;;  %v2165_v12 = vadd.f32 %v6891_v45, %v5733_v6  ;;  %v6899_v45 = vld [vmem:[#allocation56_spill] sm:$0xff] }
 0x916   :  { %2741 = vmatpush1.msra.mxu1 %v6883_v50  ;;  %2774 = vmatprep.mubr.f32.mxu1 %v6882_v39 }
 0x917   :  { %2807 = vmatprep.subr.mxu0 %v6884_v46  ;;  %2878 = vmatprep.subr.mxu1 %v6885_v54 }
 0x9b6   :  { %v2537_v5 = vpop.f32.mrf.mxu0  ;;  %v2608_v42 = vpop.f32.mrf.mxu1 }
 0x9b7   :  { %v2613_v41 = vadd.f32 %v2537_v5, %v2050_v14  ;;  %v2615_v39 = vadd.f32 %v2608_v42, %v2163_v28 }
 0x9b8   :  { %v2539_v8 = vpop.f32.mrf.mxu0  ;;  %v2610_v54 = vpop.f32.mrf.mxu1 }
 0x9b9   :  { %v2617_v50 = vmul.f32 0.5, %v2613_v41  ;;  %v2614_v13 = vadd.f32 %v2539_v8, %v2052_v43  ;;  %v2616_v9 = vadd.f32 %v2610_v54, %v2165_v12  ;;  %v6896_v54 = vld [vmem:[#allocation54_spill] sm:$0xff]  ;;  %v6897_v12 = vld [vmem:[#allocation53_spill] sm:$0xff]  ;;  %v6898_v8 = vld [vmem:[#allocation55_spill] sm:$0xff] }
 0x9bb   :  { %3921 = vtanh.f32 %v2617_v50  ;;  %v2621_v46 = vmul.f32 0.5, %v2614_v13  ;;  %v2626_v7 = vmul.f32 0.5, %v2616_v9 }
 0x9bd   :  { %3923 = vtanh.f32 %v2621_v46 }
 0x9be   :  { %3925 = vtanh.f32 %v2615_v39 }
 0x9bf   :  { %3927 = vtanh.f32 %v2626_v7  ;;  %v6894_v7 = vld [vmem:[#allocation51_spill] sm:$0xff] }
 0x9c8   :  { %v3922_v49 = vpop.eup %3921 }
 0x9c9   :  { %v2619_v14 = vadd.f32 1.0, %v3922_v49  ;;  %v6900_v49 = vld [vmem:[#allocation58_spill] sm:$0xff] }
 0x9ca   :  { %v3924_v5 = vpop.eup %3923 }
 0x9cb   :  { %v2620_v60 = vmul.f32 0.5, %v2619_v14  ;;  %v2623_v37 = vadd.f32 1.0, %v3924_v5  ;;  %v3926_v10 = vpop.eup %3925  ;;  %v6901_v14 = vld [vmem:[#allocation57_spill] sm:$0xff]  ;;  %v6902_v5 = vld [vmem:[#allocation59_spill] sm:$0xff] }
 0x9cc   :  { %v3928_v42 = vpop.eup %3927 }
 0x9cd   :  { %v2624_v41 = vmul.f32 0.5, %v2623_v37  ;;  %v2631_v43 = vmul.f32 %v3926_v10, %v2620_v60  ;;  %v2628_v39 = vadd.f32 1.0, %v3928_v42  ;;  %v6892_v37 = vld [vmem:[#allocation50_spill] sm:$0xff]  ;;  %v6895_v60 = vld [vmem:[#allocation52_spill] sm:$0xff]  ;;  %v6907_v42 = vld [vmem:[#allocation61_spill] sm:$0xff] }
 0x9ce   :  { %v6903_v10 = vld [vmem:[#allocation46_spill] sm:$0xff] }
 0x9cf   :  { %v2630_v28 = vmul.f32 %v2624_v41, %v5736_v27  ;;  %v2629_v50 = vmul.f32 0.5, %v2628_v39  ;;  %v6893_v27 = vld [vmem:[#allocation49_spill] sm:$0xff]  ;;  %v6908_v39 = vld [vmem:[#allocation63_spill] sm:$0xff] }
 0x9d0   :  { %v6904_v41 = vld [vmem:[#allocation45_spill] sm:$0xff] }
 0x9d1   :  { %v5814_v13 = vadd.f32 %v2631_v43, %v2630_v28  ;;  %v6905_v43 = vld [vmem:[#allocation60_spill] sm:$0xff]  ;;  %v6906_v28 = vld [vmem:[#allocation62_spill] sm:$0xff] }
 0x9d3   :  { %3929 = vtanh.f32 %v5814_v13 }
 0x9e0   :  { %v3930_v46 = vpop.eup %3929 }
 0x9e1   :  { %v2634_v9 = vmul.f32 %v3930_v46, %v2629_v50  ;;  %v6909_v50 = vld [vmem:[#allocation25_spill] sm:$0xff]  ;;  %v6910_v46 = vld [vmem:[#allocation26_spill] sm:$0xff] }
 0x9e3   :  { %2704 = vmatmul.mubr.f32.vlgmr.msra.gmra.mxu0 %v2634_v9  ;;  %2775 = vmatmul.mubr.f32.vlgmr.msra.gmra.mxu1 %v2634_v9  ;;  %v6911_v9 = vld [vmem:[#allocation27_spill] sm:$0xff] }
 0x9e4   :  { %2808 = vmatpush1.msra.mxu0 %v5394_v44  ;;  %2879 = vmatpush1.msra.mxu1 %v5396_v53 }
 0x9e5   :  { %2809 = vmatprep.subr.mxu0 %v5400_v25  ;;  %2880 = vmatprep.subr.mxu1 %v5402_v48 }
 0x9e6   :  { %2810 = vmatpush1.msra.mxu0 %v5406_v59  ;;  %2881 = vmatpush1.msra.mxu1 %v5408_v55 }
 0x9e7   :  { %2811 = vmatprep.subr.mxu0 %v5412_v20  ;;  %2882 = vmatprep.subr.mxu1 %v5414_v57 }
 0x9e8   :  { %2812 = vmatpush1.msra.mxu0 %v5418_v61  ;;  %2883 = vmatpush1.msra.mxu1 %v5420_v0 }
 0x9e9   :  { %2813 = vmatprep.subr.mxu0 %v5424_v62  ;;  %2884 = vmatprep.subr.mxu1 %v5426_v2 }
 0x9ea   :  { %2814 = vmatpush1.msra.mxu0 %v5430_v29  ;;  %2885 = vmatpush1.msra.mxu1 %v5432_v58 }
 0x9eb   :  { %2815 = vmatprep.subr.mxu0 %v5436_v47  ;;  %2886 = vmatprep.subr.mxu1 %v5438_v1 }
 0x9ec   :  { %2816 = vmatpush1.msra.mxu0 %v5442_v63  ;;  %2887 = vmatpush1.msra.mxu1 %v5444_v11 }
 0x9ed   :  { %2817 = vmatprep.subr.mxu0 %v5448_v38  ;;  %2888 = vmatprep.subr.mxu1 %v5450_v56 }
 0x9ee   :  { %2818 = vmatpush1.msra.mxu0 %v5454_v51  ;;  %2889 = vmatpush1.msra.mxu1 %v5456_v4 }
 0x9ef   :  { %2819 = vmatprep.subr.mxu0 %v5458_v3  ;;  %2890 = vmatprep.subr.mxu1 %v5462_v15 }
 0x9f0   :  { %2820 = vmatpush1.msra.mxu0 %v5464_v16  ;;  %2891 = vmatpush1.msra.mxu1 %v5466_v17 }
 0x9f1   :  { %2821 = vmatprep.subr.mxu0 %v5472_v18  ;;  %2892 = vmatprep.subr.mxu1 %v5474_v19 }
 0x9f2   :  { %2822 = vmatpush1.msra.mxu0 %v5478_v21  ;;  %2893 = vmatpush1.msra.mxu1 %v5480_v22 }
 0x9f3   :  { %2823 = vmatprep.subr.mxu0 %v5484_v23  ;;  %2894 = vmatprep.subr.mxu1 %v5486_v24 }
 0x9f4   :  { %2824 = vmatpush1.msra.mxu0 %v5490_v26  ;;  %2895 = vmatpush1.msra.mxu1 %v5492_v52 }
 0x9f5   :  { %2825 = vmatprep.subr.mxu0 %v5496_v30  ;;  %2896 = vmatprep.subr.mxu1 %v5498_v31 }
 0x9f6   :  { %2826 = vmatpush1.msra.mxu0 %v5502_v32  ;;  %2897 = vmatpush1.msra.mxu1 %v5504_v33 }
 0x9f7   :  { %2827 = vmatprep.subr.mxu0 %v5508_v34  ;;  %2898 = vmatprep.subr.mxu1 %v5510_v35 }
 0x9f8   :  { %2828 = vmatpush1.msra.mxu0 %v5514_v36  ;;  %2899 = vmatpush1.msra.mxu1 %v6892_v37 }
 0x9f9   :  { %2829 = vmatprep.subr.mxu0 %v6893_v27  ;;  %2900 = vmatprep.subr.mxu1 %v6894_v7 }
 0x9fa   :  { %2830 = vmatpush1.msra.mxu0 %v6895_v60  ;;  %2901 = vmatpush1.msra.mxu1 %v6896_v54 }
 0x9fb   :  { %2831 = vmatprep.subr.mxu0 %v6897_v12  ;;  %2902 = vmatprep.subr.mxu1 %v6898_v8  ;;  %v6920_v12 = vld [vmem:[#allocation34_spill] sm:$0xff] }
 0x9fc   :  { %2832 = vmatpush1.msra.mxu0 %v6899_v45  ;;  %2903 = vmatpush1.msra.mxu1 %v6900_v49  ;;  %v6918_v49 = vld [vmem:[#allocation71_spill] sm:$0xff]  ;;  %v2169_v54 = vadd.f32 %v6920_v12, %v5727_v40 }
 0x9fd   :  { %2833 = vmatprep.subr.mxu0 %v6901_v14  ;;  %2904 = vmatprep.subr.mxu1 %v6902_v5  ;;  %v6912_v14 = vmov 0.0   ;;  %v6913_v5 = vld [vmem:[#allocation28_spill] sm:$0xff] }
 0x9fe   :  { %2834 = vmatpush1.msra.mxu0 %v6903_v10  ;;  %2905 = vmatpush1.msra.mxu1 %v6904_v41  ;;  %v6914_v41 = vld [vmem:[#allocation22_spill] sm:$0xff] }
 0x9ff   :  { %2835 = vmatprep.subr.mxu0 %v6905_v43  ;;  %2906 = vmatprep.subr.mxu1 %v6906_v28  ;;  %v6915_v43 = vld [vmem:[#allocation48_spill] sm:$0xff] }
 0xa00   :  { %2836 = vmatpush1.msra.mxu0 %v6907_v42  ;;  %2907 = vmatpush1.msra.mxu1 %v6908_v39  ;;  %v6916_v28 = vld [vmem:[#allocation68_spill] sm:$0xff]  ;;  %v6917_v42 = vld [vmem:[#allocation33_spill] sm:$0xff] }
 0xa01   :  { %2837 = vmatprep.subr.mxu0 %v6909_v50  ;;  %2908 = vmatprep.subr.mxu1 %v6910_v46  ;;  %v2056_v10 = vadd.f32 %v6917_v42, %v6916_v28  ;;  %v6919_v50 = vld [vmem:[#allocation35_spill] sm:$0xff]  ;;  %v6921_v42 = vld [vmem:[#allocation36_spill] sm:$0xff] }
 0xa02   :  { %2838 = vmatpush1.msra.mxu0 %v6911_v9  ;;  %2871 = vmatprep.mubr.f32.mxu0 %v6912_v14  ;;  %v2058_v45 = vadd.f32 %v6919_v50, %v6918_v49  ;;  %v2171_v28 = vadd.f32 %v6921_v42, %v5733_v6 }
 0xa03   :  { %2909 = vmatpush1.msra.mxu1 %v6913_v5  ;;  %2942 = vmatprep.mubr.f32.mxu1 %v6912_v14 }
 0xa04   :  { %2975 = vmatprep.subr.mxu0 %v6914_v41  ;;  %3046 = vmatprep.subr.mxu1 %v6915_v43 }
 0xaa3   :  { %v2705_v39 = vpop.f32.mrf.mxu0  ;;  %v2776_v8 = vpop.f32.mrf.mxu1 }
 0xaa4   :  { %v2781_v46 = vadd.f32 %v2705_v39, %v2056_v10  ;;  %v2783_v14 = vadd.f32 %v2776_v8, %v2169_v54 }
 0xaa5   :  { %v2707_v9 = vpop.f32.mrf.mxu0  ;;  %v2778_v43 = vpop.f32.mrf.mxu1 }
 0xaa6   :  { %v2785_v5 = vmul.f32 0.5, %v2781_v46  ;;  %v2782_v60 = vadd.f32 %v2707_v9, %v2058_v45  ;;  %v2784_v7 = vadd.f32 %v2778_v43, %v2171_v28 }
 0xaa8   :  { %3931 = vtanh.f32 %v2785_v5  ;;  %v2789_v41 = vmul.f32 0.5, %v2782_v60  ;;  %v2794_v27 = vmul.f32 0.5, %v2784_v7 }
 0xaaa   :  { %3933 = vtanh.f32 %v2789_v41 }
 0xaab   :  { %3935 = vtanh.f32 %v2783_v14 }
 0xaac   :  { %3937 = vtanh.f32 %v2794_v27 }
 0xab5   :  { %v3932_v50 = vpop.eup %3931 }
 0xab6   :  { %v2787_v10 = vadd.f32 1.0, %v3932_v50 }
 0xab7   :  { %v3934_v39 = vpop.eup %3933 }
 0xab8   :  { %v2788_v49 = vmul.f32 0.5, %v2787_v10  ;;  %v2791_v37 = vadd.f32 1.0, %v3934_v39  ;;  %v3936_v12 = vpop.eup %3935 }
 0xab9   :  { %v3938_v8 = vpop.eup %3937 }
 0xaba   :  { %v2792_v46 = vmul.f32 0.5, %v2791_v37  ;;  %v2799_v45 = vmul.f32 %v3936_v12, %v2788_v49  ;;  %v2796_v14 = vadd.f32 1.0, %v3938_v8 }
 0xabc   :  { %v2798_v54 = vmul.f32 %v2792_v46, %v5814_v13  ;;  %v2797_v5 = vmul.f32 0.5, %v2796_v14  ;;  %v6951_v13 = vld [vmem:[#allocation40_spill] sm:$0xff] }
 0xabd   :  { %v2177_v37 = vadd.f32 %v6951_v13, %v5733_v6  ;;  %v6091_v13 = vld [vmem:[#allocation12 + $0xa8] sm:$0xff] }
 0xabe   :  { %v5892_v60 = vadd.f32 %v2799_v45, %v2798_v54 }
 0xac0   :  { %3939 = vtanh.f32 %v5892_v60 }
 0xacd   :  { %v3940_v28 = vpop.eup %3939 }
 0xace   :  { %v2802_v7 = vmul.f32 %v3940_v28, %v2797_v5 }
 0xad0   :  { %2872 = vmatmul.mubr.f32.vlgmr.msra.gmra.mxu0 %v2802_v7  ;;  %2943 = vmatmul.mubr.f32.vlgmr.msra.gmra.mxu1 %v2802_v7  ;;  %v5977_v7 = vld [vmem:[#allocation12 + $0x1e0] sm:$0xff] }
 0xad1   :  { %2976 = vmatpush1.msra.mxu0 %v5394_v44  ;;  %3047 = vmatpush1.msra.mxu1 %v5396_v53  ;;  %v6922_v44 = vld [vmem:[#allocation50_spill] sm:$0xff]  ;;  %v6923_v53 = vld [vmem:[#allocation49_spill] sm:$0xff] }
 0xad2   :  { %2977 = vmatprep.subr.mxu0 %v5400_v25  ;;  %3048 = vmatprep.subr.mxu1 %v5402_v48  ;;  %v6924_v25 = vld [vmem:[#allocation51_spill] sm:$0xff]  ;;  %v6925_v48 = vld [vmem:[#allocation52_spill] sm:$0xff] }
 0xad3   :  { %2978 = vmatpush1.msra.mxu0 %v5406_v59  ;;  %3049 = vmatpush1.msra.mxu1 %v5408_v55  ;;  %v6926_v59 = vld [vmem:[#allocation54_spill] sm:$0xff]  ;;  %v6927_v55 = vld [vmem:[#allocation53_spill] sm:$0xff] }
 0xad4   :  { %2979 = vmatprep.subr.mxu0 %v5412_v20  ;;  %3050 = vmatprep.subr.mxu1 %v5414_v57  ;;  %v6928_v20 = vld [vmem:[#allocation55_spill] sm:$0xff]  ;;  %v6929_v57 = vld [vmem:[#allocation56_spill] sm:$0xff] }
 0xad5   :  { %2980 = vmatpush1.msra.mxu0 %v5418_v61  ;;  %3051 = vmatpush1.msra.mxu1 %v5420_v0  ;;  %v6930_v61 = vld [vmem:[#allocation58_spill] sm:$0xff]  ;;  %v6931_v0 = vld [vmem:[#allocation57_spill] sm:$0xff] }
 0xad6   :  { %2981 = vmatprep.subr.mxu0 %v5424_v62  ;;  %3052 = vmatprep.subr.mxu1 %v5426_v2  ;;  %v6932_v62 = vld [vmem:[#allocation59_spill] sm:$0xff]  ;;  %v6933_v2 = vld [vmem:[#allocation46_spill] sm:$0xff] }
 0xad7   :  { %2982 = vmatpush1.msra.mxu0 %v5430_v29  ;;  %3053 = vmatpush1.msra.mxu1 %v5432_v58  ;;  %v6934_v29 = vld [vmem:[#allocation45_spill] sm:$0xff]  ;;  %v6935_v58 = vld [vmem:[#allocation60_spill] sm:$0xff] }
 0xad8   :  { %2983 = vmatprep.subr.mxu0 %v5436_v47  ;;  %3054 = vmatprep.subr.mxu1 %v5438_v1  ;;  %v6936_v47 = vld [vmem:[#allocation62_spill] sm:$0xff]  ;;  %v6937_v1 = vld [vmem:[#allocation61_spill] sm:$0xff] }
 0xad9   :  { %2984 = vmatpush1.msra.mxu0 %v5442_v63  ;;  %3055 = vmatpush1.msra.mxu1 %v5444_v11  ;;  %v6938_v63 = vld [vmem:[#allocation63_spill] sm:$0xff]  ;;  %v6939_v11 = vld [vmem:[#allocation25_spill] sm:$0xff] }
 0xada   :  { %2985 = vmatprep.subr.mxu0 %v5448_v38  ;;  %3056 = vmatprep.subr.mxu1 %v5450_v56  ;;  %v6940_v38 = vld [vmem:[#allocation26_spill] sm:$0xff]  ;;  %v6941_v56 = vld [vmem:[#allocation27_spill] sm:$0xff] }
 0xadb   :  { %2986 = vmatpush1.msra.mxu0 %v5454_v51  ;;  %3057 = vmatpush1.msra.mxu1 %v5456_v4  ;;  %v6942_v51 = vmov 0.0   ;;  %v6943_v4 = vld [vmem:[#allocation28_spill] sm:$0xff] }
 0xadc   :  { %2987 = vmatprep.subr.mxu0 %v5458_v3  ;;  %3058 = vmatprep.subr.mxu1 %v5462_v15  ;;  %v5959_v3 = vld [vmem:[#allocation12 + $0x1e8] sm:$0xff]  ;;  %v5962_v15 = vld [vmem:[#allocation12 + $0x1f8] sm:$0xff] }
 0xadd   :  { %2988 = vmatpush1.msra.mxu0 %v5464_v16  ;;  %3059 = vmatpush1.msra.mxu1 %v5466_v17  ;;  %6944 = vst [vmem:[#allocation29_spill] sm:$0xff] %v5959_v3  ;;  %6945 = vst [vmem:[#allocation31_spill] sm:$0xff] %v5962_v15  ;;  %v6946_v16 = vld [vmem:[#allocation68_spill] sm:$0xff]  ;;  %v6947_v17 = vld [vmem:[#allocation37_spill] sm:$0xff] }
 0xade   :  { %2989 = vmatprep.subr.mxu0 %v5472_v18  ;;  %3060 = vmatprep.subr.mxu1 %v5474_v19  ;;  %v2062_v18 = vadd.f32 %v6947_v17, %v6946_v16  ;;  %v6046_v17 = vld [vmem:[#allocation12 + $0x138] sm:$0xff] }
 0xadf   :  { %2990 = vmatpush1.msra.mxu0 %v5478_v21  ;;  %3061 = vmatpush1.msra.mxu1 %v5480_v22  ;;  %v6948_v21 = vld [vmem:[#allocation71_spill] sm:$0xff] }
 0xae0   :  { %2991 = vmatprep.subr.mxu0 %v5484_v23  ;;  %3062 = vmatprep.subr.mxu1 %v5486_v24  ;;  %v6949_v22 = vld [vmem:[#allocation39_spill] sm:$0xff] }
 0xae1   :  { %2992 = vmatpush1.msra.mxu0 %v5490_v26  ;;  %3063 = vmatpush1.msra.mxu1 %v5492_v52  ;;  %v2064_v23 = vadd.f32 %v6949_v22, %v6948_v21  ;;  %v6055_v22 = vld [vmem:[#allocation12 + $0x108] sm:$0xff] }
 0xae2   :  { %2993 = vmatprep.subr.mxu0 %v5496_v30  ;;  %3064 = vmatprep.subr.mxu1 %v5498_v31  ;;  %v6950_v30 = vld [vmem:[#allocation38_spill] sm:$0xff] }
 0xae3   :  { %2994 = vmatpush1.msra.mxu0 %v5502_v32  ;;  %3065 = vmatpush1.msra.mxu1 %v5504_v33  ;;  %v2175_v31 = vadd.f32 %v6950_v30, %v5727_v40  ;;  %v6070_v30 = vld [vmem:[#allocation12 + $0xf8] sm:$0xff] }
 0xae4   :  { %2995 = vmatprep.subr.mxu0 %v5508_v34  ;;  %3066 = vmatprep.subr.mxu1 %v5510_v35 }
 0xae5   :  { %2996 = vmatpush1.msra.mxu0 %v5514_v36  ;;  %3067 = vmatpush1.msra.mxu1 %v6922_v44  ;;  %v5980_v44 = vld [vmem:[#allocation12 + $0x1f0] sm:$0xff] }
 0xae6   :  { %2997 = vmatprep.subr.mxu0 %v6923_v53  ;;  %3068 = vmatprep.subr.mxu1 %v6924_v25  ;;  %v5986_v53 = vld [vmem:[#allocation12 + $0x1d8] sm:$0xff]  ;;  %v5989_v25 = vld [vmem:[#allocation12 + $0x1c0] sm:$0xff] }
 0xae7   :  { %2998 = vmatpush1.msra.mxu0 %v6925_v48  ;;  %3069 = vmatpush1.msra.mxu1 %v6926_v59  ;;  %v5992_v48 = vld [vmem:[#allocation12 + $0x1d0] sm:$0xff]  ;;  %v5995_v59 = vld [vmem:[#allocation12 + $0x1a8] sm:$0xff] }
 0xae8   :  { %2999 = vmatprep.subr.mxu0 %v6927_v55  ;;  %3070 = vmatprep.subr.mxu1 %v6928_v20  ;;  %v5998_v55 = vld [vmem:[#allocation12 + $0x1b8] sm:$0xff]  ;;  %v6001_v20 = vld [vmem:[#allocation12 + $0x1a0] sm:$0xff] }
 0xae9   :  { %3000 = vmatpush1.msra.mxu0 %v6929_v57  ;;  %3071 = vmatpush1.msra.mxu1 %v6930_v61  ;;  %v6004_v57 = vld [vmem:[#allocation12 + $0x1b0] sm:$0xff]  ;;  %v6007_v61 = vld [vmem:[#allocation12 + $0x188] sm:$0xff] }
 0xaea   :  { %3001 = vmatprep.subr.mxu0 %v6931_v0  ;;  %3072 = vmatprep.subr.mxu1 %v6932_v62  ;;  %v6010_v0 = vld [vmem:[#allocation12 + $0x198] sm:$0xff]  ;;  %v6013_v62 = vld [vmem:[#allocation12 + $0x180] sm:$0xff] }
 0xaeb   :  { %3002 = vmatpush1.msra.mxu0 %v6933_v2  ;;  %3073 = vmatpush1.msra.mxu1 %v6934_v29  ;;  %v6016_v2 = vld [vmem:[#allocation12 + $0x190] sm:$0xff]  ;;  %v6019_v29 = vld [vmem:[#allocation12 + $0x168] sm:$0xff] }
 0xaec   :  { %3003 = vmatprep.subr.mxu0 %v6935_v58  ;;  %3074 = vmatprep.subr.mxu1 %v6936_v47  ;;  %v6022_v58 = vld [vmem:[#allocation12 + $0x178] sm:$0xff]  ;;  %v6025_v47 = vld [vmem:[#allocation12 + $0x160] sm:$0xff] }
 0xaed   :  { %3004 = vmatpush1.msra.mxu0 %v6937_v1  ;;  %3075 = vmatpush1.msra.mxu1 %v6938_v63  ;;  %v6028_v1 = vld [vmem:[#allocation12 + $0x170] sm:$0xff]  ;;  %v6031_v63 = vld [vmem:[#allocation12 + $0x148] sm:$0xff] }
 0xaee   :  { %3005 = vmatprep.subr.mxu0 %v6939_v11  ;;  %3076 = vmatprep.subr.mxu1 %v6940_v38  ;;  %v6034_v11 = vld [vmem:[#allocation12 + $0x158] sm:$0xff]  ;;  %v6037_v38 = vld [vmem:[#allocation12 + $0x140] sm:$0xff] }
 0xaef   :  { %3006 = vmatpush1.msra.mxu0 %v6941_v56  ;;  %3039 = vmatprep.mubr.f32.mxu0 %v6942_v51  ;;  %v6040_v56 = vld [vmem:[#allocation12 + $0x150] sm:$0xff] }
 0xaf0   :  { %3077 = vmatpush1.msra.mxu1 %v6943_v4  ;;  %3110 = vmatprep.mubr.f32.mxu1 %v6942_v51  ;;  %v6043_v4 = vld [vmem:[#allocation12 + $0x128] sm:$0xff] }
 0xaf1   :  { %3143 = vmatprep.subr.mxu0 %v5959_v3  ;;  %3214 = vmatprep.subr.mxu1 %v5962_v15 }
 0xb90   :  { %v2873_v19 = vpop.f32.mrf.mxu0  ;;  %v2944_v26 = vpop.f32.mrf.mxu1 }
 0xb91   :  { %v2949_v24 = vadd.f32 %v2873_v19, %v2062_v18  ;;  %v2951_v34 = vadd.f32 %v2944_v26, %v2175_v31  ;;  %v6049_v18 = vld [vmem:[#allocation12 + $0x120] sm:$0xff]  ;;  %v6052_v19 = vld [vmem:[#allocation12 + $0x130] sm:$0xff] }
 0xb92   :  { %v2875_v52 = vpop.f32.mrf.mxu0  ;;  %v2946_v36 = vpop.f32.mrf.mxu1  ;;  %v6064_v26 = vld [vmem:[#allocation12 + $0x110] sm:$0xff]  ;;  %v6073_v31 = vld [vmem:[#allocation12 + $0xe0] sm:$0xff] }
 0xb93   :  { %v2953_v32 = vmul.f32 0.5, %v2949_v24  ;;  %v2950_v33 = vadd.f32 %v2875_v52, %v2064_v23  ;;  %v2952_v27 = vadd.f32 %v2946_v36, %v2177_v37  ;;  %v6058_v23 = vld [vmem:[#allocation12 + $0x118] sm:$0xff]  ;;  %v6061_v24 = vld [vmem:[#allocation12 + $0x100] sm:$0xff]  ;;  %v6067_v52 = vld [vmem:[#allocation12 + $0xe8] sm:$0xff] }
 0xb94   :  { %v6088_v36 = vld [vmem:[#allocation12 + $0xd0] sm:$0xff]  ;;  %v6094_v37 = vld [vmem:[#allocation12 + $0xb8] sm:$0xff] }
 0xb95   :  { %3941 = vtanh.f32 %v2953_v32  ;;  %v2957_v35 = vmul.f32 0.5, %v2950_v33  ;;  %v2962_v49 = vmul.f32 0.5, %v2952_v27  ;;  %v6076_v32 = vld [vmem:[#allocation12 + $0xf0] sm:$0xff]  ;;  %v6079_v33 = vld [vmem:[#allocation12 + $0xc8] sm:$0xff]  ;;  %v6097_v27 = vld [vmem:[#allocation12 + $0xa0] sm:$0xff] }
 0xb97   :  { %3943 = vtanh.f32 %v2957_v35  ;;  %v6085_v35 = vld [vmem:[#allocation12 + $0xc0] sm:$0xff] }
 0xb98   :  { %3945 = vtanh.f32 %v2951_v34  ;;  %v6082_v34 = vld [vmem:[#allocation12 + $0xd8] sm:$0xff] }
 0xb99   :  { %3947 = vtanh.f32 %v2962_v49  ;;  %v6100_v49 = vld [vmem:[#allocation12 + $0xb0] sm:$0xff] }
 0xb9a   :  { %6952 = vst [vmem:[#allocation30_spill] sm:$0xff] %v6100_v49 }
 0xba2   :  { %v3942_v9 = vpop.eup %3941 }
 0xba3   :  { %v2955_v41 = vadd.f32 1.0, %v3942_v9  ;;  %v6103_v9 = vld [vmem:[#allocation12 + $0x88] sm:$0xff] }
 0xba4   :  { %v3944_v43 = vpop.eup %3943  ;;  %6953 = vst [vmem:[#allocation32_spill] sm:$0xff] %v6103_v9 }
 0xba5   :  { %v2956_v42 = vmul.f32 0.5, %v2955_v41  ;;  %v2959_v50 = vadd.f32 1.0, %v3944_v43  ;;  %v3946_v10 = vpop.eup %3945  ;;  %v6106_v41 = vld [vmem:[#allocation12 + $0x98] sm:$0xff]  ;;  %v6109_v43 = vld [vmem:[#allocation12 + $0x80] sm:$0xff] }
 0xba6   :  { %v3948_v54 = vpop.eup %3947  ;;  %6954 = vst [vmem:[#allocation22_spill] sm:$0xff] %v6106_v41  ;;  %6955 = vst [vmem:[#allocation48_spill] sm:$0xff] %v6109_v43 }
 0xba7   :  { %v2960_v39 = vmul.f32 0.5, %v2959_v50  ;;  %v2967_v12 = vmul.f32 %v3946_v10, %v2956_v42  ;;  %v2964_v8 = vadd.f32 1.0, %v3948_v54  ;;  %v6112_v42 = vld [vmem:[#allocation12 + $0x90] sm:$0xff]  ;;  %v6115_v50 = vld [vmem:[#allocation12 + $0x68] sm:$0xff]  ;;  %v6118_v10 = vld [vmem:[#allocation12 + $0x78] sm:$0xff] }
 0xba8   :  { %6956 = vst [vmem:[#allocation33_spill] sm:$0xff] %v6112_v42  ;;  %6957 = vst [vmem:[#allocation35_spill] sm:$0xff] %v6115_v50  ;;  %v6130_v54 = vld [vmem:[#allocation12 + $0x58] sm:$0xff] }
 0xba9   :  { %v2966_v46 = vmul.f32 %v2960_v39, %v5892_v60  ;;  %v2965_v14 = vmul.f32 0.5, %v2964_v8  ;;  %v5983_v60 = vld [vmem:[#allocation12 + $0x1c8] sm:$0xff]  ;;  %6958 = vst [vmem:[#allocation34_spill] sm:$0xff] %v6118_v10  ;;  %v6121_v39 = vld [vmem:[#allocation12 + $0x60] sm:$0xff]  ;;  %6962 = vst [vmem:[#allocation51_spill] sm:$0xff] %v6130_v54 }
 0xbaa   :  { %6959 = vst [vmem:[#allocation36_spill] sm:$0xff] %v6121_v39  ;;  %v6133_v8 = vld [vmem:[#allocation12 + $0x40] sm:$0xff] }
 0xbab   :  { %v5974_v45 = vadd.f32 %v2967_v12, %v2966_v46  ;;  %v6124_v12 = vld [vmem:[#allocation12 + $0x70] sm:$0xff]  ;;  %v6127_v46 = vld [vmem:[#allocation12 + $0x48] sm:$0xff]  ;;  %6963 = vst [vmem:[#allocation52_spill] sm:$0xff] %v6133_v8 }
 0xbac   :  { %6960 = vst [vmem:[#allocation50_spill] sm:$0xff] %v6124_v12  ;;  %6961 = vst [vmem:[#allocation49_spill] sm:$0xff] %v6127_v46 }
 0xbad   :  { %3949 = vtanh.f32 %v5974_v45 }
 0xbba   :  { %v3950_v5 = vpop.eup %3949 }
 0xbbb   :  { %v2970_v28 = vmul.f32 %v3950_v5, %v2965_v14  ;;  %v6136_v14 = vld [vmem:[#allocation12 + $0x50] sm:$0xff]  ;;  %v6139_v5 = vld [vmem:[#allocation12 + $0x28] sm:$0xff] }
 0xbbc   :  { %6964 = vst [vmem:[#allocation54_spill] sm:$0xff] %v6136_v14  ;;  %6965 = vst [vmem:[#allocation53_spill] sm:$0xff] %v6139_v5 }
 0xbbd   :  { %3040 = vmatmul.mubr.f32.vlgmr.msra.gmra.mxu0 %v2970_v28  ;;  %3111 = vmatmul.mubr.f32.vlgmr.msra.gmra.mxu1 %v2970_v28  ;;  %v6142_v28 = vld [vmem:[#allocation12 + $0x38] sm:$0xff] }
 0xbbe   :  { %3144 = vmatpush1.msra.mxu0 %v5977_v7  ;;  %3215 = vmatpush1.msra.mxu1 %v5980_v44  ;;  %6966 = vst [vmem:[#allocation55_spill] sm:$0xff] %v6142_v28 }
 0xbbf   :  { %3145 = vmatprep.subr.mxu0 %v5983_v60  ;;  %3216 = vmatprep.subr.mxu1 %v5986_v53 }
 0xbc0   :  { %3146 = vmatpush1.msra.mxu0 %v5989_v25  ;;  %3217 = vmatpush1.msra.mxu1 %v5992_v48 }
 0xbc1   :  { %3147 = vmatprep.subr.mxu0 %v5995_v59  ;;  %3218 = vmatprep.subr.mxu1 %v5998_v55 }
 0xbc2   :  { %3148 = vmatpush1.msra.mxu0 %v6001_v20  ;;  %3219 = vmatpush1.msra.mxu1 %v6004_v57 }
 0xbc3   :  { %3149 = vmatprep.subr.mxu0 %v6007_v61  ;;  %3220 = vmatprep.subr.mxu1 %v6010_v0 }
 0xbc4   :  { %3150 = vmatpush1.msra.mxu0 %v6013_v62  ;;  %3221 = vmatpush1.msra.mxu1 %v6016_v2 }
 0xbc5   :  { %3151 = vmatprep.subr.mxu0 %v6019_v29  ;;  %3222 = vmatprep.subr.mxu1 %v6022_v58 }
 0xbc6   :  { %3152 = vmatpush1.msra.mxu0 %v6025_v47  ;;  %3223 = vmatpush1.msra.mxu1 %v6028_v1 }
 0xbc7   :  { %3153 = vmatprep.subr.mxu0 %v6031_v63  ;;  %3224 = vmatprep.subr.mxu1 %v6034_v11 }
 0xbc8   :  { %3154 = vmatpush1.msra.mxu0 %v6037_v38  ;;  %3225 = vmatpush1.msra.mxu1 %v6040_v56 }
 0xbc9   :  { %3155 = vmatprep.subr.mxu0 %v6043_v4  ;;  %3226 = vmatprep.subr.mxu1 %v6046_v17 }
 0xbca   :  { %3156 = vmatpush1.msra.mxu0 %v6049_v18  ;;  %3227 = vmatpush1.msra.mxu1 %v6052_v19 }
 0xbcb   :  { %3157 = vmatprep.subr.mxu0 %v6055_v22  ;;  %3228 = vmatprep.subr.mxu1 %v6058_v23 }
 0xbcc   :  { %3158 = vmatpush1.msra.mxu0 %v6061_v24  ;;  %3229 = vmatpush1.msra.mxu1 %v6064_v26 }
 0xbcd   :  { %3159 = vmatprep.subr.mxu0 %v6067_v52  ;;  %3230 = vmatprep.subr.mxu1 %v6070_v30 }
 0xbce   :  { %3160 = vmatpush1.msra.mxu0 %v6073_v31  ;;  %3231 = vmatpush1.msra.mxu1 %v6076_v32 }
 0xbcf   :  { %3161 = vmatprep.subr.mxu0 %v6079_v33  ;;  %3232 = vmatprep.subr.mxu1 %v6082_v34 }
 0xbd0   :  { %3162 = vmatpush1.msra.mxu0 %v6085_v35  ;;  %3233 = vmatpush1.msra.mxu1 %v6088_v36 }
 0xbd1   :  { %3163 = vmatprep.subr.mxu0 %v6091_v13  ;;  %3234 = vmatprep.subr.mxu1 %v6094_v37 }
 0xbd2   :  { %3164 = vmatpush1.msra.mxu0 %v6097_v27  ;;  %3235 = vmatpush1.msra.mxu1 %v6100_v49 }
 0xbd3   :  { %3165 = vmatprep.subr.mxu0 %v6103_v9  ;;  %3236 = vmatprep.subr.mxu1 %v6106_v41 }
 0xbd4   :  { %3166 = vmatpush1.msra.mxu0 %v6109_v43  ;;  %3237 = vmatpush1.msra.mxu1 %v6112_v42 }
 0xbd5   :  { %3167 = vmatprep.subr.mxu0 %v6115_v50  ;;  %3238 = vmatprep.subr.mxu1 %v6118_v10  ;;  %v6975_v50 = vld [vmem:[#allocation42_spill] sm:$0xff] }
 0xbd6   :  { %3168 = vmatpush1.msra.mxu0 %v6121_v39  ;;  %3239 = vmatpush1.msra.mxu1 %v6124_v12  ;;  %v2181_v42 = vadd.f32 %v6975_v50, %v5727_v40 }
 0xbd7   :  { %3169 = vmatprep.subr.mxu0 %v6127_v46  ;;  %3240 = vmatprep.subr.mxu1 %v6130_v54  ;;  %v6145_v46 = vld [vmem:[#allocation12 + $0x20] sm:$0xff]  ;;  %v6148_v54 = vld [vmem:[#allocation12 + $0x30] sm:$0xff] }
 0xbd8   :  { %3170 = vmatpush1.msra.mxu0 %v6133_v8  ;;  %3241 = vmatpush1.msra.mxu1 %v6136_v14  ;;  %6967 = vst [vmem:[#allocation56_spill] sm:$0xff] %v6145_v46  ;;  %6968 = vst [vmem:[#allocation58_spill] sm:$0xff] %v6148_v54  ;;  %v6151_v8 = vld [vmem:[#allocation12 + $0x8] sm:$0xff]  ;;  %v6154_v14 = vld [vmem:[#allocation12 + $0x18] sm:$0xff] }
 0xbd9   :  { %3171 = vmatprep.subr.mxu0 %v6139_v5  ;;  %3242 = vmatprep.subr.mxu1 %v6142_v28  ;;  %6969 = vst [vmem:[#allocation57_spill] sm:$0xff] %v6151_v8  ;;  %6970 = vst [vmem:[#allocation59_spill] sm:$0xff] %v6154_v14  ;;  %v6157_v5 = vld [vmem:[#allocation12] sm:$0xff]  ;;  %v6161_v28 = vld [vmem:[#allocation12 + $0x10] sm:$0xff] }
 0xbda   :  { %3172 = vmatpush1.msra.mxu0 %v6145_v46  ;;  %3243 = vmatpush1.msra.mxu1 %v6148_v54  ;;  %6971 = vst [vmem:[#allocation46_spill] sm:$0xff] %v6157_v5  ;;  %6972 = vst [vmem:[#allocation45_spill] sm:$0xff] %v6161_v28  ;;  %v6974_v46 = vld [vmem:[#allocation43_spill] sm:$0xff] }
 0xbdb   :  { %3173 = vmatprep.subr.mxu0 %v6151_v8  ;;  %3244 = vmatprep.subr.mxu1 %v6154_v14  ;;  %v6973_v8 = vld [vmem:[#allocation41_spill] sm:$0xff]  ;;  %v2070_v12 = vadd.f32 %v6974_v46, %v6948_v21 }
 0xbdc   :  { %3174 = vmatpush1.msra.mxu0 %v6157_v5  ;;  %3207 = vmatprep.mubr.f32.mxu0 %v6942_v51  ;;  %v2068_v54 = vadd.f32 %v6973_v8, %v6946_v16  ;;  %v6976_v8 = vld [vmem:[#allocation64_spill] sm:$0xff] }
 0xbdd   :  { %3245 = vmatpush1.msra.mxu1 %v6161_v28  ;;  %3278 = vmatprep.mubr.f32.mxu1 %v6942_v51  ;;  %v2183_v16 = vadd.f32 %v6976_v8, %v5733_v6  ;;  %v6984_v8 = vld [vmem:[#allocation36_spill] sm:$0xff] }
 0xbde   :  { %3311 = vmatprep.subr.mxu0 %v5959_v3  ;;  %3382 = vmatprep.subr.mxu1 %v5962_v15 }
 0xc7d   :  { %v3041_v14 = vpop.f32.mrf.mxu0  ;;  %v3112_v39 = vpop.f32.mrf.mxu1 }
 0xc7e   :  { %v3117_v5 = vadd.f32 %v3041_v14, %v2068_v54  ;;  %v3119_v51 = vadd.f32 %v3112_v39, %v2181_v42 }
 0xc7f   :  { %v3043_v10 = vpop.f32.mrf.mxu0  ;;  %v3114_v15 = vpop.f32.mrf.mxu1 }
 0xc80   :  { %v3121_v28 = vmul.f32 0.5, %v3117_v5  ;;  %v3118_v43 = vadd.f32 %v3043_v10, %v2070_v12  ;;  %v3120_v41 = vadd.f32 %v3114_v15, %v2183_v16  ;;  %v6982_v12 = vld [vmem:[#allocation35_spill] sm:$0xff] }
 0xc82   :  { %3951 = vtanh.f32 %v3121_v28  ;;  %v3125_v3 = vmul.f32 0.5, %v3118_v43  ;;  %v3130_v9 = vmul.f32 0.5, %v3120_v41  ;;  %v6981_v41 = vld [vmem:[#allocation33_spill] sm:$0xff]  ;;  %v6983_v28 = vld [vmem:[#allocation34_spill] sm:$0xff] }
 0xc84   :  { %3953 = vtanh.f32 %v3125_v3 }
 0xc85   :  { %3955 = vtanh.f32 %v3119_v51 }
 0xc86   :  { %3957 = vtanh.f32 %v3130_v9  ;;  %v6980_v9 = vld [vmem:[#allocation48_spill] sm:$0xff] }
 0xc8f   :  { %v3952_v46 = vpop.eup %3951 }
 0xc90   :  { %v3123_v54 = vadd.f32 1.0, %v3952_v46  ;;  %v6985_v46 = vld [vmem:[#allocation50_spill] sm:$0xff] }
 0xc91   :  { %v3954_v14 = vpop.eup %3953 }
 0xc92   :  { %v3124_v21 = vmul.f32 0.5, %v3123_v54  ;;  %v3127_v49 = vadd.f32 1.0, %v3954_v14  ;;  %v3956_v50 = vpop.eup %3955  ;;  %v6986_v54 = vld [vmem:[#allocation49_spill] sm:$0xff]  ;;  %v6987_v14 = vld [vmem:[#allocation51_spill] sm:$0xff] }
 0xc93   :  { %v3958_v51 = vpop.eup %3957 }
 0xc94   :  { %v3128_v5 = vmul.f32 0.5, %v3127_v49  ;;  %v3135_v10 = vmul.f32 %v3956_v50, %v3124_v21  ;;  %v3132_v3 = vadd.f32 1.0, %v3958_v51  ;;  %v6977_v21 = vld [vmem:[#allocation30_spill] sm:$0xff]  ;;  %v6988_v50 = vld [vmem:[#allocation52_spill] sm:$0xff] }
 0xc95   :  { %v6979_v49 = vld [vmem:[#allocation22_spill] sm:$0xff]  ;;  %v6992_v51 = vld [vmem:[#allocation56_spill] sm:$0xff] }
 0xc96   :  { %v3134_v42 = vmul.f32 %v3128_v5, %v5974_v45  ;;  %v3133_v39 = vmul.f32 0.5, %v3132_v3  ;;  %v6978_v45 = vld [vmem:[#allocation32_spill] sm:$0xff]  ;;  %v6989_v5 = vld [vmem:[#allocation54_spill] sm:$0xff] }
 0xc97   :  { %v6993_v3 = vld [vmem:[#allocation58_spill] sm:$0xff] }
 0xc98   :  { %v6176_v43 = vadd.f32 %v3135_v10, %v3134_v42  ;;  %v6990_v10 = vld [vmem:[#allocation53_spill] sm:$0xff]  ;;  %v6991_v42 = vld [vmem:[#allocation55_spill] sm:$0xff] }
 0xc9a   :  { %3959 = vtanh.f32 %v6176_v43 }
 0xca7   :  { %v3960_v15 = vpop.eup %3959 }
 0xca8   :  { %v3138_v16 = vmul.f32 %v3960_v15, %v3133_v39  ;;  %v6994_v39 = vld [vmem:[#allocation57_spill] sm:$0xff]  ;;  %v6995_v15 = vld [vmem:[#allocation59_spill] sm:$0xff] }
 0xcaa   :  { %3208 = vmatmul.mubr.f32.vlgmr.msra.gmra.mxu0 %v3138_v16  ;;  %3279 = vmatmul.mubr.f32.vlgmr.msra.gmra.mxu1 %v3138_v16  ;;  %v6996_v16 = vld [vmem:[#allocation46_spill] sm:$0xff] }
 0xcab   :  { %3312 = vmatpush1.msra.mxu0 %v5977_v7  ;;  %3383 = vmatpush1.msra.mxu1 %v5980_v44 }
 0xcac   :  { %3313 = vmatprep.subr.mxu0 %v5983_v60  ;;  %3384 = vmatprep.subr.mxu1 %v5986_v53 }
 0xcad   :  { %3314 = vmatpush1.msra.mxu0 %v5989_v25  ;;  %3385 = vmatpush1.msra.mxu1 %v5992_v48 }
 0xcae   :  { %3315 = vmatprep.subr.mxu0 %v5995_v59  ;;  %3386 = vmatprep.subr.mxu1 %v5998_v55 }
 0xcaf   :  { %3316 = vmatpush1.msra.mxu0 %v6001_v20  ;;  %3387 = vmatpush1.msra.mxu1 %v6004_v57 }
 0xcb0   :  { %3317 = vmatprep.subr.mxu0 %v6007_v61  ;;  %3388 = vmatprep.subr.mxu1 %v6010_v0 }
 0xcb1   :  { %3318 = vmatpush1.msra.mxu0 %v6013_v62  ;;  %3389 = vmatpush1.msra.mxu1 %v6016_v2 }
 0xcb2   :  { %3319 = vmatprep.subr.mxu0 %v6019_v29  ;;  %3390 = vmatprep.subr.mxu1 %v6022_v58 }
 0xcb3   :  { %3320 = vmatpush1.msra.mxu0 %v6025_v47  ;;  %3391 = vmatpush1.msra.mxu1 %v6028_v1 }
 0xcb4   :  { %3321 = vmatprep.subr.mxu0 %v6031_v63  ;;  %3392 = vmatprep.subr.mxu1 %v6034_v11 }
 0xcb5   :  { %3322 = vmatpush1.msra.mxu0 %v6037_v38  ;;  %3393 = vmatpush1.msra.mxu1 %v6040_v56 }
 0xcb6   :  { %3323 = vmatprep.subr.mxu0 %v6043_v4  ;;  %3394 = vmatprep.subr.mxu1 %v6046_v17 }
 0xcb7   :  { %3324 = vmatpush1.msra.mxu0 %v6049_v18  ;;  %3395 = vmatpush1.msra.mxu1 %v6052_v19 }
 0xcb8   :  { %3325 = vmatprep.subr.mxu0 %v6055_v22  ;;  %3396 = vmatprep.subr.mxu1 %v6058_v23 }
 0xcb9   :  { %3326 = vmatpush1.msra.mxu0 %v6061_v24  ;;  %3397 = vmatpush1.msra.mxu1 %v6064_v26 }
 0xcba   :  { %3327 = vmatprep.subr.mxu0 %v6067_v52  ;;  %3398 = vmatprep.subr.mxu1 %v6070_v30 }
 0xcbb   :  { %3328 = vmatpush1.msra.mxu0 %v6073_v31  ;;  %3399 = vmatpush1.msra.mxu1 %v6076_v32 }
 0xcbc   :  { %3329 = vmatprep.subr.mxu0 %v6079_v33  ;;  %3400 = vmatprep.subr.mxu1 %v6082_v34 }
 0xcbd   :  { %3330 = vmatpush1.msra.mxu0 %v6085_v35  ;;  %3401 = vmatpush1.msra.mxu1 %v6088_v36 }
 0xcbe   :  { %3331 = vmatprep.subr.mxu0 %v6091_v13  ;;  %3402 = vmatprep.subr.mxu1 %v6094_v37 }
 0xcbf   :  { %3332 = vmatpush1.msra.mxu0 %v6097_v27  ;;  %3403 = vmatpush1.msra.mxu1 %v6977_v21 }
 0xcc0   :  { %3333 = vmatprep.subr.mxu0 %v6978_v45  ;;  %3404 = vmatprep.subr.mxu1 %v6979_v49 }
 0xcc1   :  { %3334 = vmatpush1.msra.mxu0 %v6980_v9  ;;  %3405 = vmatpush1.msra.mxu1 %v6981_v41 }
 0xcc2   :  { %3335 = vmatprep.subr.mxu0 %v6982_v12  ;;  %3406 = vmatprep.subr.mxu1 %v6983_v28  ;;  %v7005_v12 = vld [vmem:[#allocation65_spill] sm:$0xff] }
 0xcc3   :  { %3336 = vmatpush1.msra.mxu0 %v6984_v8  ;;  %3407 = vmatpush1.msra.mxu1 %v6985_v46  ;;  %v7003_v46 = vld [vmem:[#allocation71_spill] sm:$0xff]  ;;  %v2187_v41 = vadd.f32 %v7005_v12, %v5727_v40 }
 0xcc4   :  { %3337 = vmatprep.subr.mxu0 %v6986_v54  ;;  %3408 = vmatprep.subr.mxu1 %v6987_v14  ;;  %v6997_v54 = vmov 0.0   ;;  %v6998_v14 = vld [vmem:[#allocation45_spill] sm:$0xff] }
 0xcc5   :  { %3338 = vmatpush1.msra.mxu0 %v6988_v50  ;;  %3409 = vmatpush1.msra.mxu1 %v6989_v5  ;;  %v6999_v5 = vld [vmem:[#allocation29_spill] sm:$0xff] }
 0xcc6   :  { %3339 = vmatprep.subr.mxu0 %v6990_v10  ;;  %3410 = vmatprep.subr.mxu1 %v6991_v42  ;;  %v7000_v10 = vld [vmem:[#allocation31_spill] sm:$0xff]  ;;  %v7001_v42 = vld [vmem:[#allocation68_spill] sm:$0xff] }
 0xcc7   :  { %3340 = vmatpush1.msra.mxu0 %v6992_v51  ;;  %3411 = vmatpush1.msra.mxu1 %v6993_v3  ;;  %v7002_v51 = vld [vmem:[#allocation66_spill] sm:$0xff] }
 0xcc8   :  { %3341 = vmatprep.subr.mxu0 %v6994_v39  ;;  %3412 = vmatprep.subr.mxu1 %v6995_v15  ;;  %v2074_v50 = vadd.f32 %v7002_v51, %v7001_v42  ;;  %v7004_v39 = vld [vmem:[#allocation67_spill] sm:$0xff]  ;;  %v7006_v51 = vld [vmem:[#allocation72_spill] sm:$0xff] }
 0xcc9   :  { %3342 = vmatpush1.msra.mxu0 %v6996_v16  ;;  %3375 = vmatprep.mubr.f32.mxu0 %v6997_v54  ;;  %v2076_v8 = vadd.f32 %v7004_v39, %v7003_v46  ;;  %v2189_v42 = vadd.f32 %v7006_v51, %v5733_v6 }
 0xcca   :  { %3413 = vmatpush1.msra.mxu1 %v6998_v14  ;;  %3446 = vmatprep.mubr.f32.mxu1 %v6997_v54 }
 0xccb   :  { %3479 = vmatprep.subr.mxu0 %v6999_v5  ;;  %3550 = vmatprep.subr.mxu1 %v7000_v10 }
 0xd6a   :  { %v3209_v3 = vpop.f32.mrf.mxu0  ;;  %v3280_v28 = vpop.f32.mrf.mxu1 }
 0xd6b   :  { %v3285_v15 = vadd.f32 %v3209_v3, %v2074_v50  ;;  %v3287_v54 = vadd.f32 %v3280_v28, %v2187_v41 }
 0xd6c   :  { %v3211_v16 = vpop.f32.mrf.mxu0  ;;  %v3282_v10 = vpop.f32.mrf.mxu1 }
 0xd6d   :  { %v3289_v14 = vmul.f32 0.5, %v3285_v15  ;;  %v3286_v9 = vadd.f32 %v3211_v16, %v2076_v8  ;;  %v3288_v49 = vadd.f32 %v3282_v10, %v2189_v42 }
 0xd6f   :  { %3961 = vtanh.f32 %v3289_v14  ;;  %v3293_v5 = vmul.f32 0.5, %v3286_v9  ;;  %v3298_v45 = vmul.f32 0.5, %v3288_v49 }
 0xd71   :  { %3963 = vtanh.f32 %v3293_v5 }
 0xd72   :  { %3965 = vtanh.f32 %v3287_v54 }
 0xd73   :  { %3967 = vtanh.f32 %v3298_v45 }
 0xd7c   :  { %v3962_v39 = vpop.eup %3961 }
 0xd7d   :  { %v3291_v50 = vadd.f32 1.0, %v3962_v39 }
 0xd7e   :  { %v3964_v3 = vpop.eup %3963 }
 0xd7f   :  { %v3292_v46 = vmul.f32 0.5, %v3291_v50  ;;  %v3295_v21 = vadd.f32 1.0, %v3964_v3  ;;  %v3966_v12 = vpop.eup %3965 }
 0xd80   :  { %v3968_v28 = vpop.eup %3967 }
 0xd81   :  { %v3296_v15 = vmul.f32 0.5, %v3295_v21  ;;  %v3303_v8 = vmul.f32 %v3966_v12, %v3292_v46  ;;  %v3300_v54 = vadd.f32 1.0, %v3968_v28 }
 0xd83   :  { %v3302_v41 = vmul.f32 %v3296_v15, %v6176_v43  ;;  %v3301_v14 = vmul.f32 0.5, %v3300_v54 }
 0xd85   :  { %v6254_v9 = vadd.f32 %v3303_v8, %v3302_v41 }
 0xd87   :  { %3969 = vtanh.f32 %v6254_v9 }
 0xd94   :  { %v3970_v42 = vpop.eup %3969 }
 0xd95   :  { %v3306_v49 = vmul.f32 %v3970_v42, %v3301_v14  ;;  %v3659_v14 = vld [vmem:[#allocation13 + $0x78] sm:$0xff]  ;;  %v3658_v42 = vld [vmem:[#allocation13 + $0x70] sm:$0xff] }
 0xd97   :  { %3376 = vmatmul.mubr.f32.vlgmr.msra.gmra.mxu0 %v3306_v49  ;;  %3447 = vmatmul.mubr.f32.vlgmr.msra.gmra.mxu1 %v3306_v49  ;;  %v3656_v49 = vld [vmem:[#allocation13 + $0x60] sm:$0xff] }
 0xd98   :  { %3480 = vmatpush1.msra.mxu0 %v5977_v7  ;;  %3551 = vmatpush1.msra.mxu1 %v5980_v44  ;;  %v7007_v7 = vld [vmem:[#allocation30_spill] sm:$0xff]  ;;  %v7008_v44 = vld [vmem:[#allocation32_spill] sm:$0xff] }
 0xd99   :  { %3481 = vmatprep.subr.mxu0 %v5983_v60  ;;  %3552 = vmatprep.subr.mxu1 %v5986_v53  ;;  %v7009_v60 = vld [vmem:[#allocation22_spill] sm:$0xff]  ;;  %v7010_v53 = vld [vmem:[#allocation48_spill] sm:$0xff] }
 0xd9a   :  { %3482 = vmatpush1.msra.mxu0 %v5989_v25  ;;  %3553 = vmatpush1.msra.mxu1 %v5992_v48  ;;  %v7011_v25 = vld [vmem:[#allocation33_spill] sm:$0xff]  ;;  %v7012_v48 = vld [vmem:[#allocation35_spill] sm:$0xff] }
 0xd9b   :  { %3483 = vmatprep.subr.mxu0 %v5995_v59  ;;  %3554 = vmatprep.subr.mxu1 %v5998_v55  ;;  %v7013_v59 = vld [vmem:[#allocation34_spill] sm:$0xff]  ;;  %v7014_v55 = vld [vmem:[#allocation36_spill] sm:$0xff] }
 0xd9c   :  { %3484 = vmatpush1.msra.mxu0 %v6001_v20  ;;  %3555 = vmatpush1.msra.mxu1 %v6004_v57  ;;  %v7015_v20 = vld [vmem:[#allocation50_spill] sm:$0xff]  ;;  %v7016_v57 = vld [vmem:[#allocation49_spill] sm:$0xff] }
 0xd9d   :  { %3485 = vmatprep.subr.mxu0 %v6007_v61  ;;  %3556 = vmatprep.subr.mxu1 %v6010_v0  ;;  %v7017_v61 = vld [vmem:[#allocation51_spill] sm:$0xff]  ;;  %v7018_v0 = vld [vmem:[#allocation52_spill] sm:$0xff] }
 0xd9e   :  { %3486 = vmatpush1.msra.mxu0 %v6013_v62  ;;  %3557 = vmatpush1.msra.mxu1 %v6016_v2  ;;  %v7019_v62 = vld [vmem:[#allocation54_spill] sm:$0xff]  ;;  %v7020_v2 = vld [vmem:[#allocation53_spill] sm:$0xff] }
 0xd9f   :  { %3487 = vmatprep.subr.mxu0 %v6019_v29  ;;  %3558 = vmatprep.subr.mxu1 %v6022_v58  ;;  %v7021_v29 = vld [vmem:[#allocation55_spill] sm:$0xff]  ;;  %v7022_v58 = vld [vmem:[#allocation56_spill] sm:$0xff] }
 0xda0   :  { %3488 = vmatpush1.msra.mxu0 %v6025_v47  ;;  %3559 = vmatpush1.msra.mxu1 %v6028_v1  ;;  %v7023_v47 = vld [vmem:[#allocation58_spill] sm:$0xff]  ;;  %v7024_v1 = vld [vmem:[#allocation57_spill] sm:$0xff] }
 0xda1   :  { %3489 = vmatprep.subr.mxu0 %v6031_v63  ;;  %3560 = vmatprep.subr.mxu1 %v6034_v11  ;;  %v7025_v63 = vld [vmem:[#allocation59_spill] sm:$0xff]  ;;  %v7026_v11 = vld [vmem:[#allocation46_spill] sm:$0xff] }
 0xda2   :  { %3490 = vmatpush1.msra.mxu0 %v6037_v38  ;;  %3561 = vmatpush1.msra.mxu1 %v6040_v56  ;;  %v7027_v38 = vmov 0.0   ;;  %v7028_v56 = vld [vmem:[#allocation45_spill] sm:$0xff] }
 0xda3   :  { %3491 = vmatprep.subr.mxu0 %v6043_v4  ;;  %3562 = vmatprep.subr.mxu1 %v6046_v17  ;;  %v7029_v4 = vld [vmem:[#allocation68_spill] sm:$0xff]  ;;  %v7030_v17 = vld [vmem:[#allocation23_spill] sm:$0xff] }
 0xda4   :  { %3492 = vmatpush1.msra.mxu0 %v6049_v18  ;;  %3563 = vmatpush1.msra.mxu1 %v6052_v19  ;;  %v2080_v18 = vadd.f32 %v7030_v17, %v7029_v4 }
 0xda5   :  { %3493 = vmatprep.subr.mxu0 %v6055_v22  ;;  %3564 = vmatprep.subr.mxu1 %v6058_v23  ;;  %v7031_v22 = vld [vmem:[#allocation71_spill] sm:$0xff] }
 0xda6   :  { %3494 = vmatpush1.msra.mxu0 %v6061_v24  ;;  %3565 = vmatpush1.msra.mxu1 %v6064_v26  ;;  %v7032_v23 = vld [vmem:[#allocation47_spill] sm:$0xff] }
 0xda7   :  { %3495 = vmatprep.subr.mxu0 %v6067_v52  ;;  %3566 = vmatprep.subr.mxu1 %v6070_v30  ;;  %v2082_v24 = vadd.f32 %v7032_v23, %v7031_v22 }
 0xda8   :  { %3496 = vmatpush1.msra.mxu0 %v6073_v31  ;;  %3567 = vmatpush1.msra.mxu1 %v6076_v32  ;;  %v7033_v31 = vld [vmem:[#allocation24_spill] sm:$0xff] }
 0xda9   :  { %3497 = vmatprep.subr.mxu0 %v6079_v33  ;;  %3568 = vmatprep.subr.mxu1 %v6082_v34  ;;  %v2193_v32 = vadd.f32 %v7033_v31, %v5727_v40 }
 0xdaa   :  { %3498 = vmatpush1.msra.mxu0 %v6085_v35  ;;  %3569 = vmatpush1.msra.mxu1 %v6088_v36 }
 0xdab   :  { %3499 = vmatprep.subr.mxu0 %v6091_v13  ;;  %3570 = vmatprep.subr.mxu1 %v6094_v37  ;;  %v7034_v37 = vld [vmem:[#allocation21_spill] sm:$0xff] }
 0xdac   :  { %3500 = vmatpush1.msra.mxu0 %v6097_v27  ;;  %3571 = vmatpush1.msra.mxu1 %v7007_v7  ;;  %v2195_v27 = vadd.f32 %v7034_v37, %v5733_v6  ;;  %v3655_v7 = vld [vmem:[#allocation13 + $0x58] sm:$0xff] }
 0xdad   :  { %3501 = vmatprep.subr.mxu0 %v7008_v44  ;;  %3572 = vmatprep.subr.mxu1 %v7009_v60  ;;  %v3654_v44 = vld [vmem:[#allocation13 + $0x50] sm:$0xff]  ;;  %v3653_v60 = vld [vmem:[#allocation13 + $0x48] sm:$0xff] }
 0xdae   :  { %3502 = vmatpush1.msra.mxu0 %v7010_v53  ;;  %3573 = vmatpush1.msra.mxu1 %v7011_v25  ;;  %v3652_v53 = vld [vmem:[#allocation13 + $0x40] sm:$0xff]  ;;  %v3651_v25 = vld [vmem:[#allocation13 + $0x38] sm:$0xff] }
 0xdaf   :  { %3503 = vmatprep.subr.mxu0 %v7012_v48  ;;  %3574 = vmatprep.subr.mxu1 %v7013_v59  ;;  %v3650_v48 = vld [vmem:[#allocation13 + $0x30] sm:$0xff]  ;;  %v3649_v59 = vld [vmem:[#allocation13 + $0x28] sm:$0xff] }
 0xdb0   :  { %3504 = vmatpush1.msra.mxu0 %v7014_v55  ;;  %3575 = vmatpush1.msra.mxu1 %v7015_v20  ;;  %v3648_v55 = vld [vmem:[#allocation13 + $0x20] sm:$0xff]  ;;  %v3647_v20 = vld [vmem:[#allocation13 + $0x18] sm:$0xff] }
 0xdb1   :  { %3505 = vmatprep.subr.mxu0 %v7016_v57  ;;  %3576 = vmatprep.subr.mxu1 %v7017_v61  ;;  %v3646_v57 = vld [vmem:[#allocation13 + $0x10] sm:$0xff]  ;;  %v3645_v61 = vld [vmem:[#allocation13 + $0x8] sm:$0xff] }
 0xdb2   :  { %3506 = vmatpush1.msra.mxu0 %v7018_v0  ;;  %3577 = vmatpush1.msra.mxu1 %v7019_v62  ;;  %v3644_v0 = vld [vmem:[#allocation13] sm:$0xff]  ;;  %v7035_v62 = vld [vmem:[#allocation70_spill] sm:$0xff] }
 0xdb3   :  { %3507 = vmatprep.subr.mxu0 %v7020_v2  ;;  %3578 = vmatprep.subr.mxu1 %v7021_v29  ;;  %v2086_v2 = vadd.f32 %v7035_v62, %v7029_v4  ;;  %v7038_v4 = vld [vmem:[#allocation73_spill] sm:$0xff] }
 0xdb4   :  { %3508 = vmatpush1.msra.mxu0 %v7022_v58  ;;  %3579 = vmatpush1.msra.mxu1 %v7023_v47  ;;  %v7036_v58 = vld [vmem:[#allocation44_spill] sm:$0xff] }
 0xdb5   :  { %3509 = vmatprep.subr.mxu0 %v7024_v1  ;;  %3580 = vmatprep.subr.mxu1 %v7025_v63  ;;  %v2088_v47 = vadd.f32 %v7036_v58, %v7031_v22 }
 0xdb6   :  { %3510 = vmatpush1.msra.mxu0 %v7026_v11  ;;  %3543 = vmatprep.mubr.f32.mxu0 %v7027_v38 }
 0xdb7   :  { %3581 = vmatpush1.msra.mxu1 %v7028_v56  ;;  %3614 = vmatprep.mubr.f32.mxu1 %v7027_v38  ;;  %v7037_v56 = vld [vmem:[#allocation69_spill] sm:$0xff] }
 0xdb8   :  { %3783 = vmatprep.subr.mxu0 %v7027_v38  ;;  %v2199_v17 = vadd.f32 %v7037_v56, %v5727_v40 }
 0xe57   :  { %v3377_v19 = vpop.f32.mrf.mxu0  ;;  %v3448_v52 = vpop.f32.mrf.mxu1 }
 0xe58   :  { %v3453_v26 = vadd.f32 %v3377_v19, %v2080_v18  ;;  %v3455_v35 = vadd.f32 %v3448_v52, %v2193_v32 }
 0xe59   :  { %v3379_v30 = vpop.f32.mrf.mxu0  ;;  %v3450_v13 = vpop.f32.mrf.mxu1 }
 0xe5a   :  { %v3457_v33 = vmul.f32 0.5, %v3453_v26  ;;  %v3454_v34 = vadd.f32 %v3379_v30, %v2082_v24  ;;  %v3456_v43 = vadd.f32 %v3450_v13, %v2195_v27  ;;  %v2201_v26 = vadd.f32 %v7038_v4, %v5733_v6 }
 0xe5c   :  { %3971 = vtanh.f32 %v3457_v33  ;;  %v3461_v36 = vmul.f32 0.5, %v3454_v34  ;;  %v3466_v21 = vmul.f32 0.5, %v3456_v43 }
 0xe5e   :  { %3973 = vtanh.f32 %v3461_v36 }
 0xe5f   :  { %3975 = vtanh.f32 %v3455_v35 }
 0xe60   :  { %3977 = vtanh.f32 %v3466_v21 }
 0xe69   :  { %v3972_v45 = vpop.eup %3971 }
 0xe6a   :  { %v3459_v46 = vadd.f32 1.0, %v3972_v45 }
 0xe6b   :  { %v3974_v16 = vpop.eup %3973 }
 0xe6c   :  { %v3460_v5 = vmul.f32 0.5, %v3459_v46  ;;  %v3463_v10 = vadd.f32 1.0, %v3974_v16  ;;  %v3976_v51 = vpop.eup %3975  ;;  %v3765_v16 = vld [vmem:[%s6373_s8] ss:$0 sm:$0xff] }
 0xe6d   :  { %v3978_v15 = vpop.eup %3977 }
 0xe6e   :  { %v3464_v39 = vmul.f32 0.5, %v3463_v10  ;;  %v3471_v50 = vmul.f32 %v3976_v51, %v3460_v5  ;;  %v3468_v8 = vadd.f32 1.0, %v3978_v15 }
 0xe70   :  { %v3470_v3 = vmul.f32 %v3464_v39, %v6254_v9  ;;  %v3469_v41 = vmul.f32 0.5, %v3468_v8  ;;  %v3657_v9 = vld [vmem:[#allocation13 + $0x68] sm:$0xff] }
 0xe72   :  { %v6331_v12 = vadd.f32 %v3471_v50, %v3470_v3 }
 0xe74   :  { %3979 = vtanh.f32 %v6331_v12 }
 0xe81   :  { %v3980_v28 = vpop.eup %3979 }
 0xe82   :  { %v3474_v54 = vmul.f32 %v3980_v28, %v3469_v41 }
 0xe84   :  { %3544 = vmatmul.mubr.f32.vlgmr.msra.gmra.mxu0 %v3474_v54  ;;  %3615 = vmatmul.mubr.f32.vlgmr.msra.gmra.mxu1 %v3474_v54 }
 0xe85   :  { %3784 = vmatpush3.msra.mxu0 %v3659_v14  ;;  %3815 = vmatprep.mubr.msk.f32.mxu0 %vm4284_vm0, %v7027_v38 }
 0xe86   :  { %3785 = vmatprep.subr.mxu0 %v7027_v38 }
 0xe87   :  { %3786 = vmatpush3.msra.mxu0 %v3658_v42 }
 0xe88   :  { %3787 = vmatprep.subr.mxu0 %v7027_v38 }
 0xe89   :  { %3788 = vmatpush3.msra.mxu0 %v3657_v9 }
 0xe8a   :  { %3789 = vmatprep.subr.mxu0 %v7027_v38 }
 0xe8b   :  { %3790 = vmatpush3.msra.mxu0 %v3656_v49 }
 0xe8c   :  { %3791 = vmatprep.subr.mxu0 %v7027_v38 }
 0xe8d   :  { %3792 = vmatpush3.msra.mxu0 %v3655_v7 }
 0xe8e   :  { %3793 = vmatprep.subr.mxu0 %v7027_v38 }
 0xe8f   :  { %3794 = vmatpush3.msra.mxu0 %v3654_v44 }
 0xe90   :  { %3795 = vmatprep.subr.mxu0 %v7027_v38 }
 0xe91   :  { %3796 = vmatpush3.msra.mxu0 %v3653_v60 }
 0xe92   :  { %3797 = vmatprep.subr.mxu0 %v7027_v38 }
 0xe93   :  { %3798 = vmatpush3.msra.mxu0 %v3652_v53 }
 0xe94   :  { %3799 = vmatprep.subr.mxu0 %v7027_v38 }
 0xe95   :  { %3800 = vmatpush3.msra.mxu0 %v3651_v25 }
 0xe96   :  { %3801 = vmatprep.subr.mxu0 %v7027_v38 }
 0xe97   :  { %3802 = vmatpush3.msra.mxu0 %v3650_v48 }
 0xe98   :  { %3803 = vmatprep.subr.mxu0 %v7027_v38 }
 0xe99   :  { %3804 = vmatpush3.msra.mxu0 %v3649_v59 }
 0xe9a   :  { %3805 = vmatprep.subr.mxu0 %v7027_v38 }
 0xe9b   :  { %3806 = vmatpush3.msra.mxu0 %v3648_v55 }
 0xe9c   :  { %3807 = vmatprep.subr.mxu0 %v7027_v38 }
 0xe9d   :  { %3808 = vmatpush3.msra.mxu0 %v3647_v20 }
 0xe9e   :  { %3809 = vmatprep.subr.mxu0 %v7027_v38 }
 0xe9f   :  { %3810 = vmatpush3.msra.mxu0 %v3646_v57 }
 0xea0   :  { %3811 = vmatprep.subr.mxu0 %v7027_v38 }
 0xea1   :  { %3812 = vmatpush3.msra.mxu0 %v3645_v61 }
 0xea2   :  { %3813 = vmatprep.subr.mxu0 %v7027_v38 }
 0xea3   :  { %3814 = vmatpush3.msra.mxu0 %v3644_v0 }
 0xf44   :  { %v3545_v29 = vpop.f32.mrf.mxu0  ;;  %v3616_v63 = vpop.f32.mrf.mxu1 }
 0xf45   :  { %v3621_v1 = vadd.f32 %v3545_v29, %v2086_v2  ;;  %v3623_v23 = vadd.f32 %v3616_v63, %v2199_v17 }
 0xf46   :  { %v3547_v11 = vpop.f32.mrf.mxu0  ;;  %v3618_v38 = vpop.f32.mrf.mxu1 }
 0xf47   :  { %v3625_v18 = vmul.f32 0.5, %v3621_v1  ;;  %v3622_v19 = vadd.f32 %v3547_v11, %v2088_v47  ;;  %v3624_v52 = vadd.f32 %v3618_v38, %v2201_v26 }
 0xf49   :  { %3981 = vtanh.f32 %v3625_v18  ;;  %v3629_v24 = vmul.f32 0.5, %v3622_v19  ;;  %v3634_v30 = vmul.f32 0.5, %v3624_v52 }
 0xf4b   :  { %3983 = vtanh.f32 %v3629_v24 }
 0xf4c   :  { %3985 = vtanh.f32 %v3623_v23 }
 0xf4d   :  { %3987 = vtanh.f32 %v3634_v30 }
 0xf56   :  { %v3982_v22 = vpop.eup %3981 }
 0xf57   :  { %v3627_v31 = vadd.f32 1.0, %v3982_v22 }
 0xf58   :  { %v3984_v32 = vpop.eup %3983 }
 0xf59   :  { %v3628_v33 = vmul.f32 0.5, %v3627_v31  ;;  %v3631_v34 = vadd.f32 1.0, %v3984_v32  ;;  %v3986_v40 = vpop.eup %3985 }
 0xf5a   :  { %v3988_v27 = vpop.eup %3987 }
 0xf5b   :  { %v3632_v35 = vmul.f32 0.5, %v3631_v34  ;;  %v3639_v36 = vmul.f32 %v3986_v40, %v3628_v33  ;;  %v3636_v43 = vadd.f32 1.0, %v3988_v27 }
 0xf5d   :  { %v3638_v13 = vmul.f32 %v3632_v35, %v6331_v12  ;;  %v3637_v21 = vmul.f32 0.5, %v3636_v43 }
 0xf5f   :  { %v3640_v37 = vadd.f32 %v3639_v36, %v3638_v13 }
 0xf61   :  { %3989 = vtanh.f32 %v3640_v37 }
 0xf6e   :  { %v3990_v45 = vpop.eup %3989 }
 0xf6f   :  { %v3642_v6 = vmul.f32 %v3990_v45, %v3637_v21 }
 0xf71   :  { %v3643_v46 = vmax.f32 %v3642_v6, 0.0 }
 0xf73   :  { %3816 = vmatmul.mubr.f32.vlgmr.msra.gmra.mxu0 %v3643_v46 }
0x1033   :  { %v3733_v5 = vpop.f32.mrf.mxu0 }
0x1034   :  { %v3734_v10 = vadd.f32 %v3765_v16, %v3733_v5 }
0x1035   :  { %v3817_v51 = vpop.f32.mrf.mxu0 }
0x1036   :  { %3737 = vmax.xlane.f32.xlu0 %v3734_v10 }
0x10bf   :  { %v3738_v39 = vpop.xlane.xlu0 %3737 }
0x10c0   :  { %v3739_v50 = vsub.f32 %v3734_v10, %v3738_v39 }
0x10c2   :  { %v3740_v3 = vmul.f32 1.442695, %v3739_v50 }
0x10c4   :  { %3991 = vpow2.f32 %v3740_v3 }
0x10d1   :  { %v3992_v12 = vpop.eup %3991 }
0x10d2   :  { %3742 = vadd.xlane.f32.xlu0 %v3992_v12 }
0x115b   :  { %v3743_v15 = vpop.xlane.xlu0 %3742 }
0x115c   :  { %3993 = vrcp.f32 %v3743_v15 }
0x1169   :  { %v3994_v8 = vpop.eup %3993 }
0x116a   :  { %v3745_v41 = vmul.f32 %v3994_v8, %v3992_v12 }
0x116c   :  { %3746 = vst [vmem:[#allocation15] sm:$0xff] %v3745_v41 }
0x116d   :  { %4254 = shalt.err (!%p4251_p6)
}
0x116e   :  { %3756 = dma.vmem_to_hbm [thread:$0]  %s3754_s21, 128, %s6374_s9, [#allocation6]  }
0x116f   :  { %4271 = dma.done.wait [#allocation6], 128  }
0x1170   :  { %4272 = vsyncadd [#allocation6], 4294967168 }
0x1171   :  { %3760 = vsyncpa [#allocation5], 1 }
0x1172   :  { %3761 = vsyncpa [#allocation8], 1 }
0x1173   :  { %3762 = vsyncpa [#allocation11], 1 }
0x1174   :  { %3763 = vsyncpa [#allocation14], 1 }
0x1175   :  { %3764 = vsyncpa [#allocation6], 1 }

</bundles_post_ra>
